<compile_context>
chip_gen: v7x
topology: tpu7x:2x2x1
jax: 0.10.0
libtpu: 0.0.40
codegen_flags: <defaults>
</compile_context>

<pallas_src>
import jax
import jax.numpy as jnp
from jax import lax
from jax.experimental import pallas as pl

_EPS = 1e-12  # torch normalizes by the raw norm; eps only guards all-zero rows

NOR_TOPK_TOTAL = 10
NOR_TOPK = 5
ABN_TOPK_TOTAL = 5
ABN_TOPK = 2


# ----------------------------------------------------------------------------
# In-kernel helpers (all 2-D, slice-free, reshape-free)
# ----------------------------------------------------------------------------
def _rowdot(a, b):
    """a @ b.T without materializing a transpose (contract last dims on MXU)."""
    return lax.dot_general(a, b, dimension_numbers=(((1,), (1,)), ((), ())),
                           preferred_element_type=jnp.float32)


def _softmax_rows(s):
    s = s - jnp.max(s, axis=-1, keepdims=True)
    p = jnp.exp(s)
    return p / jnp.sum(p, axis=-1, keepdims=True)


def _l2_normalize(x):
    return x * lax.rsqrt(jnp.sum(x * x, axis=-1, keepdims=True) + _EPS)


def _self_attn(x):
    """softmax(normalize(x) @ normalize(x)^T) @ x for one (N, F) tile."""
    xn = _l2_normalize(x)
    p = _softmax_rows(_rowdot(xn, xn))
    return jnp.dot(p, x, preferred_element_type=jnp.float32)


def _placement(rows, cols, offset):
    """(rows, cols) f32 matrix M with M[i, offset + i] = 1 (shifted identity)."""
    r = lax.broadcasted_iota(jnp.int32, (rows, cols), 0)
    c = lax.broadcasted_iota(jnp.int32, (rows, cols), 1)
    return (c == r + offset).astype(jnp.float32)


def _topk_row(x, k, largest, want_vals, want_hot):
    """Unrolled top-k over a tiny (1, N) row.

    Returns (vals, hot): vals (1, k) in torch.topk order (descending for
    largest=True, ascending for largest=False); hot (k, N) one-hot selection
    matrix whose row t picks the t-th selected element.  Ties take the lowest
    index.  Built purely from iota / compare / where / lane reductions so it
    lowers cleanly on every TPU generation (no concat / reshape / slicing).
    """
    n = x.shape[-1]
    lane_n = lax.broadcasted_iota(jnp.int32, (1, n), 1)
    lane_k = lax.broadcasted_iota(jnp.int32, (1, k), 1) if want_vals else None
    row_kn = lax.broadcasted_iota(jnp.int32, (k, n), 0) if want_hot else None
    lane_kn = lax.broadcasted_iota(jnp.int32, (k, n), 1) if want_hot else None
    fill = jnp.float32(-jnp.inf) if largest else jnp.float32(jnp.inf)

    cur = x
    vals = jnp.zeros((1, k), jnp.float32) if want_vals else None
    hot = jnp.zeros((k, n), jnp.float32) if want_hot else None
    for t in range(k):
        if largest:
            v = jnp.max(cur, axis=-1, keepdims=True)               # (1, 1)
        else:
            v = jnp.min(cur, axis=-1, keepdims=True)               # (1, 1)
        idx = jnp.min(jnp.where(cur == v, lane_n, n), axis=-1, keepdims=True)
        if want_vals:
            vals = vals + jnp.where(lane_k == t, v, 0.0)
        if want_hot:
            hot = hot + jnp.where((row_kn == t) & (lane_kn == idx), 1.0, 0.0)
        cur = jnp.where(lane_n == idx, fill, cur)
    return vals, hot


# ----------------------------------------------------------------------------
# The single fused LPN forward kernel
# ----------------------------------------------------------------------------
def _lpn_fused_kernel(nor_ref, fcn_ref, fca_ref, sca_ref, fh_ref,
                      wq_ref, bq_ref, wk_ref, bk_ref,
                      nsh_ref, stn_ref, sta_ref, onor_ref, ofn_ref, ofa_ref):
    B, N1, F = fcn_ref.shape
    N2 = fca_ref.shape[1]
    Nh = fh_ref.shape[1]
    Nq = N1 + N2
    Nt = Nq + Nh

    # Batch-invariant loads / constants hoisted out of the (unrolled) batch loop.
    wq = wq_ref[...]                      # (F, F) torch layout (out, in)
    bq = bq_ref[...]                      # (1, F)
    wk = wk_ref[...]
    bk = bk_ref[...]
    s_abn2q = _placement(N2, Nq, N1)      # places score_conf_abn after N1 zeros
    embed_q = _placement(Nq, Nt, 0)       # first Nq slots of score_total
    embed_h = _placement(Nh, Nt, Nq)      # last Nh slots of score_total

    for b in range(B):   # B is tiny: unrolled inside ONE grid step (no per-step cost)
        # --- fq / fk projections (torch Linear: x @ W^T + b) -----------------
        x_q = jnp.concatenate([fcn_ref[b], fca_ref[b]], axis=0)     # (Nq, F)
        feat = _rowdot(x_q, wq) + bq                                 # (Nq, F)
        fhard = _rowdot(fh_ref[b], wk) + bk                          # (Nh, F)
        feat_total = jnp.concatenate([feat, fhard], axis=0)         # (Nt, F), VMEM only

        # --- cosine-similarity attention: hard tokens attend to confident ----
        sim = _rowdot(_l2_normalize(fhard), _l2_normalize(feat))    # (Nh, Nq)
        p = _softmax_rows(sim)

        # score = [zeros(N1), score_conf_abn]; built with a shifted-identity
        # matmul instead of materializing zeros / an unaligned lane concat.
        s_abn = sca_ref[pl.ds(b, 1), :]                              # (1, N2)
        score_q = jnp.dot(s_abn, s_abn2q,
                          preferred_element_type=jnp.float32)        # (1, Nq)
        new_score = _rowdot(score_q, p)                              # (1, Nh), lane-dense
        nsh_ref[pl.ds(b, 1), :] = new_score

        # score_total = [score_q | new_score], again via placement matmuls.
        score_total = (jnp.dot(score_q, embed_q, preferred_element_type=jnp.float32)
                       + jnp.dot(new_score, embed_h, preferred_element_type=jnp.float32))

        # --- torch.topk / torch.gather, fully in-kernel -----------------------
        stn_vals, _ = _topk_row(new_score, NOR_TOPK, largest=False,
                                want_vals=True, want_hot=False)
        sta_vals, _ = _topk_row(new_score, ABN_TOPK, largest=True,
                                want_vals=True, want_hot=False)
        _, hot_nor = _topk_row(score_total, NOR_TOPK_TOTAL, largest=False,
                               want_vals=False, want_hot=True)
        _, hot_abn = _topk_row(score_total, ABN_TOPK_TOTAL, largest=True,
                               want_vals=False, want_hot=True)
        stn_ref[pl.ds(b, 1), :] = stn_vals                           # (1, 5)
        sta_ref[pl.ds(b, 1), :] = sta_vals                           # (1, 2)

        # gather = one-hot @ feat_total on the MXU (replaces torch.gather)
        feat_topk_nor = jnp.dot(hot_nor, feat_total,
                                preferred_element_type=jnp.float32)  # (10, F)
        feat_topk_abn = jnp.dot(hot_abn, feat_total,
                                preferred_element_type=jnp.float32)  # (5, F)

        # --- the three self-similarity refinement blocks ----------------------
        onor_ref[b] = _self_attn(nor_ref[b])
        ofn_ref[b] = _self_attn(feat_topk_nor)
        ofa_ref[b] = _self_attn(feat_topk_abn)


# ----------------------------------------------------------------------------
# Wrapper: one pallas_call, no grid, no XLA glue ops
# ----------------------------------------------------------------------------
def lpn_forward(params, nor_feat_conf_nor, feat_conf_nor, score_conf_nor,
                feat_conf_abn, score_conf_abn, feat_hard, score_hard):
    """Pallas port of LPN.forward.

    score_conf_nor only ever appears as zeros_like(...) in the reference and
    score_hard is unused by the reference forward, so neither enters the kernel.
    """
    del score_conf_nor, score_hard
    B, N_nor, F = nor_feat_conf_nor.shape
    Nh = feat_hard.shape[1]

    out_shape = (
        jax.ShapeDtypeStruct((B, Nh), jnp.float32),                 # new_score_hard
        jax.ShapeDtypeStruct((B, NOR_TOPK), jnp.float32),           # score_topK_nor
        jax.ShapeDtypeStruct((B, ABN_TOPK), jnp.float32),           # score_topK_abn
        jax.ShapeDtypeStruct((B, N_nor, F), jnp.float32),           # nor_new_feat_nor
        jax.ShapeDtypeStruct((B, NOR_TOPK_TOTAL, F), jnp.float32),  # new_feat_nor
        jax.ShapeDtypeStruct((B, ABN_TOPK_TOTAL, F), jnp.float32),  # new_feat_abn
    )
    # Single invocation (no grid): full arrays land in VMEM (tiny footprint),
    # so there is exactly one kernel dispatch for the whole forward pass.
    return pl.pallas_call(
        _lpn_fused_kernel,
        out_shape=out_shape,
    )(nor_feat_conf_nor, feat_conf_nor, feat_conf_abn, score_conf_abn, feat_hard,
      params["fq_w"], params["fq_b"], params["fk_w"], params["fk_b"])


# ----------------------------------------------------------------------------
# main
# ----------------------------------------------------------------------------
if __name__ == "__main__":
    F = 32        # feature_dim
    B = 2         # batch
    N_nor = 8     # tokens in nor_feat_conf_nor
    N1 = 6        # confident-normal tokens
    N2 = 6        # confident-abnormal tokens
    Nh = 8        # hard tokens (>= 5 so the smallest-5 top-k is valid)

    key = jax.random.PRNGKey(0)
    ks = jax.random.split(key, 11)

    nor_feat_conf_nor = jax.random.normal(ks[0], (B, N_nor, F), jnp.float32)
    feat_conf_nor = jax.random.normal(ks[1], (B, N1, F), jnp.float32)
    score_conf_nor = jax.random.uniform(ks[2], (B, N1), jnp.float32)
    feat_conf_abn = jax.random.normal(ks[3], (B, N2, F), jnp.float32)
    score_conf_abn = jax.random.uniform(ks[4], (B, N2), jnp.float32)
    feat_hard = jax.random.normal(ks[5], (B, Nh, F), jnp.float32)
    score_hard = jax.random.uniform(ks[6], (B, Nh), jnp.float32)

    # PyTorch Linear default init U(-1/sqrt(F), 1/sqrt(F)); biases kept (1, F)
    # so the kernel can broadcast them directly (torch stores them as (F,)).
    bound = 1.0 / (F ** 0.5)
    params = {
        "fq_w": jax.random.uniform(ks[7], (F, F), jnp.float32, -bound, bound),
        "fq_b": jax.random.uniform(ks[8], (1, F), jnp.float32, -bound, bound),
        "fk_w": jax.random.uniform(ks[9], (F, F), jnp.float32, -bound, bound),
        "fk_b": jax.random.uniform(ks[10], (1, F), jnp.float32, -bound, bound),
    }

    outs = lpn_forward(params, nor_feat_conf_nor, feat_conf_nor, score_conf_nor,
                       feat_conf_abn, score_conf_abn, feat_hard, score_hard)
    outs = jax.tree_util.tree_map(jax.block_until_ready, outs)

    (new_score_hard, score_topK_nor, score_topK_abn,
     nor_new_feat_nor, new_feat_nor, new_feat_abn) = outs

    # sanity checks
    assert new_score_hard.shape == (B, Nh)
    assert score_topK_nor.shape == (B, NOR_TOPK)
    assert score_topK_abn.shape == (B, ABN_TOPK)
    assert nor_new_feat_nor.shape == (B, N_nor, F)
    assert new_feat_nor.shape == (B, NOR_TOPK_TOTAL, F)
    assert new_feat_abn.shape == (B, ABN_TOPK_TOTAL, F)
    for o in outs:
        assert bool(jnp.all(jnp.isfinite(o)))
    # torch.topk value ordering: ascending for largest=False, descending for largest=True
    assert bool(jnp.all(jnp.diff(score_topK_nor, axis=1) >= 0))
    assert bool(jnp.all(jnp.diff(score_topK_abn, axis=1) <= 0))
    assert bool(jnp.allclose(score_topK_nor[:, 0], new_score_hard.min(axis=1)))
    assert bool(jnp.allclose(score_topK_abn[:, 0], new_score_hard.max(axis=1)))

    print("KERNEL_OK")
</pallas_src>

<mosaic_0001>
module attributes {stable_mosaic.version = 11 : i64} {
  func.func @_lpn_fused_kernel(%arg0: memref<2x8x32xf32, #tpu.memory_space<vmem>>, %arg1: memref<2x6x32xf32, #tpu.memory_space<vmem>>, %arg2: memref<2x6x32xf32, #tpu.memory_space<vmem>>, %arg3: memref<2x6xf32, #tpu.memory_space<vmem>>, %arg4: memref<2x8x32xf32, #tpu.memory_space<vmem>>, %arg5: memref<32x32xf32, #tpu.memory_space<vmem>>, %arg6: memref<1x32xf32, #tpu.memory_space<vmem>>, %arg7: memref<32x32xf32, #tpu.memory_space<vmem>>, %arg8: memref<1x32xf32, #tpu.memory_space<vmem>>, %arg9: memref<2x8xf32, #tpu.memory_space<vmem>>, %arg10: memref<2x5xf32, #tpu.memory_space<vmem>>, %arg11: memref<2x2xf32, #tpu.memory_space<vmem>>, %arg12: memref<2x8x32xf32, #tpu.memory_space<vmem>>, %arg13: memref<2x10x32xf32, #tpu.memory_space<vmem>>, %arg14: memref<2x5x32xf32, #tpu.memory_space<vmem>>) attributes {dimension_semantics = [], scalar_prefetch = 0 : i64, scratch_operands = 0 : i64, tpu.core_type = #tpu.core_type<tc>} {
    %c0 = arith.constant 0 : index
    %c0_0 = arith.constant 0 : index
    %0 = vector.load %arg5[%c0, %c0_0] : memref<32x32xf32, #tpu.memory_space<vmem>>, vector<32x32xf32>
    %c0_1 = arith.constant 0 : index
    %c0_2 = arith.constant 0 : index
    %1 = vector.load %arg6[%c0_1, %c0_2] : memref<1x32xf32, #tpu.memory_space<vmem>>, vector<1x32xf32>
    %c0_3 = arith.constant 0 : index
    %c0_4 = arith.constant 0 : index
    %2 = vector.load %arg7[%c0_3, %c0_4] : memref<32x32xf32, #tpu.memory_space<vmem>>, vector<32x32xf32>
    %c0_5 = arith.constant 0 : index
    %c0_6 = arith.constant 0 : index
    %3 = vector.load %arg8[%c0_5, %c0_6] : memref<1x32xf32, #tpu.memory_space<vmem>>, vector<1x32xf32>
    %4 = tpu.iota {dimensions = array<i32: 0>} : vector<6x12xi32>
    %5 = tpu.iota {dimensions = array<i32: 1>} : vector<6x12xi32>
    %c6_i32 = arith.constant 6 : i32
    %6 = vector.broadcast %c6_i32 : i32 to vector<6x12xi32>
    %7 = arith.addi %4, %6 : vector<6x12xi32>
    %8 = arith.cmpi eq, %5, %7 : vector<6x12xi32>
    %9 = arith.extui %8 : vector<6x12xi1> to vector<6x12xi32>
    %10 = arith.sitofp %9 : vector<6x12xi32> to vector<6x12xf32>
    %11 = tpu.iota {dimensions = array<i32: 0>} : vector<12x20xi32>
    %12 = tpu.iota {dimensions = array<i32: 1>} : vector<12x20xi32>
    %c0_i32 = arith.constant 0 : i32
    %13 = vector.broadcast %c0_i32 : i32 to vector<12x20xi32>
    %14 = arith.addi %11, %13 : vector<12x20xi32>
    %15 = arith.cmpi eq, %12, %14 : vector<12x20xi32>
    %16 = arith.extui %15 : vector<12x20xi1> to vector<12x20xi32>
    %17 = arith.sitofp %16 : vector<12x20xi32> to vector<12x20xf32>
    %18 = tpu.iota {dimensions = array<i32: 0>} : vector<8x20xi32>
    %19 = tpu.iota {dimensions = array<i32: 1>} : vector<8x20xi32>
    %c12_i32 = arith.constant 12 : i32
    %20 = vector.broadcast %c12_i32 : i32 to vector<8x20xi32>
    %21 = arith.addi %18, %20 : vector<8x20xi32>
    %22 = arith.cmpi eq, %19, %21 : vector<8x20xi32>
    %23 = arith.extui %22 : vector<8x20xi1> to vector<8x20xi32>
    %24 = arith.sitofp %23 : vector<8x20xi32> to vector<8x20xf32>
    %c0_7 = arith.constant 0 : index
    %c0_8 = arith.constant 0 : index
    %c0_9 = arith.constant 0 : index
    %25 = vector.load %arg1[%c0_7, %c0_8, %c0_9] : memref<2x6x32xf32, #tpu.memory_space<vmem>>, vector<1x6x32xf32>
    %26 = vector.shape_cast %25 : vector<1x6x32xf32> to vector<6x32xf32>
    %c0_10 = arith.constant 0 : index
    %c0_11 = arith.constant 0 : index
    %c0_12 = arith.constant 0 : index
    %27 = vector.load %arg2[%c0_10, %c0_11, %c0_12] : memref<2x6x32xf32, #tpu.memory_space<vmem>>, vector<1x6x32xf32>
    %28 = vector.shape_cast %27 : vector<1x6x32xf32> to vector<6x32xf32>
    %29 = tpu.concatenate %26, %28 in 0 : vector<6x32xf32>, vector<6x32xf32> -> vector<12x32xf32>
    %cst = arith.constant dense<0.000000e+00> : vector<12x32xf32>
    %30 = tpu.matmul %29, %0, %cst {dimension_numbers = #tpu.dot_dimension_numbers<[1], [1], [0], [0], [0, 0, 1, 0], [], []>} : vector<12x32xf32>, vector<32x32xf32>, vector<12x32xf32> -> vector<12x32xf32>
    %31 = vector.broadcast %1 : vector<1x32xf32> to vector<12x32xf32>
    %32 = arith.addf %30, %31 : vector<12x32xf32>
    %c0_13 = arith.constant 0 : index
    %c0_14 = arith.constant 0 : index
    %c0_15 = arith.constant 0 : index
    %33 = vector.load %arg4[%c0_13, %c0_14, %c0_15] : memref<2x8x32xf32, #tpu.memory_space<vmem>>, vector<1x8x32xf32>
    %34 = vector.shape_cast %33 : vector<1x8x32xf32> to vector<8x32xf32>
    %cst_16 = arith.constant dense<0.000000e+00> : vector<8x32xf32>
    %35 = tpu.matmul %34, %2, %cst_16 {dimension_numbers = #tpu.dot_dimension_numbers<[1], [1], [0], [0], [0, 0, 1, 0], [], []>} : vector<8x32xf32>, vector<32x32xf32>, vector<8x32xf32> -> vector<8x32xf32>
    %36 = vector.broadcast %3 : vector<1x32xf32> to vector<8x32xf32>
    %37 = arith.addf %35, %36 : vector<8x32xf32>
    %38 = tpu.concatenate %32, %37 in 0 : vector<12x32xf32>, vector<8x32xf32> -> vector<20x32xf32>
    %39 = arith.mulf %37, %37 : vector<8x32xf32>
    %cst_17 = arith.constant dense<0.000000e+00> : vector<8xf32>
    %40 = vector.multi_reduction <add>, %39, %cst_17 [1] : vector<8x32xf32> to vector<8xf32>
    %41 = vector.shape_cast %40 : vector<8xf32> to vector<8x1xf32>
    %cst_18 = arith.constant 9.99999996E-13 : f32
    %42 = vector.broadcast %cst_18 : f32 to vector<8x1xf32>
    %43 = arith.addf %41, %42 : vector<8x1xf32>
    %44 = math.rsqrt %43 : vector<8x1xf32>
    %45 = vector.broadcast %44 : vector<8x1xf32> to vector<8x32xf32>
    %46 = arith.mulf %37, %45 : vector<8x32xf32>
    %47 = arith.mulf %32, %32 : vector<12x32xf32>
    %cst_19 = arith.constant dense<0.000000e+00> : vector<12xf32>
    %48 = vector.multi_reduction <add>, %47, %cst_19 [1] : vector<12x32xf32> to vector<12xf32>
    %49 = vector.shape_cast %48 : vector<12xf32> to vector<12x1xf32>
    %cst_20 = arith.constant 9.99999996E-13 : f32
    %50 = vector.broadcast %cst_20 : f32 to vector<12x1xf32>
    %51 = arith.addf %49, %50 : vector<12x1xf32>
    %52 = math.rsqrt %51 : vector<12x1xf32>
    %53 = vector.broadcast %52 : vector<12x1xf32> to vector<12x32xf32>
    %54 = arith.mulf %32, %53 : vector<12x32xf32>
    %cst_21 = arith.constant dense<0.000000e+00> : vector<8x12xf32>
    %55 = tpu.matmul %46, %54, %cst_21 {dimension_numbers = #tpu.dot_dimension_numbers<[1], [1], [0], [0], [0, 0, 1, 0], [], []>} : vector<8x32xf32>, vector<12x32xf32>, vector<8x12xf32> -> vector<8x12xf32>
    %cst_22 = arith.constant dense<0xFF800000> : vector<8xf32>
    %56 = vector.multi_reduction <maximumf>, %55, %cst_22 [1] : vector<8x12xf32> to vector<8xf32>
    %57 = vector.shape_cast %56 : vector<8xf32> to vector<8x1xf32>
    %58 = vector.broadcast %57 : vector<8x1xf32> to vector<8x12xf32>
    %59 = arith.subf %55, %58 : vector<8x12xf32>
    %60 = math.exp %59 : vector<8x12xf32>
    %cst_23 = arith.constant dense<0.000000e+00> : vector<8xf32>
    %61 = vector.multi_reduction <add>, %60, %cst_23 [1] : vector<8x12xf32> to vector<8xf32>
    %62 = vector.shape_cast %61 : vector<8xf32> to vector<8x1xf32>
    %63 = vector.broadcast %62 : vector<8x1xf32> to vector<8x12xf32>
    %64 = arith.divf %60, %63 : vector<8x12xf32>
    %c0_24 = arith.constant 0 : index
    %c0_25 = arith.constant 0 : index
    %65 = vector.load %arg3[%c0_24, %c0_25] : memref<2x6xf32, #tpu.memory_space<vmem>>, vector<1x6xf32>
    %cst_26 = arith.constant dense<0.000000e+00> : vector<1x12xf32>
    %66 = tpu.matmul %65, %10, %cst_26 {dimension_numbers = #tpu.dot_dimension_numbers<[1], [0], [0], [1], [0, 0, 1, 1], [], []>} : vector<1x6xf32>, vector<6x12xf32>, vector<1x12xf32> -> vector<1x12xf32>
    %cst_27 = arith.constant dense<0.000000e+00> : vector<1x8xf32>
    %67 = tpu.matmul %66, %64, %cst_27 {dimension_numbers = #tpu.dot_dimension_numbers<[1], [1], [0], [0], [0, 0, 1, 0], [], []>} : vector<1x12xf32>, vector<8x12xf32>, vector<1x8xf32> -> vector<1x8xf32>
    %c0_28 = arith.constant 0 : index
    %c0_29 = arith.constant 0 : index
    %68 = vector.load %arg9[%c0_28, %c0_29] : memref<2x8xf32, #tpu.memory_space<vmem>>, vector<1x8xf32>
    tpu.vector_store %arg9[%c0_28, %c0_29], %67 {strides = array<i32>} : memref<2x8xf32, #tpu.memory_space<vmem>>, vector<1x8xf32>,
    %cst_30 = arith.constant dense<0.000000e+00> : vector<1x20xf32>
    %69 = tpu.matmul %66, %17, %cst_30 {dimension_numbers = #tpu.dot_dimension_numbers<[1], [0], [0], [1], [0, 0, 1, 1], [], []>} : vector<1x12xf32>, vector<12x20xf32>, vector<1x20xf32> -> vector<1x20xf32>
    %cst_31 = arith.constant dense<0.000000e+00> : vector<1x20xf32>
    %70 = tpu.matmul %67, %24, %cst_31 {dimension_numbers = #tpu.dot_dimension_numbers<[1], [0], [0], [1], [0, 0, 1, 1], [], []>} : vector<1x8xf32>, vector<8x20xf32>, vector<1x20xf32> -> vector<1x20xf32>
    %71 = arith.addf %69, %70 : vector<1x20xf32>
    %72 = tpu.iota {dimensions = array<i32: 1>} : vector<1x8xi32>
    %73 = tpu.iota {dimensions = array<i32: 1>} : vector<1x5xi32>
    %cst_32 = arith.constant 0.000000e+00 : f32
    %74 = vector.broadcast %cst_32 : f32 to vector<1x5xf32>
    %cst_33 = arith.constant dense<0x7F800000> : vector<1xf32>
    %75 = vector.multi_reduction <minimumf>, %67, %cst_33 [1] : vector<1x8xf32> to vector<1xf32>
    %76 = vector.shape_cast %75 : vector<1xf32> to vector<1x1xf32>
    %77 = vector.broadcast %76 : vector<1x1xf32> to vector<1x8xf32>
    %78 = arith.cmpf oeq, %67, %77 : vector<1x8xf32>
    %c8_i32 = arith.constant 8 : i32
    %79 = vector.broadcast %c8_i32 : i32 to vector<1x8xi32>
    %80 = arith.select %78, %72, %79 : vector<1x8xi1>, vector<1x8xi32>
    %cst_34 = arith.constant dense<2147483647> : vector<1xi32>
    %81 = vector.multi_reduction <minsi>, %80, %cst_34 [1] : vector<1x8xi32> to vector<1xi32>
    %82 = vector.shape_cast %81 : vector<1xi32> to vector<1x1xi32>
    %c0_i32_35 = arith.constant 0 : i32
    %83 = vector.broadcast %c0_i32_35 : i32 to vector<1x5xi32>
    %84 = arith.cmpi eq, %73, %83 : vector<1x5xi32>
    %cst_36 = arith.constant 0.000000e+00 : f32
    %85 = vector.shape_cast %76 : vector<1x1xf32> to vector<1x1xf32>
    %86 = vector.broadcast %85 : vector<1x1xf32> to vector<1x5xf32>
    %87 = vector.broadcast %cst_36 : f32 to vector<1x5xf32>
    %88 = arith.select %84, %86, %87 : vector<1x5xi1>, vector<1x5xf32>
    %89 = arith.addf %74, %88 : vector<1x5xf32>
    %90 = vector.broadcast %82 : vector<1x1xi32> to vector<1x8xi32>
    %91 = arith.cmpi eq, %72, %90 : vector<1x8xi32>
    %cst_37 = arith.constant 0x7F800000 : f32
    %92 = vector.broadcast %cst_37 : f32 to vector<1x8xf32>
    %93 = arith.select %91, %92, %67 : vector<1x8xi1>, vector<1x8xf32>
    %cst_38 = arith.constant dense<0x7F800000> : vector<1xf32>
    %94 = vector.multi_reduction <minimumf>, %93, %cst_38 [1] : vector<1x8xf32> to vector<1xf32>
    %95 = vector.shape_cast %94 : vector<1xf32> to vector<1x1xf32>
    %96 = vector.broadcast %95 : vector<1x1xf32> to vector<1x8xf32>
    %97 = arith.cmpf oeq, %93, %96 : vector<1x8xf32>
    %c8_i32_39 = arith.constant 8 : i32
    %98 = vector.broadcast %c8_i32_39 : i32 to vector<1x8xi32>
    %99 = arith.select %97, %72, %98 : vector<1x8xi1>, vector<1x8xi32>
    %cst_40 = arith.constant dense<2147483647> : vector<1xi32>
    %100 = vector.multi_reduction <minsi>, %99, %cst_40 [1] : vector<1x8xi32> to vector<1xi32>
    %101 = vector.shape_cast %100 : vector<1xi32> to vector<1x1xi32>
    %c1_i32 = arith.constant 1 : i32
    %102 = vector.broadcast %c1_i32 : i32 to vector<1x5xi32>
    %103 = arith.cmpi eq, %73, %102 : vector<1x5xi32>
    %cst_41 = arith.constant 0.000000e+00 : f32
    %104 = vector.shape_cast %95 : vector<1x1xf32> to vector<1x1xf32>
    %105 = vector.broadcast %104 : vector<1x1xf32> to vector<1x5xf32>
    %106 = vector.broadcast %cst_41 : f32 to vector<1x5xf32>
    %107 = arith.select %103, %105, %106 : vector<1x5xi1>, vector<1x5xf32>
    %108 = arith.addf %89, %107 : vector<1x5xf32>
    %109 = vector.broadcast %101 : vector<1x1xi32> to vector<1x8xi32>
    %110 = arith.cmpi eq, %72, %109 : vector<1x8xi32>
    %cst_42 = arith.constant 0x7F800000 : f32
    %111 = vector.broadcast %cst_42 : f32 to vector<1x8xf32>
    %112 = arith.select %110, %111, %93 : vector<1x8xi1>, vector<1x8xf32>
    %cst_43 = arith.constant dense<0x7F800000> : vector<1xf32>
    %113 = vector.multi_reduction <minimumf>, %112, %cst_43 [1] : vector<1x8xf32> to vector<1xf32>
    %114 = vector.shape_cast %113 : vector<1xf32> to vector<1x1xf32>
    %115 = vector.broadcast %114 : vector<1x1xf32> to vector<1x8xf32>
    %116 = arith.cmpf oeq, %112, %115 : vector<1x8xf32>
    %c8_i32_44 = arith.constant 8 : i32
    %117 = vector.broadcast %c8_i32_44 : i32 to vector<1x8xi32>
    %118 = arith.select %116, %72, %117 : vector<1x8xi1>, vector<1x8xi32>
    %cst_45 = arith.constant dense<2147483647> : vector<1xi32>
    %119 = vector.multi_reduction <minsi>, %118, %cst_45 [1] : vector<1x8xi32> to vector<1xi32>
    %120 = vector.shape_cast %119 : vector<1xi32> to vector<1x1xi32>
    %c2_i32 = arith.constant 2 : i32
    %121 = vector.broadcast %c2_i32 : i32 to vector<1x5xi32>
    %122 = arith.cmpi eq, %73, %121 : vector<1x5xi32>
    %cst_46 = arith.constant 0.000000e+00 : f32
    %123 = vector.shape_cast %114 : vector<1x1xf32> to vector<1x1xf32>
    %124 = vector.broadcast %123 : vector<1x1xf32> to vector<1x5xf32>
    %125 = vector.broadcast %cst_46 : f32 to vector<1x5xf32>
    %126 = arith.select %122, %124, %125 : vector<1x5xi1>, vector<1x5xf32>
    %127 = arith.addf %108, %126 : vector<1x5xf32>
    %128 = vector.broadcast %120 : vector<1x1xi32> to vector<1x8xi32>
    %129 = arith.cmpi eq, %72, %128 : vector<1x8xi32>
    %cst_47 = arith.constant 0x7F800000 : f32
    %130 = vector.broadcast %cst_47 : f32 to vector<1x8xf32>
    %131 = arith.select %129, %130, %112 : vector<1x8xi1>, vector<1x8xf32>
    %cst_48 = arith.constant dense<0x7F800000> : vector<1xf32>
    %132 = vector.multi_reduction <minimumf>, %131, %cst_48 [1] : vector<1x8xf32> to vector<1xf32>
    %133 = vector.shape_cast %132 : vector<1xf32> to vector<1x1xf32>
    %134 = vector.broadcast %133 : vector<1x1xf32> to vector<1x8xf32>
    %135 = arith.cmpf oeq, %131, %134 : vector<1x8xf32>
    %c8_i32_49 = arith.constant 8 : i32
    %136 = vector.broadcast %c8_i32_49 : i32 to vector<1x8xi32>
    %137 = arith.select %135, %72, %136 : vector<1x8xi1>, vector<1x8xi32>
    %cst_50 = arith.constant dense<2147483647> : vector<1xi32>
    %138 = vector.multi_reduction <minsi>, %137, %cst_50 [1] : vector<1x8xi32> to vector<1xi32>
    %139 = vector.shape_cast %138 : vector<1xi32> to vector<1x1xi32>
    %c3_i32 = arith.constant 3 : i32
    %140 = vector.broadcast %c3_i32 : i32 to vector<1x5xi32>
    %141 = arith.cmpi eq, %73, %140 : vector<1x5xi32>
    %cst_51 = arith.constant 0.000000e+00 : f32
    %142 = vector.shape_cast %133 : vector<1x1xf32> to vector<1x1xf32>
    %143 = vector.broadcast %142 : vector<1x1xf32> to vector<1x5xf32>
    %144 = vector.broadcast %cst_51 : f32 to vector<1x5xf32>
    %145 = arith.select %141, %143, %144 : vector<1x5xi1>, vector<1x5xf32>
    %146 = arith.addf %127, %145 : vector<1x5xf32>
    %147 = vector.broadcast %139 : vector<1x1xi32> to vector<1x8xi32>
    %148 = arith.cmpi eq, %72, %147 : vector<1x8xi32>
    %cst_52 = arith.constant 0x7F800000 : f32
    %149 = vector.broadcast %cst_52 : f32 to vector<1x8xf32>
    %150 = arith.select %148, %149, %131 : vector<1x8xi1>, vector<1x8xf32>
    %cst_53 = arith.constant dense<0x7F800000> : vector<1xf32>
    %151 = vector.multi_reduction <minimumf>, %150, %cst_53 [1] : vector<1x8xf32> to vector<1xf32>
    %152 = vector.shape_cast %151 : vector<1xf32> to vector<1x1xf32>
    %c4_i32 = arith.constant 4 : i32
    %153 = vector.broadcast %c4_i32 : i32 to vector<1x5xi32>
    %154 = arith.cmpi eq, %73, %153 : vector<1x5xi32>
    %cst_54 = arith.constant 0.000000e+00 : f32
    %155 = vector.shape_cast %152 : vector<1x1xf32> to vector<1x1xf32>
    %156 = vector.broadcast %155 : vector<1x1xf32> to vector<1x5xf32>
    %157 = vector.broadcast %cst_54 : f32 to vector<1x5xf32>
    %158 = arith.select %154, %156, %157 : vector<1x5xi1>, vector<1x5xf32>
    %159 = arith.addf %146, %158 : vector<1x5xf32>
    %160 = tpu.iota {dimensions = array<i32: 1>} : vector<1x8xi32>
    %161 = tpu.iota {dimensions = array<i32: 1>} : vector<1x2xi32>
    %cst_55 = arith.constant 0.000000e+00 : f32
    %162 = vector.broadcast %cst_55 : f32 to vector<1x2xf32>
    %cst_56 = arith.constant dense<0xFF800000> : vector<1xf32>
    %163 = vector.multi_reduction <maximumf>, %67, %cst_56 [1] : vector<1x8xf32> to vector<1xf32>
    %164 = vector.shape_cast %163 : vector<1xf32> to vector<1x1xf32>
    %165 = vector.broadcast %164 : vector<1x1xf32> to vector<1x8xf32>
    %166 = arith.cmpf oeq, %67, %165 : vector<1x8xf32>
    %c8_i32_57 = arith.constant 8 : i32
    %167 = vector.broadcast %c8_i32_57 : i32 to vector<1x8xi32>
    %168 = arith.select %166, %160, %167 : vector<1x8xi1>, vector<1x8xi32>
    %cst_58 = arith.constant dense<2147483647> : vector<1xi32>
    %169 = vector.multi_reduction <minsi>, %168, %cst_58 [1] : vector<1x8xi32> to vector<1xi32>
    %170 = vector.shape_cast %169 : vector<1xi32> to vector<1x1xi32>
    %c0_i32_59 = arith.constant 0 : i32
    %171 = vector.broadcast %c0_i32_59 : i32 to vector<1x2xi32>
    %172 = arith.cmpi eq, %161, %171 : vector<1x2xi32>
    %cst_60 = arith.constant 0.000000e+00 : f32
    %173 = vector.shape_cast %164 : vector<1x1xf32> to vector<1x1xf32>
    %174 = vector.broadcast %173 : vector<1x1xf32> to vector<1x2xf32>
    %175 = vector.broadcast %cst_60 : f32 to vector<1x2xf32>
    %176 = arith.select %172, %174, %175 : vector<1x2xi1>, vector<1x2xf32>
    %177 = arith.addf %162, %176 : vector<1x2xf32>
    %178 = vector.broadcast %170 : vector<1x1xi32> to vector<1x8xi32>
    %179 = arith.cmpi eq, %160, %178 : vector<1x8xi32>
    %cst_61 = arith.constant 0xFF800000 : f32
    %180 = vector.broadcast %cst_61 : f32 to vector<1x8xf32>
    %181 = arith.select %179, %180, %67 : vector<1x8xi1>, vector<1x8xf32>
    %cst_62 = arith.constant dense<0xFF800000> : vector<1xf32>
    %182 = vector.multi_reduction <maximumf>, %181, %cst_62 [1] : vector<1x8xf32> to vector<1xf32>
    %183 = vector.shape_cast %182 : vector<1xf32> to vector<1x1xf32>
    %c1_i32_63 = arith.constant 1 : i32
    %184 = vector.broadcast %c1_i32_63 : i32 to vector<1x2xi32>
    %185 = arith.cmpi eq, %161, %184 : vector<1x2xi32>
    %cst_64 = arith.constant 0.000000e+00 : f32
    %186 = vector.shape_cast %183 : vector<1x1xf32> to vector<1x1xf32>
    %187 = vector.broadcast %186 : vector<1x1xf32> to vector<1x2xf32>
    %188 = vector.broadcast %cst_64 : f32 to vector<1x2xf32>
    %189 = arith.select %185, %187, %188 : vector<1x2xi1>, vector<1x2xf32>
    %190 = arith.addf %177, %189 : vector<1x2xf32>
    %191 = tpu.iota {dimensions = array<i32: 1>} : vector<1x20xi32>
    %192 = tpu.iota {dimensions = array<i32: 0>} : vector<10x20xi32>
    %193 = tpu.iota {dimensions = array<i32: 1>} : vector<10x20xi32>
    %cst_65 = arith.constant 0.000000e+00 : f32
    %194 = vector.broadcast %cst_65 : f32 to vector<10x20xf32>
    %cst_66 = arith.constant dense<0x7F800000> : vector<1xf32>
    %195 = vector.multi_reduction <minimumf>, %71, %cst_66 [1] : vector<1x20xf32> to vector<1xf32>
    %196 = vector.shape_cast %195 : vector<1xf32> to vector<1x1xf32>
    %197 = vector.broadcast %196 : vector<1x1xf32> to vector<1x20xf32>
    %198 = arith.cmpf oeq, %71, %197 : vector<1x20xf32>
    %c20_i32 = arith.constant 20 : i32
    %199 = vector.broadcast %c20_i32 : i32 to vector<1x20xi32>
    %200 = arith.select %198, %191, %199 : vector<1x20xi1>, vector<1x20xi32>
    %cst_67 = arith.constant dense<2147483647> : vector<1xi32>
    %201 = vector.multi_reduction <minsi>, %200, %cst_67 [1] : vector<1x20xi32> to vector<1xi32>
    %202 = vector.shape_cast %201 : vector<1xi32> to vector<1x1xi32>
    %c0_i32_68 = arith.constant 0 : i32
    %203 = vector.broadcast %c0_i32_68 : i32 to vector<10x20xi32>
    %204 = arith.cmpi eq, %192, %203 : vector<10x20xi32>
    %205 = vector.broadcast %202 : vector<1x1xi32> to vector<10x20xi32>
    %206 = arith.cmpi eq, %193, %205 : vector<10x20xi32>
    %207 = arith.andi %204, %206 : vector<10x20xi1>
    %cst_69 = arith.constant 1.000000e+00 : f32
    %cst_70 = arith.constant 0.000000e+00 : f32
    %208 = vector.broadcast %cst_69 : f32 to vector<10x20xf32>
    %209 = vector.broadcast %cst_70 : f32 to vector<10x20xf32>
    %210 = arith.select %207, %208, %209 : vector<10x20xi1>, vector<10x20xf32>
    %211 = arith.addf %194, %210 : vector<10x20xf32>
    %212 = vector.broadcast %202 : vector<1x1xi32> to vector<1x20xi32>
    %213 = arith.cmpi eq, %191, %212 : vector<1x20xi32>
    %cst_71 = arith.constant 0x7F800000 : f32
    %214 = vector.broadcast %cst_71 : f32 to vector<1x20xf32>
    %215 = arith.select %213, %214, %71 : vector<1x20xi1>, vector<1x20xf32>
    %cst_72 = arith.constant dense<0x7F800000> : vector<1xf32>
    %216 = vector.multi_reduction <minimumf>, %215, %cst_72 [1] : vector<1x20xf32> to vector<1xf32>
    %217 = vector.shape_cast %216 : vector<1xf32> to vector<1x1xf32>
    %218 = vector.broadcast %217 : vector<1x1xf32> to vector<1x20xf32>
    %219 = arith.cmpf oeq, %215, %218 : vector<1x20xf32>
    %c20_i32_73 = arith.constant 20 : i32
    %220 = vector.broadcast %c20_i32_73 : i32 to vector<1x20xi32>
    %221 = arith.select %219, %191, %220 : vector<1x20xi1>, vector<1x20xi32>
    %cst_74 = arith.constant dense<2147483647> : vector<1xi32>
    %222 = vector.multi_reduction <minsi>, %221, %cst_74 [1] : vector<1x20xi32> to vector<1xi32>
    %223 = vector.shape_cast %222 : vector<1xi32> to vector<1x1xi32>
    %c1_i32_75 = arith.constant 1 : i32
    %224 = vector.broadcast %c1_i32_75 : i32 to vector<10x20xi32>
    %225 = arith.cmpi eq, %192, %224 : vector<10x20xi32>
    %226 = vector.broadcast %223 : vector<1x1xi32> to vector<10x20xi32>
    %227 = arith.cmpi eq, %193, %226 : vector<10x20xi32>
    %228 = arith.andi %225, %227 : vector<10x20xi1>
    %cst_76 = arith.constant 1.000000e+00 : f32
    %cst_77 = arith.constant 0.000000e+00 : f32
    %229 = vector.broadcast %cst_76 : f32 to vector<10x20xf32>
    %230 = vector.broadcast %cst_77 : f32 to vector<10x20xf32>
    %231 = arith.select %228, %229, %230 : vector<10x20xi1>, vector<10x20xf32>
    %232 = arith.addf %211, %231 : vector<10x20xf32>
    %233 = vector.broadcast %223 : vector<1x1xi32> to vector<1x20xi32>
    %234 = arith.cmpi eq, %191, %233 : vector<1x20xi32>
    %cst_78 = arith.constant 0x7F800000 : f32
    %235 = vector.broadcast %cst_78 : f32 to vector<1x20xf32>
    %236 = arith.select %234, %235, %215 : vector<1x20xi1>, vector<1x20xf32>
    %cst_79 = arith.constant dense<0x7F800000> : vector<1xf32>
    %237 = vector.multi_reduction <minimumf>, %236, %cst_79 [1] : vector<1x20xf32> to vector<1xf32>
    %238 = vector.shape_cast %237 : vector<1xf32> to vector<1x1xf32>
    %239 = vector.broadcast %238 : vector<1x1xf32> to vector<1x20xf32>
    %240 = arith.cmpf oeq, %236, %239 : vector<1x20xf32>
    %c20_i32_80 = arith.constant 20 : i32
    %241 = vector.broadcast %c20_i32_80 : i32 to vector<1x20xi32>
    %242 = arith.select %240, %191, %241 : vector<1x20xi1>, vector<1x20xi32>
    %cst_81 = arith.constant dense<2147483647> : vector<1xi32>
    %243 = vector.multi_reduction <minsi>, %242, %cst_81 [1] : vector<1x20xi32> to vector<1xi32>
    %244 = vector.shape_cast %243 : vector<1xi32> to vector<1x1xi32>
    %c2_i32_82 = arith.constant 2 : i32
    %245 = vector.broadcast %c2_i32_82 : i32 to vector<10x20xi32>
    %246 = arith.cmpi eq, %192, %245 : vector<10x20xi32>
    %247 = vector.broadcast %244 : vector<1x1xi32> to vector<10x20xi32>
    %248 = arith.cmpi eq, %193, %247 : vector<10x20xi32>
    %249 = arith.andi %246, %248 : vector<10x20xi1>
    %cst_83 = arith.constant 1.000000e+00 : f32
    %cst_84 = arith.constant 0.000000e+00 : f32
    %250 = vector.broadcast %cst_83 : f32 to vector<10x20xf32>
    %251 = vector.broadcast %cst_84 : f32 to vector<10x20xf32>
    %252 = arith.select %249, %250, %251 : vector<10x20xi1>, vector<10x20xf32>
    %253 = arith.addf %232, %252 : vector<10x20xf32>
    %254 = vector.broadcast %244 : vector<1x1xi32> to vector<1x20xi32>
    %255 = arith.cmpi eq, %191, %254 : vector<1x20xi32>
    %cst_85 = arith.constant 0x7F800000 : f32
    %256 = vector.broadcast %cst_85 : f32 to vector<1x20xf32>
    %257 = arith.select %255, %256, %236 : vector<1x20xi1>, vector<1x20xf32>
    %cst_86 = arith.constant dense<0x7F800000> : vector<1xf32>
    %258 = vector.multi_reduction <minimumf>, %257, %cst_86 [1] : vector<1x20xf32> to vector<1xf32>
    %259 = vector.shape_cast %258 : vector<1xf32> to vector<1x1xf32>
    %260 = vector.broadcast %259 : vector<1x1xf32> to vector<1x20xf32>
    %261 = arith.cmpf oeq, %257, %260 : vector<1x20xf32>
    %c20_i32_87 = arith.constant 20 : i32
    %262 = vector.broadcast %c20_i32_87 : i32 to vector<1x20xi32>
    %263 = arith.select %261, %191, %262 : vector<1x20xi1>, vector<1x20xi32>
    %cst_88 = arith.constant dense<2147483647> : vector<1xi32>
    %264 = vector.multi_reduction <minsi>, %263, %cst_88 [1] : vector<1x20xi32> to vector<1xi32>
    %265 = vector.shape_cast %264 : vector<1xi32> to vector<1x1xi32>
    %c3_i32_89 = arith.constant 3 : i32
    %266 = vector.broadcast %c3_i32_89 : i32 to vector<10x20xi32>
    %267 = arith.cmpi eq, %192, %266 : vector<10x20xi32>
    %268 = vector.broadcast %265 : vector<1x1xi32> to vector<10x20xi32>
    %269 = arith.cmpi eq, %193, %268 : vector<10x20xi32>
    %270 = arith.andi %267, %269 : vector<10x20xi1>
    %cst_90 = arith.constant 1.000000e+00 : f32
    %cst_91 = arith.constant 0.000000e+00 : f32
    %271 = vector.broadcast %cst_90 : f32 to vector<10x20xf32>
    %272 = vector.broadcast %cst_91 : f32 to vector<10x20xf32>
    %273 = arith.select %270, %271, %272 : vector<10x20xi1>, vector<10x20xf32>
    %274 = arith.addf %253, %273 : vector<10x20xf32>
    %275 = vector.broadcast %265 : vector<1x1xi32> to vector<1x20xi32>
    %276 = arith.cmpi eq, %191, %275 : vector<1x20xi32>
    %cst_92 = arith.constant 0x7F800000 : f32
    %277 = vector.broadcast %cst_92 : f32 to vector<1x20xf32>
    %278 = arith.select %276, %277, %257 : vector<1x20xi1>, vector<1x20xf32>
    %cst_93 = arith.constant dense<0x7F800000> : vector<1xf32>
    %279 = vector.multi_reduction <minimumf>, %278, %cst_93 [1] : vector<1x20xf32> to vector<1xf32>
    %280 = vector.shape_cast %279 : vector<1xf32> to vector<1x1xf32>
    %281 = vector.broadcast %280 : vector<1x1xf32> to vector<1x20xf32>
    %282 = arith.cmpf oeq, %278, %281 : vector<1x20xf32>
    %c20_i32_94 = arith.constant 20 : i32
    %283 = vector.broadcast %c20_i32_94 : i32 to vector<1x20xi32>
    %284 = arith.select %282, %191, %283 : vector<1x20xi1>, vector<1x20xi32>
    %cst_95 = arith.constant dense<2147483647> : vector<1xi32>
    %285 = vector.multi_reduction <minsi>, %284, %cst_95 [1] : vector<1x20xi32> to vector<1xi32>
    %286 = vector.shape_cast %285 : vector<1xi32> to vector<1x1xi32>
    %c4_i32_96 = arith.constant 4 : i32
    %287 = vector.broadcast %c4_i32_96 : i32 to vector<10x20xi32>
    %288 = arith.cmpi eq, %192, %287 : vector<10x20xi32>
    %289 = vector.broadcast %286 : vector<1x1xi32> to vector<10x20xi32>
    %290 = arith.cmpi eq, %193, %289 : vector<10x20xi32>
    %291 = arith.andi %288, %290 : vector<10x20xi1>
    %cst_97 = arith.constant 1.000000e+00 : f32
    %cst_98 = arith.constant 0.000000e+00 : f32
    %292 = vector.broadcast %cst_97 : f32 to vector<10x20xf32>
    %293 = vector.broadcast %cst_98 : f32 to vector<10x20xf32>
    %294 = arith.select %291, %292, %293 : vector<10x20xi1>, vector<10x20xf32>
    %295 = arith.addf %274, %294 : vector<10x20xf32>
    %296 = vector.broadcast %286 : vector<1x1xi32> to vector<1x20xi32>
    %297 = arith.cmpi eq, %191, %296 : vector<1x20xi32>
    %cst_99 = arith.constant 0x7F800000 : f32
    %298 = vector.broadcast %cst_99 : f32 to vector<1x20xf32>
    %299 = arith.select %297, %298, %278 : vector<1x20xi1>, vector<1x20xf32>
    %cst_100 = arith.constant dense<0x7F800000> : vector<1xf32>
    %300 = vector.multi_reduction <minimumf>, %299, %cst_100 [1] : vector<1x20xf32> to vector<1xf32>
    %301 = vector.shape_cast %300 : vector<1xf32> to vector<1x1xf32>
    %302 = vector.broadcast %301 : vector<1x1xf32> to vector<1x20xf32>
    %303 = arith.cmpf oeq, %299, %302 : vector<1x20xf32>
    %c20_i32_101 = arith.constant 20 : i32
    %304 = vector.broadcast %c20_i32_101 : i32 to vector<1x20xi32>
    %305 = arith.select %303, %191, %304 : vector<1x20xi1>, vector<1x20xi32>
    %cst_102 = arith.constant dense<2147483647> : vector<1xi32>
    %306 = vector.multi_reduction <minsi>, %305, %cst_102 [1] : vector<1x20xi32> to vector<1xi32>
    %307 = vector.shape_cast %306 : vector<1xi32> to vector<1x1xi32>
    %c5_i32 = arith.constant 5 : i32
    %308 = vector.broadcast %c5_i32 : i32 to vector<10x20xi32>
    %309 = arith.cmpi eq, %192, %308 : vector<10x20xi32>
    %310 = vector.broadcast %307 : vector<1x1xi32> to vector<10x20xi32>
    %311 = arith.cmpi eq, %193, %310 : vector<10x20xi32>
    %312 = arith.andi %309, %311 : vector<10x20xi1>
    %cst_103 = arith.constant 1.000000e+00 : f32
    %cst_104 = arith.constant 0.000000e+00 : f32
    %313 = vector.broadcast %cst_103 : f32 to vector<10x20xf32>
    %314 = vector.broadcast %cst_104 : f32 to vector<10x20xf32>
    %315 = arith.select %312, %313, %314 : vector<10x20xi1>, vector<10x20xf32>
    %316 = arith.addf %295, %315 : vector<10x20xf32>
    %317 = vector.broadcast %307 : vector<1x1xi32> to vector<1x20xi32>
    %318 = arith.cmpi eq, %191, %317 : vector<1x20xi32>
    %cst_105 = arith.constant 0x7F800000 : f32
    %319 = vector.broadcast %cst_105 : f32 to vector<1x20xf32>
    %320 = arith.select %318, %319, %299 : vector<1x20xi1>, vector<1x20xf32>
    %cst_106 = arith.constant dense<0x7F800000> : vector<1xf32>
    %321 = vector.multi_reduction <minimumf>, %320, %cst_106 [1] : vector<1x20xf32> to vector<1xf32>
    %322 = vector.shape_cast %321 : vector<1xf32> to vector<1x1xf32>
    %323 = vector.broadcast %322 : vector<1x1xf32> to vector<1x20xf32>
    %324 = arith.cmpf oeq, %320, %323 : vector<1x20xf32>
    %c20_i32_107 = arith.constant 20 : i32
    %325 = vector.broadcast %c20_i32_107 : i32 to vector<1x20xi32>
    %326 = arith.select %324, %191, %325 : vector<1x20xi1>, vector<1x20xi32>
    %cst_108 = arith.constant dense<2147483647> : vector<1xi32>
    %327 = vector.multi_reduction <minsi>, %326, %cst_108 [1] : vector<1x20xi32> to vector<1xi32>
    %328 = vector.shape_cast %327 : vector<1xi32> to vector<1x1xi32>
    %c6_i32_109 = arith.constant 6 : i32
    %329 = vector.broadcast %c6_i32_109 : i32 to vector<10x20xi32>
    %330 = arith.cmpi eq, %192, %329 : vector<10x20xi32>
    %331 = vector.broadcast %328 : vector<1x1xi32> to vector<10x20xi32>
    %332 = arith.cmpi eq, %193, %331 : vector<10x20xi32>
    %333 = arith.andi %330, %332 : vector<10x20xi1>
    %cst_110 = arith.constant 1.000000e+00 : f32
    %cst_111 = arith.constant 0.000000e+00 : f32
    %334 = vector.broadcast %cst_110 : f32 to vector<10x20xf32>
    %335 = vector.broadcast %cst_111 : f32 to vector<10x20xf32>
    %336 = arith.select %333, %334, %335 : vector<10x20xi1>, vector<10x20xf32>
    %337 = arith.addf %316, %336 : vector<10x20xf32>
    %338 = vector.broadcast %328 : vector<1x1xi32> to vector<1x20xi32>
    %339 = arith.cmpi eq, %191, %338 : vector<1x20xi32>
    %cst_112 = arith.constant 0x7F800000 : f32
    %340 = vector.broadcast %cst_112 : f32 to vector<1x20xf32>
    %341 = arith.select %339, %340, %320 : vector<1x20xi1>, vector<1x20xf32>
    %cst_113 = arith.constant dense<0x7F800000> : vector<1xf32>
    %342 = vector.multi_reduction <minimumf>, %341, %cst_113 [1] : vector<1x20xf32> to vector<1xf32>
    %343 = vector.shape_cast %342 : vector<1xf32> to vector<1x1xf32>
    %344 = vector.broadcast %343 : vector<1x1xf32> to vector<1x20xf32>
    %345 = arith.cmpf oeq, %341, %344 : vector<1x20xf32>
    %c20_i32_114 = arith.constant 20 : i32
    %346 = vector.broadcast %c20_i32_114 : i32 to vector<1x20xi32>
    %347 = arith.select %345, %191, %346 : vector<1x20xi1>, vector<1x20xi32>
    %cst_115 = arith.constant dense<2147483647> : vector<1xi32>
    %348 = vector.multi_reduction <minsi>, %347, %cst_115 [1] : vector<1x20xi32> to vector<1xi32>
    %349 = vector.shape_cast %348 : vector<1xi32> to vector<1x1xi32>
    %c7_i32 = arith.constant 7 : i32
    %350 = vector.broadcast %c7_i32 : i32 to vector<10x20xi32>
    %351 = arith.cmpi eq, %192, %350 : vector<10x20xi32>
    %352 = vector.broadcast %349 : vector<1x1xi32> to vector<10x20xi32>
    %353 = arith.cmpi eq, %193, %352 : vector<10x20xi32>
    %354 = arith.andi %351, %353 : vector<10x20xi1>
    %cst_116 = arith.constant 1.000000e+00 : f32
    %cst_117 = arith.constant 0.000000e+00 : f32
    %355 = vector.broadcast %cst_116 : f32 to vector<10x20xf32>
    %356 = vector.broadcast %cst_117 : f32 to vector<10x20xf32>
    %357 = arith.select %354, %355, %356 : vector<10x20xi1>, vector<10x20xf32>
    %358 = arith.addf %337, %357 : vector<10x20xf32>
    %359 = vector.broadcast %349 : vector<1x1xi32> to vector<1x20xi32>
    %360 = arith.cmpi eq, %191, %359 : vector<1x20xi32>
    %cst_118 = arith.constant 0x7F800000 : f32
    %361 = vector.broadcast %cst_118 : f32 to vector<1x20xf32>
    %362 = arith.select %360, %361, %341 : vector<1x20xi1>, vector<1x20xf32>
    %cst_119 = arith.constant dense<0x7F800000> : vector<1xf32>
    %363 = vector.multi_reduction <minimumf>, %362, %cst_119 [1] : vector<1x20xf32> to vector<1xf32>
    %364 = vector.shape_cast %363 : vector<1xf32> to vector<1x1xf32>
    %365 = vector.broadcast %364 : vector<1x1xf32> to vector<1x20xf32>
    %366 = arith.cmpf oeq, %362, %365 : vector<1x20xf32>
    %c20_i32_120 = arith.constant 20 : i32
    %367 = vector.broadcast %c20_i32_120 : i32 to vector<1x20xi32>
    %368 = arith.select %366, %191, %367 : vector<1x20xi1>, vector<1x20xi32>
    %cst_121 = arith.constant dense<2147483647> : vector<1xi32>
    %369 = vector.multi_reduction <minsi>, %368, %cst_121 [1] : vector<1x20xi32> to vector<1xi32>
    %370 = vector.shape_cast %369 : vector<1xi32> to vector<1x1xi32>
    %c8_i32_122 = arith.constant 8 : i32
    %371 = vector.broadcast %c8_i32_122 : i32 to vector<10x20xi32>
    %372 = arith.cmpi eq, %192, %371 : vector<10x20xi32>
    %373 = vector.broadcast %370 : vector<1x1xi32> to vector<10x20xi32>
    %374 = arith.cmpi eq, %193, %373 : vector<10x20xi32>
    %375 = arith.andi %372, %374 : vector<10x20xi1>
    %cst_123 = arith.constant 1.000000e+00 : f32
    %cst_124 = arith.constant 0.000000e+00 : f32
    %376 = vector.broadcast %cst_123 : f32 to vector<10x20xf32>
    %377 = vector.broadcast %cst_124 : f32 to vector<10x20xf32>
    %378 = arith.select %375, %376, %377 : vector<10x20xi1>, vector<10x20xf32>
    %379 = arith.addf %358, %378 : vector<10x20xf32>
    %380 = vector.broadcast %370 : vector<1x1xi32> to vector<1x20xi32>
    %381 = arith.cmpi eq, %191, %380 : vector<1x20xi32>
    %cst_125 = arith.constant 0x7F800000 : f32
    %382 = vector.broadcast %cst_125 : f32 to vector<1x20xf32>
    %383 = arith.select %381, %382, %362 : vector<1x20xi1>, vector<1x20xf32>
    %cst_126 = arith.constant dense<0x7F800000> : vector<1xf32>
    %384 = vector.multi_reduction <minimumf>, %383, %cst_126 [1] : vector<1x20xf32> to vector<1xf32>
    %385 = vector.shape_cast %384 : vector<1xf32> to vector<1x1xf32>
    %386 = vector.broadcast %385 : vector<1x1xf32> to vector<1x20xf32>
    %387 = arith.cmpf oeq, %383, %386 : vector<1x20xf32>
    %c20_i32_127 = arith.constant 20 : i32
    %388 = vector.broadcast %c20_i32_127 : i32 to vector<1x20xi32>
    %389 = arith.select %387, %191, %388 : vector<1x20xi1>, vector<1x20xi32>
    %cst_128 = arith.constant dense<2147483647> : vector<1xi32>
    %390 = vector.multi_reduction <minsi>, %389, %cst_128 [1] : vector<1x20xi32> to vector<1xi32>
    %391 = vector.shape_cast %390 : vector<1xi32> to vector<1x1xi32>
    %c9_i32 = arith.constant 9 : i32
    %392 = vector.broadcast %c9_i32 : i32 to vector<10x20xi32>
    %393 = arith.cmpi eq, %192, %392 : vector<10x20xi32>
    %394 = vector.broadcast %391 : vector<1x1xi32> to vector<10x20xi32>
    %395 = arith.cmpi eq, %193, %394 : vector<10x20xi32>
    %396 = arith.andi %393, %395 : vector<10x20xi1>
    %cst_129 = arith.constant 1.000000e+00 : f32
    %cst_130 = arith.constant 0.000000e+00 : f32
    %397 = vector.broadcast %cst_129 : f32 to vector<10x20xf32>
    %398 = vector.broadcast %cst_130 : f32 to vector<10x20xf32>
    %399 = arith.select %396, %397, %398 : vector<10x20xi1>, vector<10x20xf32>
    %400 = arith.addf %379, %399 : vector<10x20xf32>
    %401 = tpu.iota {dimensions = array<i32: 1>} : vector<1x20xi32>
    %402 = tpu.iota {dimensions = array<i32: 0>} : vector<5x20xi32>
    %403 = tpu.iota {dimensions = array<i32: 1>} : vector<5x20xi32>
    %cst_131 = arith.constant 0.000000e+00 : f32
    %404 = vector.broadcast %cst_131 : f32 to vector<5x20xf32>
    %cst_132 = arith.constant dense<0xFF800000> : vector<1xf32>
    %405 = vector.multi_reduction <maximumf>, %71, %cst_132 [1] : vector<1x20xf32> to vector<1xf32>
    %406 = vector.shape_cast %405 : vector<1xf32> to vector<1x1xf32>
    %407 = vector.broadcast %406 : vector<1x1xf32> to vector<1x20xf32>
    %408 = arith.cmpf oeq, %71, %407 : vector<1x20xf32>
    %c20_i32_133 = arith.constant 20 : i32
    %409 = vector.broadcast %c20_i32_133 : i32 to vector<1x20xi32>
    %410 = arith.select %408, %401, %409 : vector<1x20xi1>, vector<1x20xi32>
    %cst_134 = arith.constant dense<2147483647> : vector<1xi32>
    %411 = vector.multi_reduction <minsi>, %410, %cst_134 [1] : vector<1x20xi32> to vector<1xi32>
    %412 = vector.shape_cast %411 : vector<1xi32> to vector<1x1xi32>
    %c0_i32_135 = arith.constant 0 : i32
    %413 = vector.broadcast %c0_i32_135 : i32 to vector<5x20xi32>
    %414 = arith.cmpi eq, %402, %413 : vector<5x20xi32>
    %415 = vector.broadcast %412 : vector<1x1xi32> to vector<5x20xi32>
    %416 = arith.cmpi eq, %403, %415 : vector<5x20xi32>
    %417 = arith.andi %414, %416 : vector<5x20xi1>
    %cst_136 = arith.constant 1.000000e+00 : f32
    %cst_137 = arith.constant 0.000000e+00 : f32
    %418 = vector.broadcast %cst_136 : f32 to vector<5x20xf32>
    %419 = vector.broadcast %cst_137 : f32 to vector<5x20xf32>
    %420 = arith.select %417, %418, %419 : vector<5x20xi1>, vector<5x20xf32>
    %421 = arith.addf %404, %420 : vector<5x20xf32>
    %422 = vector.broadcast %412 : vector<1x1xi32> to vector<1x20xi32>
    %423 = arith.cmpi eq, %401, %422 : vector<1x20xi32>
    %cst_138 = arith.constant 0xFF800000 : f32
    %424 = vector.broadcast %cst_138 : f32 to vector<1x20xf32>
    %425 = arith.select %423, %424, %71 : vector<1x20xi1>, vector<1x20xf32>
    %cst_139 = arith.constant dense<0xFF800000> : vector<1xf32>
    %426 = vector.multi_reduction <maximumf>, %425, %cst_139 [1] : vector<1x20xf32> to vector<1xf32>
    %427 = vector.shape_cast %426 : vector<1xf32> to vector<1x1xf32>
    %428 = vector.broadcast %427 : vector<1x1xf32> to vector<1x20xf32>
    %429 = arith.cmpf oeq, %425, %428 : vector<1x20xf32>
    %c20_i32_140 = arith.constant 20 : i32
    %430 = vector.broadcast %c20_i32_140 : i32 to vector<1x20xi32>
    %431 = arith.select %429, %401, %430 : vector<1x20xi1>, vector<1x20xi32>
    %cst_141 = arith.constant dense<2147483647> : vector<1xi32>
    %432 = vector.multi_reduction <minsi>, %431, %cst_141 [1] : vector<1x20xi32> to vector<1xi32>
    %433 = vector.shape_cast %432 : vector<1xi32> to vector<1x1xi32>
    %c1_i32_142 = arith.constant 1 : i32
    %434 = vector.broadcast %c1_i32_142 : i32 to vector<5x20xi32>
    %435 = arith.cmpi eq, %402, %434 : vector<5x20xi32>
    %436 = vector.broadcast %433 : vector<1x1xi32> to vector<5x20xi32>
    %437 = arith.cmpi eq, %403, %436 : vector<5x20xi32>
    %438 = arith.andi %435, %437 : vector<5x20xi1>
    %cst_143 = arith.constant 1.000000e+00 : f32
    %cst_144 = arith.constant 0.000000e+00 : f32
    %439 = vector.broadcast %cst_143 : f32 to vector<5x20xf32>
    %440 = vector.broadcast %cst_144 : f32 to vector<5x20xf32>
    %441 = arith.select %438, %439, %440 : vector<5x20xi1>, vector<5x20xf32>
    %442 = arith.addf %421, %441 : vector<5x20xf32>
    %443 = vector.broadcast %433 : vector<1x1xi32> to vector<1x20xi32>
    %444 = arith.cmpi eq, %401, %443 : vector<1x20xi32>
    %cst_145 = arith.constant 0xFF800000 : f32
    %445 = vector.broadcast %cst_145 : f32 to vector<1x20xf32>
    %446 = arith.select %444, %445, %425 : vector<1x20xi1>, vector<1x20xf32>
    %cst_146 = arith.constant dense<0xFF800000> : vector<1xf32>
    %447 = vector.multi_reduction <maximumf>, %446, %cst_146 [1] : vector<1x20xf32> to vector<1xf32>
    %448 = vector.shape_cast %447 : vector<1xf32> to vector<1x1xf32>
    %449 = vector.broadcast %448 : vector<1x1xf32> to vector<1x20xf32>
    %450 = arith.cmpf oeq, %446, %449 : vector<1x20xf32>
    %c20_i32_147 = arith.constant 20 : i32
    %451 = vector.broadcast %c20_i32_147 : i32 to vector<1x20xi32>
    %452 = arith.select %450, %401, %451 : vector<1x20xi1>, vector<1x20xi32>
    %cst_148 = arith.constant dense<2147483647> : vector<1xi32>
    %453 = vector.multi_reduction <minsi>, %452, %cst_148 [1] : vector<1x20xi32> to vector<1xi32>
    %454 = vector.shape_cast %453 : vector<1xi32> to vector<1x1xi32>
    %c2_i32_149 = arith.constant 2 : i32
    %455 = vector.broadcast %c2_i32_149 : i32 to vector<5x20xi32>
    %456 = arith.cmpi eq, %402, %455 : vector<5x20xi32>
    %457 = vector.broadcast %454 : vector<1x1xi32> to vector<5x20xi32>
    %458 = arith.cmpi eq, %403, %457 : vector<5x20xi32>
    %459 = arith.andi %456, %458 : vector<5x20xi1>
    %cst_150 = arith.constant 1.000000e+00 : f32
    %cst_151 = arith.constant 0.000000e+00 : f32
    %460 = vector.broadcast %cst_150 : f32 to vector<5x20xf32>
    %461 = vector.broadcast %cst_151 : f32 to vector<5x20xf32>
    %462 = arith.select %459, %460, %461 : vector<5x20xi1>, vector<5x20xf32>
    %463 = arith.addf %442, %462 : vector<5x20xf32>
    %464 = vector.broadcast %454 : vector<1x1xi32> to vector<1x20xi32>
    %465 = arith.cmpi eq, %401, %464 : vector<1x20xi32>
    %cst_152 = arith.constant 0xFF800000 : f32
    %466 = vector.broadcast %cst_152 : f32 to vector<1x20xf32>
    %467 = arith.select %465, %466, %446 : vector<1x20xi1>, vector<1x20xf32>
    %cst_153 = arith.constant dense<0xFF800000> : vector<1xf32>
    %468 = vector.multi_reduction <maximumf>, %467, %cst_153 [1] : vector<1x20xf32> to vector<1xf32>
    %469 = vector.shape_cast %468 : vector<1xf32> to vector<1x1xf32>
    %470 = vector.broadcast %469 : vector<1x1xf32> to vector<1x20xf32>
    %471 = arith.cmpf oeq, %467, %470 : vector<1x20xf32>
    %c20_i32_154 = arith.constant 20 : i32
    %472 = vector.broadcast %c20_i32_154 : i32 to vector<1x20xi32>
    %473 = arith.select %471, %401, %472 : vector<1x20xi1>, vector<1x20xi32>
    %cst_155 = arith.constant dense<2147483647> : vector<1xi32>
    %474 = vector.multi_reduction <minsi>, %473, %cst_155 [1] : vector<1x20xi32> to vector<1xi32>
    %475 = vector.shape_cast %474 : vector<1xi32> to vector<1x1xi32>
    %c3_i32_156 = arith.constant 3 : i32
    %476 = vector.broadcast %c3_i32_156 : i32 to vector<5x20xi32>
    %477 = arith.cmpi eq, %402, %476 : vector<5x20xi32>
    %478 = vector.broadcast %475 : vector<1x1xi32> to vector<5x20xi32>
    %479 = arith.cmpi eq, %403, %478 : vector<5x20xi32>
    %480 = arith.andi %477, %479 : vector<5x20xi1>
    %cst_157 = arith.constant 1.000000e+00 : f32
    %cst_158 = arith.constant 0.000000e+00 : f32
    %481 = vector.broadcast %cst_157 : f32 to vector<5x20xf32>
    %482 = vector.broadcast %cst_158 : f32 to vector<5x20xf32>
    %483 = arith.select %480, %481, %482 : vector<5x20xi1>, vector<5x20xf32>
    %484 = arith.addf %463, %483 : vector<5x20xf32>
    %485 = vector.broadcast %475 : vector<1x1xi32> to vector<1x20xi32>
    %486 = arith.cmpi eq, %401, %485 : vector<1x20xi32>
    %cst_159 = arith.constant 0xFF800000 : f32
    %487 = vector.broadcast %cst_159 : f32 to vector<1x20xf32>
    %488 = arith.select %486, %487, %467 : vector<1x20xi1>, vector<1x20xf32>
    %cst_160 = arith.constant dense<0xFF800000> : vector<1xf32>
    %489 = vector.multi_reduction <maximumf>, %488, %cst_160 [1] : vector<1x20xf32> to vector<1xf32>
    %490 = vector.shape_cast %489 : vector<1xf32> to vector<1x1xf32>
    %491 = vector.broadcast %490 : vector<1x1xf32> to vector<1x20xf32>
    %492 = arith.cmpf oeq, %488, %491 : vector<1x20xf32>
    %c20_i32_161 = arith.constant 20 : i32
    %493 = vector.broadcast %c20_i32_161 : i32 to vector<1x20xi32>
    %494 = arith.select %492, %401, %493 : vector<1x20xi1>, vector<1x20xi32>
    %cst_162 = arith.constant dense<2147483647> : vector<1xi32>
    %495 = vector.multi_reduction <minsi>, %494, %cst_162 [1] : vector<1x20xi32> to vector<1xi32>
    %496 = vector.shape_cast %495 : vector<1xi32> to vector<1x1xi32>
    %c4_i32_163 = arith.constant 4 : i32
    %497 = vector.broadcast %c4_i32_163 : i32 to vector<5x20xi32>
    %498 = arith.cmpi eq, %402, %497 : vector<5x20xi32>
    %499 = vector.broadcast %496 : vector<1x1xi32> to vector<5x20xi32>
    %500 = arith.cmpi eq, %403, %499 : vector<5x20xi32>
    %501 = arith.andi %498, %500 : vector<5x20xi1>
    %cst_164 = arith.constant 1.000000e+00 : f32
    %cst_165 = arith.constant 0.000000e+00 : f32
    %502 = vector.broadcast %cst_164 : f32 to vector<5x20xf32>
    %503 = vector.broadcast %cst_165 : f32 to vector<5x20xf32>
    %504 = arith.select %501, %502, %503 : vector<5x20xi1>, vector<5x20xf32>
    %505 = arith.addf %484, %504 : vector<5x20xf32>
    %c0_166 = arith.constant 0 : index
    %c0_167 = arith.constant 0 : index
    %506 = vector.load %arg10[%c0_166, %c0_167] : memref<2x5xf32, #tpu.memory_space<vmem>>, vector<1x5xf32>
    tpu.vector_store %arg10[%c0_166, %c0_167], %159 {strides = array<i32>} : memref<2x5xf32, #tpu.memory_space<vmem>>, vector<1x5xf32>,
    %c0_168 = arith.constant 0 : index
    %c0_169 = arith.constant 0 : index
    %507 = vector.load %arg11[%c0_168, %c0_169] : memref<2x2xf32, #tpu.memory_space<vmem>>, vector<1x2xf32>
    tpu.vector_store %arg11[%c0_168, %c0_169], %190 {strides = array<i32>} : memref<2x2xf32, #tpu.memory_space<vmem>>, vector<1x2xf32>,
    %cst_170 = arith.constant dense<0.000000e+00> : vector<10x32xf32>
    %508 = tpu.matmul %400, %38, %cst_170 {dimension_numbers = #tpu.dot_dimension_numbers<[1], [0], [0], [1], [0, 0, 1, 1], [], []>} : vector<10x20xf32>, vector<20x32xf32>, vector<10x32xf32> -> vector<10x32xf32>
    %cst_171 = arith.constant dense<0.000000e+00> : vector<5x32xf32>
    %509 = tpu.matmul %505, %38, %cst_171 {dimension_numbers = #tpu.dot_dimension_numbers<[1], [0], [0], [1], [0, 0, 1, 1], [], []>} : vector<5x20xf32>, vector<20x32xf32>, vector<5x32xf32> -> vector<5x32xf32>
    %c0_172 = arith.constant 0 : index
    %c0_173 = arith.constant 0 : index
    %c0_174 = arith.constant 0 : index
    %510 = vector.load %arg0[%c0_172, %c0_173, %c0_174] : memref<2x8x32xf32, #tpu.memory_space<vmem>>, vector<1x8x32xf32>
    %511 = vector.shape_cast %510 : vector<1x8x32xf32> to vector<8x32xf32>
    %512 = arith.mulf %511, %511 : vector<8x32xf32>
    %cst_175 = arith.constant dense<0.000000e+00> : vector<8xf32>
    %513 = vector.multi_reduction <add>, %512, %cst_175 [1] : vector<8x32xf32> to vector<8xf32>
    %514 = vector.shape_cast %513 : vector<8xf32> to vector<8x1xf32>
    %cst_176 = arith.constant 9.99999996E-13 : f32
    %515 = vector.broadcast %cst_176 : f32 to vector<8x1xf32>
    %516 = arith.addf %514, %515 : vector<8x1xf32>
    %517 = math.rsqrt %516 : vector<8x1xf32>
    %518 = vector.broadcast %517 : vector<8x1xf32> to vector<8x32xf32>
    %519 = arith.mulf %511, %518 : vector<8x32xf32>
    %cst_177 = arith.constant dense<0.000000e+00> : vector<8x8xf32>
    %520 = tpu.matmul %519, %519, %cst_177 {dimension_numbers = #tpu.dot_dimension_numbers<[1], [1], [0], [0], [0, 0, 1, 0], [], []>} : vector<8x32xf32>, vector<8x32xf32>, vector<8x8xf32> -> vector<8x8xf32>
    %cst_178 = arith.constant dense<0xFF800000> : vector<8xf32>
    %521 = vector.multi_reduction <maximumf>, %520, %cst_178 [1] : vector<8x8xf32> to vector<8xf32>
    %522 = vector.shape_cast %521 : vector<8xf32> to vector<8x1xf32>
    %523 = vector.broadcast %522 : vector<8x1xf32> to vector<8x8xf32>
    %524 = arith.subf %520, %523 : vector<8x8xf32>
    %525 = math.exp %524 : vector<8x8xf32>
    %cst_179 = arith.constant dense<0.000000e+00> : vector<8xf32>
    %526 = vector.multi_reduction <add>, %525, %cst_179 [1] : vector<8x8xf32> to vector<8xf32>
    %527 = vector.shape_cast %526 : vector<8xf32> to vector<8x1xf32>
    %528 = vector.broadcast %527 : vector<8x1xf32> to vector<8x8xf32>
    %529 = arith.divf %525, %528 : vector<8x8xf32>
    %cst_180 = arith.constant dense<0.000000e+00> : vector<8x32xf32>
    %530 = tpu.matmul %529, %511, %cst_180 {dimension_numbers = #tpu.dot_dimension_numbers<[1], [0], [0], [1], [0, 0, 1, 1], [], []>} : vector<8x8xf32>, vector<8x32xf32>, vector<8x32xf32> -> vector<8x32xf32>
    %c0_181 = arith.constant 0 : index
    %c0_182 = arith.constant 0 : index
    %c0_183 = arith.constant 0 : index
    %531 = vector.load %arg12[%c0_181, %c0_182, %c0_183] : memref<2x8x32xf32, #tpu.memory_space<vmem>>, vector<1x8x32xf32>
    %532 = vector.shape_cast %531 : vector<1x8x32xf32> to vector<8x32xf32>
    %533 = vector.shape_cast %530 : vector<8x32xf32> to vector<1x8x32xf32>
    tpu.vector_store %arg12[%c0_181, %c0_182, %c0_183], %533 {strides = array<i32>} : memref<2x8x32xf32, #tpu.memory_space<vmem>>, vector<1x8x32xf32>,
    %534 = arith.mulf %508, %508 : vector<10x32xf32>
    %cst_184 = arith.constant dense<0.000000e+00> : vector<10xf32>
    %535 = vector.multi_reduction <add>, %534, %cst_184 [1] : vector<10x32xf32> to vector<10xf32>
    %536 = vector.shape_cast %535 : vector<10xf32> to vector<10x1xf32>
    %cst_185 = arith.constant 9.99999996E-13 : f32
    %537 = vector.broadcast %cst_185 : f32 to vector<10x1xf32>
    %538 = arith.addf %536, %537 : vector<10x1xf32>
    %539 = math.rsqrt %538 : vector<10x1xf32>
    %540 = vector.broadcast %539 : vector<10x1xf32> to vector<10x32xf32>
    %541 = arith.mulf %508, %540 : vector<10x32xf32>
    %cst_186 = arith.constant dense<0.000000e+00> : vector<10x10xf32>
    %542 = tpu.matmul %541, %541, %cst_186 {dimension_numbers = #tpu.dot_dimension_numbers<[1], [1], [0], [0], [0, 0, 1, 0], [], []>} : vector<10x32xf32>, vector<10x32xf32>, vector<10x10xf32> -> vector<10x10xf32>
    %cst_187 = arith.constant dense<0xFF800000> : vector<10xf32>
    %543 = vector.multi_reduction <maximumf>, %542, %cst_187 [1] : vector<10x10xf32> to vector<10xf32>
    %544 = vector.shape_cast %543 : vector<10xf32> to vector<10x1xf32>
    %545 = vector.broadcast %544 : vector<10x1xf32> to vector<10x10xf32>
    %546 = arith.subf %542, %545 : vector<10x10xf32>
    %547 = math.exp %546 : vector<10x10xf32>
    %cst_188 = arith.constant dense<0.000000e+00> : vector<10xf32>
    %548 = vector.multi_reduction <add>, %547, %cst_188 [1] : vector<10x10xf32> to vector<10xf32>
    %549 = vector.shape_cast %548 : vector<10xf32> to vector<10x1xf32>
    %550 = vector.broadcast %549 : vector<10x1xf32> to vector<10x10xf32>
    %551 = arith.divf %547, %550 : vector<10x10xf32>
    %cst_189 = arith.constant dense<0.000000e+00> : vector<10x32xf32>
    %552 = tpu.matmul %551, %508, %cst_189 {dimension_numbers = #tpu.dot_dimension_numbers<[1], [0], [0], [1], [0, 0, 1, 1], [], []>} : vector<10x10xf32>, vector<10x32xf32>, vector<10x32xf32> -> vector<10x32xf32>
    %c0_190 = arith.constant 0 : index
    %c0_191 = arith.constant 0 : index
    %c0_192 = arith.constant 0 : index
    %553 = vector.load %arg13[%c0_190, %c0_191, %c0_192] : memref<2x10x32xf32, #tpu.memory_space<vmem>>, vector<1x10x32xf32>
    %554 = vector.shape_cast %553 : vector<1x10x32xf32> to vector<10x32xf32>
    %555 = vector.shape_cast %552 : vector<10x32xf32> to vector<1x10x32xf32>
    tpu.vector_store %arg13[%c0_190, %c0_191, %c0_192], %555 {strides = array<i32>} : memref<2x10x32xf32, #tpu.memory_space<vmem>>, vector<1x10x32xf32>,
    %556 = arith.mulf %509, %509 : vector<5x32xf32>
    %cst_193 = arith.constant dense<0.000000e+00> : vector<5xf32>
    %557 = vector.multi_reduction <add>, %556, %cst_193 [1] : vector<5x32xf32> to vector<5xf32>
    %558 = vector.shape_cast %557 : vector<5xf32> to vector<5x1xf32>
    %cst_194 = arith.constant 9.99999996E-13 : f32
    %559 = vector.broadcast %cst_194 : f32 to vector<5x1xf32>
    %560 = arith.addf %558, %559 : vector<5x1xf32>
    %561 = math.rsqrt %560 : vector<5x1xf32>
    %562 = vector.broadcast %561 : vector<5x1xf32> to vector<5x32xf32>
    %563 = arith.mulf %509, %562 : vector<5x32xf32>
    %cst_195 = arith.constant dense<0.000000e+00> : vector<5x5xf32>
    %564 = tpu.matmul %563, %563, %cst_195 {dimension_numbers = #tpu.dot_dimension_numbers<[1], [1], [0], [0], [0, 0, 1, 0], [], []>} : vector<5x32xf32>, vector<5x32xf32>, vector<5x5xf32> -> vector<5x5xf32>
    %cst_196 = arith.constant dense<0xFF800000> : vector<5xf32>
    %565 = vector.multi_reduction <maximumf>, %564, %cst_196 [1] : vector<5x5xf32> to vector<5xf32>
    %566 = vector.shape_cast %565 : vector<5xf32> to vector<5x1xf32>
    %567 = vector.broadcast %566 : vector<5x1xf32> to vector<5x5xf32>
    %568 = arith.subf %564, %567 : vector<5x5xf32>
    %569 = math.exp %568 : vector<5x5xf32>
    %cst_197 = arith.constant dense<0.000000e+00> : vector<5xf32>
    %570 = vector.multi_reduction <add>, %569, %cst_197 [1] : vector<5x5xf32> to vector<5xf32>
    %571 = vector.shape_cast %570 : vector<5xf32> to vector<5x1xf32>
    %572 = vector.broadcast %571 : vector<5x1xf32> to vector<5x5xf32>
    %573 = arith.divf %569, %572 : vector<5x5xf32>
    %cst_198 = arith.constant dense<0.000000e+00> : vector<5x32xf32>
    %574 = tpu.matmul %573, %509, %cst_198 {dimension_numbers = #tpu.dot_dimension_numbers<[1], [0], [0], [1], [0, 0, 1, 1], [], []>} : vector<5x5xf32>, vector<5x32xf32>, vector<5x32xf32> -> vector<5x32xf32>
    %c0_199 = arith.constant 0 : index
    %c0_200 = arith.constant 0 : index
    %c0_201 = arith.constant 0 : index
    %575 = vector.load %arg14[%c0_199, %c0_200, %c0_201] : memref<2x5x32xf32, #tpu.memory_space<vmem>>, vector<1x5x32xf32>
    %576 = vector.shape_cast %575 : vector<1x5x32xf32> to vector<5x32xf32>
    %577 = vector.shape_cast %574 : vector<5x32xf32> to vector<1x5x32xf32>
    tpu.vector_store %arg14[%c0_199, %c0_200, %c0_201], %577 {strides = array<i32>} : memref<2x5x32xf32, #tpu.memory_space<vmem>>, vector<1x5x32xf32>,
    %c1 = arith.constant 1 : index
    %c0_202 = arith.constant 0 : index
    %c0_203 = arith.constant 0 : index
    %578 = vector.load %arg1[%c1, %c0_202, %c0_203] : memref<2x6x32xf32, #tpu.memory_space<vmem>>, vector<1x6x32xf32>
    %579 = vector.shape_cast %578 : vector<1x6x32xf32> to vector<6x32xf32>
    %c1_204 = arith.constant 1 : index
    %c0_205 = arith.constant 0 : index
    %c0_206 = arith.constant 0 : index
    %580 = vector.load %arg2[%c1_204, %c0_205, %c0_206] : memref<2x6x32xf32, #tpu.memory_space<vmem>>, vector<1x6x32xf32>
    %581 = vector.shape_cast %580 : vector<1x6x32xf32> to vector<6x32xf32>
    %582 = tpu.concatenate %579, %581 in 0 : vector<6x32xf32>, vector<6x32xf32> -> vector<12x32xf32>
    %cst_207 = arith.constant dense<0.000000e+00> : vector<12x32xf32>
    %583 = tpu.matmul %582, %0, %cst_207 {dimension_numbers = #tpu.dot_dimension_numbers<[1], [1], [0], [0], [0, 0, 1, 0], [], []>} : vector<12x32xf32>, vector<32x32xf32>, vector<12x32xf32> -> vector<12x32xf32>
    %584 = vector.broadcast %1 : vector<1x32xf32> to vector<12x32xf32>
    %585 = arith.addf %583, %584 : vector<12x32xf32>
    %c1_208 = arith.constant 1 : index
    %c0_209 = arith.constant 0 : index
    %c0_210 = arith.constant 0 : index
    %586 = vector.load %arg4[%c1_208, %c0_209, %c0_210] : memref<2x8x32xf32, #tpu.memory_space<vmem>>, vector<1x8x32xf32>
    %587 = vector.shape_cast %586 : vector<1x8x32xf32> to vector<8x32xf32>
    %cst_211 = arith.constant dense<0.000000e+00> : vector<8x32xf32>
    %588 = tpu.matmul %587, %2, %cst_211 {dimension_numbers = #tpu.dot_dimension_numbers<[1], [1], [0], [0], [0, 0, 1, 0], [], []>} : vector<8x32xf32>, vector<32x32xf32>, vector<8x32xf32> -> vector<8x32xf32>
    %589 = vector.broadcast %3 : vector<1x32xf32> to vector<8x32xf32>
    %590 = arith.addf %588, %589 : vector<8x32xf32>
    %591 = tpu.concatenate %585, %590 in 0 : vector<12x32xf32>, vector<8x32xf32> -> vector<20x32xf32>
    %592 = arith.mulf %590, %590 : vector<8x32xf32>
    %cst_212 = arith.constant dense<0.000000e+00> : vector<8xf32>
    %593 = vector.multi_reduction <add>, %592, %cst_212 [1] : vector<8x32xf32> to vector<8xf32>
    %594 = vector.shape_cast %593 : vector<8xf32> to vector<8x1xf32>
    %cst_213 = arith.constant 9.99999996E-13 : f32
    %595 = vector.broadcast %cst_213 : f32 to vector<8x1xf32>
    %596 = arith.addf %594, %595 : vector<8x1xf32>
    %597 = math.rsqrt %596 : vector<8x1xf32>
    %598 = vector.broadcast %597 : vector<8x1xf32> to vector<8x32xf32>
    %599 = arith.mulf %590, %598 : vector<8x32xf32>
    %600 = arith.mulf %585, %585 : vector<12x32xf32>
    %cst_214 = arith.constant dense<0.000000e+00> : vector<12xf32>
    %601 = vector.multi_reduction <add>, %600, %cst_214 [1] : vector<12x32xf32> to vector<12xf32>
    %602 = vector.shape_cast %601 : vector<12xf32> to vector<12x1xf32>
    %cst_215 = arith.constant 9.99999996E-13 : f32
    %603 = vector.broadcast %cst_215 : f32 to vector<12x1xf32>
    %604 = arith.addf %602, %603 : vector<12x1xf32>
    %605 = math.rsqrt %604 : vector<12x1xf32>
    %606 = vector.broadcast %605 : vector<12x1xf32> to vector<12x32xf32>
    %607 = arith.mulf %585, %606 : vector<12x32xf32>
    %cst_216 = arith.constant dense<0.000000e+00> : vector<8x12xf32>
    %608 = tpu.matmul %599, %607, %cst_216 {dimension_numbers = #tpu.dot_dimension_numbers<[1], [1], [0], [0], [0, 0, 1, 0], [], []>} : vector<8x32xf32>, vector<12x32xf32>, vector<8x12xf32> -> vector<8x12xf32>
    %cst_217 = arith.constant dense<0xFF800000> : vector<8xf32>
    %609 = vector.multi_reduction <maximumf>, %608, %cst_217 [1] : vector<8x12xf32> to vector<8xf32>
    %610 = vector.shape_cast %609 : vector<8xf32> to vector<8x1xf32>
    %611 = vector.broadcast %610 : vector<8x1xf32> to vector<8x12xf32>
    %612 = arith.subf %608, %611 : vector<8x12xf32>
    %613 = math.exp %612 : vector<8x12xf32>
    %cst_218 = arith.constant dense<0.000000e+00> : vector<8xf32>
    %614 = vector.multi_reduction <add>, %613, %cst_218 [1] : vector<8x12xf32> to vector<8xf32>
    %615 = vector.shape_cast %614 : vector<8xf32> to vector<8x1xf32>
    %616 = vector.broadcast %615 : vector<8x1xf32> to vector<8x12xf32>
    %617 = arith.divf %613, %616 : vector<8x12xf32>
    %c1_219 = arith.constant 1 : index
    %c0_220 = arith.constant 0 : index
    %618 = vector.load %arg3[%c1_219, %c0_220] : memref<2x6xf32, #tpu.memory_space<vmem>>, vector<1x6xf32>
    %cst_221 = arith.constant dense<0.000000e+00> : vector<1x12xf32>
    %619 = tpu.matmul %618, %10, %cst_221 {dimension_numbers = #tpu.dot_dimension_numbers<[1], [0], [0], [1], [0, 0, 1, 1], [], []>} : vector<1x6xf32>, vector<6x12xf32>, vector<1x12xf32> -> vector<1x12xf32>
    %cst_222 = arith.constant dense<0.000000e+00> : vector<1x8xf32>
    %620 = tpu.matmul %619, %617, %cst_222 {dimension_numbers = #tpu.dot_dimension_numbers<[1], [1], [0], [0], [0, 0, 1, 0], [], []>} : vector<1x12xf32>, vector<8x12xf32>, vector<1x8xf32> -> vector<1x8xf32>
    %c1_223 = arith.constant 1 : index
    %c0_224 = arith.constant 0 : index
    %621 = vector.load %arg9[%c1_223, %c0_224] : memref<2x8xf32, #tpu.memory_space<vmem>>, vector<1x8xf32>
    tpu.vector_store %arg9[%c1_223, %c0_224], %620 {strides = array<i32>} : memref<2x8xf32, #tpu.memory_space<vmem>>, vector<1x8xf32>,
    %cst_225 = arith.constant dense<0.000000e+00> : vector<1x20xf32>
    %622 = tpu.matmul %619, %17, %cst_225 {dimension_numbers = #tpu.dot_dimension_numbers<[1], [0], [0], [1], [0, 0, 1, 1], [], []>} : vector<1x12xf32>, vector<12x20xf32>, vector<1x20xf32> -> vector<1x20xf32>
    %cst_226 = arith.constant dense<0.000000e+00> : vector<1x20xf32>
    %623 = tpu.matmul %620, %24, %cst_226 {dimension_numbers = #tpu.dot_dimension_numbers<[1], [0], [0], [1], [0, 0, 1, 1], [], []>} : vector<1x8xf32>, vector<8x20xf32>, vector<1x20xf32> -> vector<1x20xf32>
    %624 = arith.addf %622, %623 : vector<1x20xf32>
    %625 = tpu.iota {dimensions = array<i32: 1>} : vector<1x8xi32>
    %626 = tpu.iota {dimensions = array<i32: 1>} : vector<1x5xi32>
    %cst_227 = arith.constant 0.000000e+00 : f32
    %627 = vector.broadcast %cst_227 : f32 to vector<1x5xf32>
    %cst_228 = arith.constant dense<0x7F800000> : vector<1xf32>
    %628 = vector.multi_reduction <minimumf>, %620, %cst_228 [1] : vector<1x8xf32> to vector<1xf32>
    %629 = vector.shape_cast %628 : vector<1xf32> to vector<1x1xf32>
    %630 = vector.broadcast %629 : vector<1x1xf32> to vector<1x8xf32>
    %631 = arith.cmpf oeq, %620, %630 : vector<1x8xf32>
    %c8_i32_229 = arith.constant 8 : i32
    %632 = vector.broadcast %c8_i32_229 : i32 to vector<1x8xi32>
    %633 = arith.select %631, %625, %632 : vector<1x8xi1>, vector<1x8xi32>
    %cst_230 = arith.constant dense<2147483647> : vector<1xi32>
    %634 = vector.multi_reduction <minsi>, %633, %cst_230 [1] : vector<1x8xi32> to vector<1xi32>
    %635 = vector.shape_cast %634 : vector<1xi32> to vector<1x1xi32>
    %c0_i32_231 = arith.constant 0 : i32
    %636 = vector.broadcast %c0_i32_231 : i32 to vector<1x5xi32>
    %637 = arith.cmpi eq, %626, %636 : vector<1x5xi32>
    %cst_232 = arith.constant 0.000000e+00 : f32
    %638 = vector.shape_cast %629 : vector<1x1xf32> to vector<1x1xf32>
    %639 = vector.broadcast %638 : vector<1x1xf32> to vector<1x5xf32>
    %640 = vector.broadcast %cst_232 : f32 to vector<1x5xf32>
    %641 = arith.select %637, %639, %640 : vector<1x5xi1>, vector<1x5xf32>
    %642 = arith.addf %627, %641 : vector<1x5xf32>
    %643 = vector.broadcast %635 : vector<1x1xi32> to vector<1x8xi32>
    %644 = arith.cmpi eq, %625, %643 : vector<1x8xi32>
    %cst_233 = arith.constant 0x7F800000 : f32
    %645 = vector.broadcast %cst_233 : f32 to vector<1x8xf32>
    %646 = arith.select %644, %645, %620 : vector<1x8xi1>, vector<1x8xf32>
    %cst_234 = arith.constant dense<0x7F800000> : vector<1xf32>
    %647 = vector.multi_reduction <minimumf>, %646, %cst_234 [1] : vector<1x8xf32> to vector<1xf32>
    %648 = vector.shape_cast %647 : vector<1xf32> to vector<1x1xf32>
    %649 = vector.broadcast %648 : vector<1x1xf32> to vector<1x8xf32>
    %650 = arith.cmpf oeq, %646, %649 : vector<1x8xf32>
    %c8_i32_235 = arith.constant 8 : i32
    %651 = vector.broadcast %c8_i32_235 : i32 to vector<1x8xi32>
    %652 = arith.select %650, %625, %651 : vector<1x8xi1>, vector<1x8xi32>
    %cst_236 = arith.constant dense<2147483647> : vector<1xi32>
    %653 = vector.multi_reduction <minsi>, %652, %cst_236 [1] : vector<1x8xi32> to vector<1xi32>
    %654 = vector.shape_cast %653 : vector<1xi32> to vector<1x1xi32>
    %c1_i32_237 = arith.constant 1 : i32
    %655 = vector.broadcast %c1_i32_237 : i32 to vector<1x5xi32>
    %656 = arith.cmpi eq, %626, %655 : vector<1x5xi32>
    %cst_238 = arith.constant 0.000000e+00 : f32
    %657 = vector.shape_cast %648 : vector<1x1xf32> to vector<1x1xf32>
    %658 = vector.broadcast %657 : vector<1x1xf32> to vector<1x5xf32>
    %659 = vector.broadcast %cst_238 : f32 to vector<1x5xf32>
    %660 = arith.select %656, %658, %659 : vector<1x5xi1>, vector<1x5xf32>
    %661 = arith.addf %642, %660 : vector<1x5xf32>
    %662 = vector.broadcast %654 : vector<1x1xi32> to vector<1x8xi32>
    %663 = arith.cmpi eq, %625, %662 : vector<1x8xi32>
    %cst_239 = arith.constant 0x7F800000 : f32
    %664 = vector.broadcast %cst_239 : f32 to vector<1x8xf32>
    %665 = arith.select %663, %664, %646 : vector<1x8xi1>, vector<1x8xf32>
    %cst_240 = arith.constant dense<0x7F800000> : vector<1xf32>
    %666 = vector.multi_reduction <minimumf>, %665, %cst_240 [1] : vector<1x8xf32> to vector<1xf32>
    %667 = vector.shape_cast %666 : vector<1xf32> to vector<1x1xf32>
    %668 = vector.broadcast %667 : vector<1x1xf32> to vector<1x8xf32>
    %669 = arith.cmpf oeq, %665, %668 : vector<1x8xf32>
    %c8_i32_241 = arith.constant 8 : i32
    %670 = vector.broadcast %c8_i32_241 : i32 to vector<1x8xi32>
    %671 = arith.select %669, %625, %670 : vector<1x8xi1>, vector<1x8xi32>
    %cst_242 = arith.constant dense<2147483647> : vector<1xi32>
    %672 = vector.multi_reduction <minsi>, %671, %cst_242 [1] : vector<1x8xi32> to vector<1xi32>
    %673 = vector.shape_cast %672 : vector<1xi32> to vector<1x1xi32>
    %c2_i32_243 = arith.constant 2 : i32
    %674 = vector.broadcast %c2_i32_243 : i32 to vector<1x5xi32>
    %675 = arith.cmpi eq, %626, %674 : vector<1x5xi32>
    %cst_244 = arith.constant 0.000000e+00 : f32
    %676 = vector.shape_cast %667 : vector<1x1xf32> to vector<1x1xf32>
    %677 = vector.broadcast %676 : vector<1x1xf32> to vector<1x5xf32>
    %678 = vector.broadcast %cst_244 : f32 to vector<1x5xf32>
    %679 = arith.select %675, %677, %678 : vector<1x5xi1>, vector<1x5xf32>
    %680 = arith.addf %661, %679 : vector<1x5xf32>
    %681 = vector.broadcast %673 : vector<1x1xi32> to vector<1x8xi32>
    %682 = arith.cmpi eq, %625, %681 : vector<1x8xi32>
    %cst_245 = arith.constant 0x7F800000 : f32
    %683 = vector.broadcast %cst_245 : f32 to vector<1x8xf32>
    %684 = arith.select %682, %683, %665 : vector<1x8xi1>, vector<1x8xf32>
    %cst_246 = arith.constant dense<0x7F800000> : vector<1xf32>
    %685 = vector.multi_reduction <minimumf>, %684, %cst_246 [1] : vector<1x8xf32> to vector<1xf32>
    %686 = vector.shape_cast %685 : vector<1xf32> to vector<1x1xf32>
    %687 = vector.broadcast %686 : vector<1x1xf32> to vector<1x8xf32>
    %688 = arith.cmpf oeq, %684, %687 : vector<1x8xf32>
    %c8_i32_247 = arith.constant 8 : i32
    %689 = vector.broadcast %c8_i32_247 : i32 to vector<1x8xi32>
    %690 = arith.select %688, %625, %689 : vector<1x8xi1>, vector<1x8xi32>
    %cst_248 = arith.constant dense<2147483647> : vector<1xi32>
    %691 = vector.multi_reduction <minsi>, %690, %cst_248 [1] : vector<1x8xi32> to vector<1xi32>
    %692 = vector.shape_cast %691 : vector<1xi32> to vector<1x1xi32>
    %c3_i32_249 = arith.constant 3 : i32
    %693 = vector.broadcast %c3_i32_249 : i32 to vector<1x5xi32>
    %694 = arith.cmpi eq, %626, %693 : vector<1x5xi32>
    %cst_250 = arith.constant 0.000000e+00 : f32
    %695 = vector.shape_cast %686 : vector<1x1xf32> to vector<1x1xf32>
    %696 = vector.broadcast %695 : vector<1x1xf32> to vector<1x5xf32>
    %697 = vector.broadcast %cst_250 : f32 to vector<1x5xf32>
    %698 = arith.select %694, %696, %697 : vector<1x5xi1>, vector<1x5xf32>
    %699 = arith.addf %680, %698 : vector<1x5xf32>
    %700 = vector.broadcast %692 : vector<1x1xi32> to vector<1x8xi32>
    %701 = arith.cmpi eq, %625, %700 : vector<1x8xi32>
    %cst_251 = arith.constant 0x7F800000 : f32
    %702 = vector.broadcast %cst_251 : f32 to vector<1x8xf32>
    %703 = arith.select %701, %702, %684 : vector<1x8xi1>, vector<1x8xf32>
    %cst_252 = arith.constant dense<0x7F800000> : vector<1xf32>
    %704 = vector.multi_reduction <minimumf>, %703, %cst_252 [1] : vector<1x8xf32> to vector<1xf32>
    %705 = vector.shape_cast %704 : vector<1xf32> to vector<1x1xf32>
    %c4_i32_253 = arith.constant 4 : i32
    %706 = vector.broadcast %c4_i32_253 : i32 to vector<1x5xi32>
    %707 = arith.cmpi eq, %626, %706 : vector<1x5xi32>
    %cst_254 = arith.constant 0.000000e+00 : f32
    %708 = vector.shape_cast %705 : vector<1x1xf32> to vector<1x1xf32>
    %709 = vector.broadcast %708 : vector<1x1xf32> to vector<1x5xf32>
    %710 = vector.broadcast %cst_254 : f32 to vector<1x5xf32>
    %711 = arith.select %707, %709, %710 : vector<1x5xi1>, vector<1x5xf32>
    %712 = arith.addf %699, %711 : vector<1x5xf32>
    %713 = tpu.iota {dimensions = array<i32: 1>} : vector<1x8xi32>
    %714 = tpu.iota {dimensions = array<i32: 1>} : vector<1x2xi32>
    %cst_255 = arith.constant 0.000000e+00 : f32
    %715 = vector.broadcast %cst_255 : f32 to vector<1x2xf32>
    %cst_256 = arith.constant dense<0xFF800000> : vector<1xf32>
    %716 = vector.multi_reduction <maximumf>, %620, %cst_256 [1] : vector<1x8xf32> to vector<1xf32>
    %717 = vector.shape_cast %716 : vector<1xf32> to vector<1x1xf32>
    %718 = vector.broadcast %717 : vector<1x1xf32> to vector<1x8xf32>
    %719 = arith.cmpf oeq, %620, %718 : vector<1x8xf32>
    %c8_i32_257 = arith.constant 8 : i32
    %720 = vector.broadcast %c8_i32_257 : i32 to vector<1x8xi32>
    %721 = arith.select %719, %713, %720 : vector<1x8xi1>, vector<1x8xi32>
    %cst_258 = arith.constant dense<2147483647> : vector<1xi32>
    %722 = vector.multi_reduction <minsi>, %721, %cst_258 [1] : vector<1x8xi32> to vector<1xi32>
    %723 = vector.shape_cast %722 : vector<1xi32> to vector<1x1xi32>
    %c0_i32_259 = arith.constant 0 : i32
    %724 = vector.broadcast %c0_i32_259 : i32 to vector<1x2xi32>
    %725 = arith.cmpi eq, %714, %724 : vector<1x2xi32>
    %cst_260 = arith.constant 0.000000e+00 : f32
    %726 = vector.shape_cast %717 : vector<1x1xf32> to vector<1x1xf32>
    %727 = vector.broadcast %726 : vector<1x1xf32> to vector<1x2xf32>
    %728 = vector.broadcast %cst_260 : f32 to vector<1x2xf32>
    %729 = arith.select %725, %727, %728 : vector<1x2xi1>, vector<1x2xf32>
    %730 = arith.addf %715, %729 : vector<1x2xf32>
    %731 = vector.broadcast %723 : vector<1x1xi32> to vector<1x8xi32>
    %732 = arith.cmpi eq, %713, %731 : vector<1x8xi32>
    %cst_261 = arith.constant 0xFF800000 : f32
    %733 = vector.broadcast %cst_261 : f32 to vector<1x8xf32>
    %734 = arith.select %732, %733, %620 : vector<1x8xi1>, vector<1x8xf32>
    %cst_262 = arith.constant dense<0xFF800000> : vector<1xf32>
    %735 = vector.multi_reduction <maximumf>, %734, %cst_262 [1] : vector<1x8xf32> to vector<1xf32>
    %736 = vector.shape_cast %735 : vector<1xf32> to vector<1x1xf32>
    %c1_i32_263 = arith.constant 1 : i32
    %737 = vector.broadcast %c1_i32_263 : i32 to vector<1x2xi32>
    %738 = arith.cmpi eq, %714, %737 : vector<1x2xi32>
    %cst_264 = arith.constant 0.000000e+00 : f32
    %739 = vector.shape_cast %736 : vector<1x1xf32> to vector<1x1xf32>
    %740 = vector.broadcast %739 : vector<1x1xf32> to vector<1x2xf32>
    %741 = vector.broadcast %cst_264 : f32 to vector<1x2xf32>
    %742 = arith.select %738, %740, %741 : vector<1x2xi1>, vector<1x2xf32>
    %743 = arith.addf %730, %742 : vector<1x2xf32>
    %744 = tpu.iota {dimensions = array<i32: 1>} : vector<1x20xi32>
    %745 = tpu.iota {dimensions = array<i32: 0>} : vector<10x20xi32>
    %746 = tpu.iota {dimensions = array<i32: 1>} : vector<10x20xi32>
    %cst_265 = arith.constant 0.000000e+00 : f32
    %747 = vector.broadcast %cst_265 : f32 to vector<10x20xf32>
    %cst_266 = arith.constant dense<0x7F800000> : vector<1xf32>
    %748 = vector.multi_reduction <minimumf>, %624, %cst_266 [1] : vector<1x20xf32> to vector<1xf32>
    %749 = vector.shape_cast %748 : vector<1xf32> to vector<1x1xf32>
    %750 = vector.broadcast %749 : vector<1x1xf32> to vector<1x20xf32>
    %751 = arith.cmpf oeq, %624, %750 : vector<1x20xf32>
    %c20_i32_267 = arith.constant 20 : i32
    %752 = vector.broadcast %c20_i32_267 : i32 to vector<1x20xi32>
    %753 = arith.select %751, %744, %752 : vector<1x20xi1>, vector<1x20xi32>
    %cst_268 = arith.constant dense<2147483647> : vector<1xi32>
    %754 = vector.multi_reduction <minsi>, %753, %cst_268 [1] : vector<1x20xi32> to vector<1xi32>
    %755 = vector.shape_cast %754 : vector<1xi32> to vector<1x1xi32>
    %c0_i32_269 = arith.constant 0 : i32
    %756 = vector.broadcast %c0_i32_269 : i32 to vector<10x20xi32>
    %757 = arith.cmpi eq, %745, %756 : vector<10x20xi32>
    %758 = vector.broadcast %755 : vector<1x1xi32> to vector<10x20xi32>
    %759 = arith.cmpi eq, %746, %758 : vector<10x20xi32>
    %760 = arith.andi %757, %759 : vector<10x20xi1>
    %cst_270 = arith.constant 1.000000e+00 : f32
    %cst_271 = arith.constant 0.000000e+00 : f32
    %761 = vector.broadcast %cst_270 : f32 to vector<10x20xf32>
    %762 = vector.broadcast %cst_271 : f32 to vector<10x20xf32>
    %763 = arith.select %760, %761, %762 : vector<10x20xi1>, vector<10x20xf32>
    %764 = arith.addf %747, %763 : vector<10x20xf32>
    %765 = vector.broadcast %755 : vector<1x1xi32> to vector<1x20xi32>
    %766 = arith.cmpi eq, %744, %765 : vector<1x20xi32>
    %cst_272 = arith.constant 0x7F800000 : f32
    %767 = vector.broadcast %cst_272 : f32 to vector<1x20xf32>
    %768 = arith.select %766, %767, %624 : vector<1x20xi1>, vector<1x20xf32>
    %cst_273 = arith.constant dense<0x7F800000> : vector<1xf32>
    %769 = vector.multi_reduction <minimumf>, %768, %cst_273 [1] : vector<1x20xf32> to vector<1xf32>
    %770 = vector.shape_cast %769 : vector<1xf32> to vector<1x1xf32>
    %771 = vector.broadcast %770 : vector<1x1xf32> to vector<1x20xf32>
    %772 = arith.cmpf oeq, %768, %771 : vector<1x20xf32>
    %c20_i32_274 = arith.constant 20 : i32
    %773 = vector.broadcast %c20_i32_274 : i32 to vector<1x20xi32>
    %774 = arith.select %772, %744, %773 : vector<1x20xi1>, vector<1x20xi32>
    %cst_275 = arith.constant dense<2147483647> : vector<1xi32>
    %775 = vector.multi_reduction <minsi>, %774, %cst_275 [1] : vector<1x20xi32> to vector<1xi32>
    %776 = vector.shape_cast %775 : vector<1xi32> to vector<1x1xi32>
    %c1_i32_276 = arith.constant 1 : i32
    %777 = vector.broadcast %c1_i32_276 : i32 to vector<10x20xi32>
    %778 = arith.cmpi eq, %745, %777 : vector<10x20xi32>
    %779 = vector.broadcast %776 : vector<1x1xi32> to vector<10x20xi32>
    %780 = arith.cmpi eq, %746, %779 : vector<10x20xi32>
    %781 = arith.andi %778, %780 : vector<10x20xi1>
    %cst_277 = arith.constant 1.000000e+00 : f32
    %cst_278 = arith.constant 0.000000e+00 : f32
    %782 = vector.broadcast %cst_277 : f32 to vector<10x20xf32>
    %783 = vector.broadcast %cst_278 : f32 to vector<10x20xf32>
    %784 = arith.select %781, %782, %783 : vector<10x20xi1>, vector<10x20xf32>
    %785 = arith.addf %764, %784 : vector<10x20xf32>
    %786 = vector.broadcast %776 : vector<1x1xi32> to vector<1x20xi32>
    %787 = arith.cmpi eq, %744, %786 : vector<1x20xi32>
    %cst_279 = arith.constant 0x7F800000 : f32
    %788 = vector.broadcast %cst_279 : f32 to vector<1x20xf32>
    %789 = arith.select %787, %788, %768 : vector<1x20xi1>, vector<1x20xf32>
    %cst_280 = arith.constant dense<0x7F800000> : vector<1xf32>
    %790 = vector.multi_reduction <minimumf>, %789, %cst_280 [1] : vector<1x20xf32> to vector<1xf32>
    %791 = vector.shape_cast %790 : vector<1xf32> to vector<1x1xf32>
    %792 = vector.broadcast %791 : vector<1x1xf32> to vector<1x20xf32>
    %793 = arith.cmpf oeq, %789, %792 : vector<1x20xf32>
    %c20_i32_281 = arith.constant 20 : i32
    %794 = vector.broadcast %c20_i32_281 : i32 to vector<1x20xi32>
    %795 = arith.select %793, %744, %794 : vector<1x20xi1>, vector<1x20xi32>
    %cst_282 = arith.constant dense<2147483647> : vector<1xi32>
    %796 = vector.multi_reduction <minsi>, %795, %cst_282 [1] : vector<1x20xi32> to vector<1xi32>
    %797 = vector.shape_cast %796 : vector<1xi32> to vector<1x1xi32>
    %c2_i32_283 = arith.constant 2 : i32
    %798 = vector.broadcast %c2_i32_283 : i32 to vector<10x20xi32>
    %799 = arith.cmpi eq, %745, %798 : vector<10x20xi32>
    %800 = vector.broadcast %797 : vector<1x1xi32> to vector<10x20xi32>
    %801 = arith.cmpi eq, %746, %800 : vector<10x20xi32>
    %802 = arith.andi %799, %801 : vector<10x20xi1>
    %cst_284 = arith.constant 1.000000e+00 : f32
    %cst_285 = arith.constant 0.000000e+00 : f32
    %803 = vector.broadcast %cst_284 : f32 to vector<10x20xf32>
    %804 = vector.broadcast %cst_285 : f32 to vector<10x20xf32>
    %805 = arith.select %802, %803, %804 : vector<10x20xi1>, vector<10x20xf32>
    %806 = arith.addf %785, %805 : vector<10x20xf32>
    %807 = vector.broadcast %797 : vector<1x1xi32> to vector<1x20xi32>
    %808 = arith.cmpi eq, %744, %807 : vector<1x20xi32>
    %cst_286 = arith.constant 0x7F800000 : f32
    %809 = vector.broadcast %cst_286 : f32 to vector<1x20xf32>
    %810 = arith.select %808, %809, %789 : vector<1x20xi1>, vector<1x20xf32>
    %cst_287 = arith.constant dense<0x7F800000> : vector<1xf32>
    %811 = vector.multi_reduction <minimumf>, %810, %cst_287 [1] : vector<1x20xf32> to vector<1xf32>
    %812 = vector.shape_cast %811 : vector<1xf32> to vector<1x1xf32>
    %813 = vector.broadcast %812 : vector<1x1xf32> to vector<1x20xf32>
    %814 = arith.cmpf oeq, %810, %813 : vector<1x20xf32>
    %c20_i32_288 = arith.constant 20 : i32
    %815 = vector.broadcast %c20_i32_288 : i32 to vector<1x20xi32>
    %816 = arith.select %814, %744, %815 : vector<1x20xi1>, vector<1x20xi32>
    %cst_289 = arith.constant dense<2147483647> : vector<1xi32>
    %817 = vector.multi_reduction <minsi>, %816, %cst_289 [1] : vector<1x20xi32> to vector<1xi32>
    %818 = vector.shape_cast %817 : vector<1xi32> to vector<1x1xi32>
    %c3_i32_290 = arith.constant 3 : i32
    %819 = vector.broadcast %c3_i32_290 : i32 to vector<10x20xi32>
    %820 = arith.cmpi eq, %745, %819 : vector<10x20xi32>
    %821 = vector.broadcast %818 : vector<1x1xi32> to vector<10x20xi32>
    %822 = arith.cmpi eq, %746, %821 : vector<10x20xi32>
    %823 = arith.andi %820, %822 : vector<10x20xi1>
    %cst_291 = arith.constant 1.000000e+00 : f32
    %cst_292 = arith.constant 0.000000e+00 : f32
    %824 = vector.broadcast %cst_291 : f32 to vector<10x20xf32>
    %825 = vector.broadcast %cst_292 : f32 to vector<10x20xf32>
    %826 = arith.select %823, %824, %825 : vector<10x20xi1>, vector<10x20xf32>
    %827 = arith.addf %806, %826 : vector<10x20xf32>
    %828 = vector.broadcast %818 : vector<1x1xi32> to vector<1x20xi32>
    %829 = arith.cmpi eq, %744, %828 : vector<1x20xi32>
    %cst_293 = arith.constant 0x7F800000 : f32
    %830 = vector.broadcast %cst_293 : f32 to vector<1x20xf32>
    %831 = arith.select %829, %830, %810 : vector<1x20xi1>, vector<1x20xf32>
    %cst_294 = arith.constant dense<0x7F800000> : vector<1xf32>
    %832 = vector.multi_reduction <minimumf>, %831, %cst_294 [1] : vector<1x20xf32> to vector<1xf32>
    %833 = vector.shape_cast %832 : vector<1xf32> to vector<1x1xf32>
    %834 = vector.broadcast %833 : vector<1x1xf32> to vector<1x20xf32>
    %835 = arith.cmpf oeq, %831, %834 : vector<1x20xf32>
    %c20_i32_295 = arith.constant 20 : i32
    %836 = vector.broadcast %c20_i32_295 : i32 to vector<1x20xi32>
    %837 = arith.select %835, %744, %836 : vector<1x20xi1>, vector<1x20xi32>
    %cst_296 = arith.constant dense<2147483647> : vector<1xi32>
    %838 = vector.multi_reduction <minsi>, %837, %cst_296 [1] : vector<1x20xi32> to vector<1xi32>
    %839 = vector.shape_cast %838 : vector<1xi32> to vector<1x1xi32>
    %c4_i32_297 = arith.constant 4 : i32
    %840 = vector.broadcast %c4_i32_297 : i32 to vector<10x20xi32>
    %841 = arith.cmpi eq, %745, %840 : vector<10x20xi32>
    %842 = vector.broadcast %839 : vector<1x1xi32> to vector<10x20xi32>
    %843 = arith.cmpi eq, %746, %842 : vector<10x20xi32>
    %844 = arith.andi %841, %843 : vector<10x20xi1>
    %cst_298 = arith.constant 1.000000e+00 : f32
    %cst_299 = arith.constant 0.000000e+00 : f32
    %845 = vector.broadcast %cst_298 : f32 to vector<10x20xf32>
    %846 = vector.broadcast %cst_299 : f32 to vector<10x20xf32>
    %847 = arith.select %844, %845, %846 : vector<10x20xi1>, vector<10x20xf32>
    %848 = arith.addf %827, %847 : vector<10x20xf32>
    %849 = vector.broadcast %839 : vector<1x1xi32> to vector<1x20xi32>
    %850 = arith.cmpi eq, %744, %849 : vector<1x20xi32>
    %cst_300 = arith.constant 0x7F800000 : f32
    %851 = vector.broadcast %cst_300 : f32 to vector<1x20xf32>
    %852 = arith.select %850, %851, %831 : vector<1x20xi1>, vector<1x20xf32>
    %cst_301 = arith.constant dense<0x7F800000> : vector<1xf32>
    %853 = vector.multi_reduction <minimumf>, %852, %cst_301 [1] : vector<1x20xf32> to vector<1xf32>
    %854 = vector.shape_cast %853 : vector<1xf32> to vector<1x1xf32>
    %855 = vector.broadcast %854 : vector<1x1xf32> to vector<1x20xf32>
    %856 = arith.cmpf oeq, %852, %855 : vector<1x20xf32>
    %c20_i32_302 = arith.constant 20 : i32
    %857 = vector.broadcast %c20_i32_302 : i32 to vector<1x20xi32>
    %858 = arith.select %856, %744, %857 : vector<1x20xi1>, vector<1x20xi32>
    %cst_303 = arith.constant dense<2147483647> : vector<1xi32>
    %859 = vector.multi_reduction <minsi>, %858, %cst_303 [1] : vector<1x20xi32> to vector<1xi32>
    %860 = vector.shape_cast %859 : vector<1xi32> to vector<1x1xi32>
    %c5_i32_304 = arith.constant 5 : i32
    %861 = vector.broadcast %c5_i32_304 : i32 to vector<10x20xi32>
    %862 = arith.cmpi eq, %745, %861 : vector<10x20xi32>
    %863 = vector.broadcast %860 : vector<1x1xi32> to vector<10x20xi32>
    %864 = arith.cmpi eq, %746, %863 : vector<10x20xi32>
    %865 = arith.andi %862, %864 : vector<10x20xi1>
    %cst_305 = arith.constant 1.000000e+00 : f32
    %cst_306 = arith.constant 0.000000e+00 : f32
    %866 = vector.broadcast %cst_305 : f32 to vector<10x20xf32>
    %867 = vector.broadcast %cst_306 : f32 to vector<10x20xf32>
    %868 = arith.select %865, %866, %867 : vector<10x20xi1>, vector<10x20xf32>
    %869 = arith.addf %848, %868 : vector<10x20xf32>
    %870 = vector.broadcast %860 : vector<1x1xi32> to vector<1x20xi32>
    %871 = arith.cmpi eq, %744, %870 : vector<1x20xi32>
    %cst_307 = arith.constant 0x7F800000 : f32
    %872 = vector.broadcast %cst_307 : f32 to vector<1x20xf32>
    %873 = arith.select %871, %872, %852 : vector<1x20xi1>, vector<1x20xf32>
    %cst_308 = arith.constant dense<0x7F800000> : vector<1xf32>
    %874 = vector.multi_reduction <minimumf>, %873, %cst_308 [1] : vector<1x20xf32> to vector<1xf32>
    %875 = vector.shape_cast %874 : vector<1xf32> to vector<1x1xf32>
    %876 = vector.broadcast %875 : vector<1x1xf32> to vector<1x20xf32>
    %877 = arith.cmpf oeq, %873, %876 : vector<1x20xf32>
    %c20_i32_309 = arith.constant 20 : i32
    %878 = vector.broadcast %c20_i32_309 : i32 to vector<1x20xi32>
    %879 = arith.select %877, %744, %878 : vector<1x20xi1>, vector<1x20xi32>
    %cst_310 = arith.constant dense<2147483647> : vector<1xi32>
    %880 = vector.multi_reduction <minsi>, %879, %cst_310 [1] : vector<1x20xi32> to vector<1xi32>
    %881 = vector.shape_cast %880 : vector<1xi32> to vector<1x1xi32>
    %c6_i32_311 = arith.constant 6 : i32
    %882 = vector.broadcast %c6_i32_311 : i32 to vector<10x20xi32>
    %883 = arith.cmpi eq, %745, %882 : vector<10x20xi32>
    %884 = vector.broadcast %881 : vector<1x1xi32> to vector<10x20xi32>
    %885 = arith.cmpi eq, %746, %884 : vector<10x20xi32>
    %886 = arith.andi %883, %885 : vector<10x20xi1>
    %cst_312 = arith.constant 1.000000e+00 : f32
    %cst_313 = arith.constant 0.000000e+00 : f32
    %887 = vector.broadcast %cst_312 : f32 to vector<10x20xf32>
    %888 = vector.broadcast %cst_313 : f32 to vector<10x20xf32>
    %889 = arith.select %886, %887, %888 : vector<10x20xi1>, vector<10x20xf32>
    %890 = arith.addf %869, %889 : vector<10x20xf32>
    %891 = vector.broadcast %881 : vector<1x1xi32> to vector<1x20xi32>
    %892 = arith.cmpi eq, %744, %891 : vector<1x20xi32>
    %cst_314 = arith.constant 0x7F800000 : f32
    %893 = vector.broadcast %cst_314 : f32 to vector<1x20xf32>
    %894 = arith.select %892, %893, %873 : vector<1x20xi1>, vector<1x20xf32>
    %cst_315 = arith.constant dense<0x7F800000> : vector<1xf32>
    %895 = vector.multi_reduction <minimumf>, %894, %cst_315 [1] : vector<1x20xf32> to vector<1xf32>
    %896 = vector.shape_cast %895 : vector<1xf32> to vector<1x1xf32>
    %897 = vector.broadcast %896 : vector<1x1xf32> to vector<1x20xf32>
    %898 = arith.cmpf oeq, %894, %897 : vector<1x20xf32>
    %c20_i32_316 = arith.constant 20 : i32
    %899 = vector.broadcast %c20_i32_316 : i32 to vector<1x20xi32>
    %900 = arith.select %898, %744, %899 : vector<1x20xi1>, vector<1x20xi32>
    %cst_317 = arith.constant dense<2147483647> : vector<1xi32>
    %901 = vector.multi_reduction <minsi>, %900, %cst_317 [1] : vector<1x20xi32> to vector<1xi32>
    %902 = vector.shape_cast %901 : vector<1xi32> to vector<1x1xi32>
    %c7_i32_318 = arith.constant 7 : i32
    %903 = vector.broadcast %c7_i32_318 : i32 to vector<10x20xi32>
    %904 = arith.cmpi eq, %745, %903 : vector<10x20xi32>
    %905 = vector.broadcast %902 : vector<1x1xi32> to vector<10x20xi32>
    %906 = arith.cmpi eq, %746, %905 : vector<10x20xi32>
    %907 = arith.andi %904, %906 : vector<10x20xi1>
    %cst_319 = arith.constant 1.000000e+00 : f32
    %cst_320 = arith.constant 0.000000e+00 : f32
    %908 = vector.broadcast %cst_319 : f32 to vector<10x20xf32>
    %909 = vector.broadcast %cst_320 : f32 to vector<10x20xf32>
    %910 = arith.select %907, %908, %909 : vector<10x20xi1>, vector<10x20xf32>
    %911 = arith.addf %890, %910 : vector<10x20xf32>
    %912 = vector.broadcast %902 : vector<1x1xi32> to vector<1x20xi32>
    %913 = arith.cmpi eq, %744, %912 : vector<1x20xi32>
    %cst_321 = arith.constant 0x7F800000 : f32
    %914 = vector.broadcast %cst_321 : f32 to vector<1x20xf32>
    %915 = arith.select %913, %914, %894 : vector<1x20xi1>, vector<1x20xf32>
    %cst_322 = arith.constant dense<0x7F800000> : vector<1xf32>
    %916 = vector.multi_reduction <minimumf>, %915, %cst_322 [1] : vector<1x20xf32> to vector<1xf32>
    %917 = vector.shape_cast %916 : vector<1xf32> to vector<1x1xf32>
    %918 = vector.broadcast %917 : vector<1x1xf32> to vector<1x20xf32>
    %919 = arith.cmpf oeq, %915, %918 : vector<1x20xf32>
    %c20_i32_323 = arith.constant 20 : i32
    %920 = vector.broadcast %c20_i32_323 : i32 to vector<1x20xi32>
    %921 = arith.select %919, %744, %920 : vector<1x20xi1>, vector<1x20xi32>
    %cst_324 = arith.constant dense<2147483647> : vector<1xi32>
    %922 = vector.multi_reduction <minsi>, %921, %cst_324 [1] : vector<1x20xi32> to vector<1xi32>
    %923 = vector.shape_cast %922 : vector<1xi32> to vector<1x1xi32>
    %c8_i32_325 = arith.constant 8 : i32
    %924 = vector.broadcast %c8_i32_325 : i32 to vector<10x20xi32>
    %925 = arith.cmpi eq, %745, %924 : vector<10x20xi32>
    %926 = vector.broadcast %923 : vector<1x1xi32> to vector<10x20xi32>
    %927 = arith.cmpi eq, %746, %926 : vector<10x20xi32>
    %928 = arith.andi %925, %927 : vector<10x20xi1>
    %cst_326 = arith.constant 1.000000e+00 : f32
    %cst_327 = arith.constant 0.000000e+00 : f32
    %929 = vector.broadcast %cst_326 : f32 to vector<10x20xf32>
    %930 = vector.broadcast %cst_327 : f32 to vector<10x20xf32>
    %931 = arith.select %928, %929, %930 : vector<10x20xi1>, vector<10x20xf32>
    %932 = arith.addf %911, %931 : vector<10x20xf32>
    %933 = vector.broadcast %923 : vector<1x1xi32> to vector<1x20xi32>
    %934 = arith.cmpi eq, %744, %933 : vector<1x20xi32>
    %cst_328 = arith.constant 0x7F800000 : f32
    %935 = vector.broadcast %cst_328 : f32 to vector<1x20xf32>
    %936 = arith.select %934, %935, %915 : vector<1x20xi1>, vector<1x20xf32>
    %cst_329 = arith.constant dense<0x7F800000> : vector<1xf32>
    %937 = vector.multi_reduction <minimumf>, %936, %cst_329 [1] : vector<1x20xf32> to vector<1xf32>
    %938 = vector.shape_cast %937 : vector<1xf32> to vector<1x1xf32>
    %939 = vector.broadcast %938 : vector<1x1xf32> to vector<1x20xf32>
    %940 = arith.cmpf oeq, %936, %939 : vector<1x20xf32>
    %c20_i32_330 = arith.constant 20 : i32
    %941 = vector.broadcast %c20_i32_330 : i32 to vector<1x20xi32>
    %942 = arith.select %940, %744, %941 : vector<1x20xi1>, vector<1x20xi32>
    %cst_331 = arith.constant dense<2147483647> : vector<1xi32>
    %943 = vector.multi_reduction <minsi>, %942, %cst_331 [1] : vector<1x20xi32> to vector<1xi32>
    %944 = vector.shape_cast %943 : vector<1xi32> to vector<1x1xi32>
    %c9_i32_332 = arith.constant 9 : i32
    %945 = vector.broadcast %c9_i32_332 : i32 to vector<10x20xi32>
    %946 = arith.cmpi eq, %745, %945 : vector<10x20xi32>
    %947 = vector.broadcast %944 : vector<1x1xi32> to vector<10x20xi32>
    %948 = arith.cmpi eq, %746, %947 : vector<10x20xi32>
    %949 = arith.andi %946, %948 : vector<10x20xi1>
    %cst_333 = arith.constant 1.000000e+00 : f32
    %cst_334 = arith.constant 0.000000e+00 : f32
    %950 = vector.broadcast %cst_333 : f32 to vector<10x20xf32>
    %951 = vector.broadcast %cst_334 : f32 to vector<10x20xf32>
    %952 = arith.select %949, %950, %951 : vector<10x20xi1>, vector<10x20xf32>
    %953 = arith.addf %932, %952 : vector<10x20xf32>
    %954 = tpu.iota {dimensions = array<i32: 1>} : vector<1x20xi32>
    %955 = tpu.iota {dimensions = array<i32: 0>} : vector<5x20xi32>
    %956 = tpu.iota {dimensions = array<i32: 1>} : vector<5x20xi32>
    %cst_335 = arith.constant 0.000000e+00 : f32
    %957 = vector.broadcast %cst_335 : f32 to vector<5x20xf32>
    %cst_336 = arith.constant dense<0xFF800000> : vector<1xf32>
    %958 = vector.multi_reduction <maximumf>, %624, %cst_336 [1] : vector<1x20xf32> to vector<1xf32>
    %959 = vector.shape_cast %958 : vector<1xf32> to vector<1x1xf32>
    %960 = vector.broadcast %959 : vector<1x1xf32> to vector<1x20xf32>
    %961 = arith.cmpf oeq, %624, %960 : vector<1x20xf32>
    %c20_i32_337 = arith.constant 20 : i32
    %962 = vector.broadcast %c20_i32_337 : i32 to vector<1x20xi32>
    %963 = arith.select %961, %954, %962 : vector<1x20xi1>, vector<1x20xi32>
    %cst_338 = arith.constant dense<2147483647> : vector<1xi32>
    %964 = vector.multi_reduction <minsi>, %963, %cst_338 [1] : vector<1x20xi32> to vector<1xi32>
    %965 = vector.shape_cast %964 : vector<1xi32> to vector<1x1xi32>
    %c0_i32_339 = arith.constant 0 : i32
    %966 = vector.broadcast %c0_i32_339 : i32 to vector<5x20xi32>
    %967 = arith.cmpi eq, %955, %966 : vector<5x20xi32>
    %968 = vector.broadcast %965 : vector<1x1xi32> to vector<5x20xi32>
    %969 = arith.cmpi eq, %956, %968 : vector<5x20xi32>
    %970 = arith.andi %967, %969 : vector<5x20xi1>
    %cst_340 = arith.constant 1.000000e+00 : f32
    %cst_341 = arith.constant 0.000000e+00 : f32
    %971 = vector.broadcast %cst_340 : f32 to vector<5x20xf32>
    %972 = vector.broadcast %cst_341 : f32 to vector<5x20xf32>
    %973 = arith.select %970, %971, %972 : vector<5x20xi1>, vector<5x20xf32>
    %974 = arith.addf %957, %973 : vector<5x20xf32>
    %975 = vector.broadcast %965 : vector<1x1xi32> to vector<1x20xi32>
    %976 = arith.cmpi eq, %954, %975 : vector<1x20xi32>
    %cst_342 = arith.constant 0xFF800000 : f32
    %977 = vector.broadcast %cst_342 : f32 to vector<1x20xf32>
    %978 = arith.select %976, %977, %624 : vector<1x20xi1>, vector<1x20xf32>
    %cst_343 = arith.constant dense<0xFF800000> : vector<1xf32>
    %979 = vector.multi_reduction <maximumf>, %978, %cst_343 [1] : vector<1x20xf32> to vector<1xf32>
    %980 = vector.shape_cast %979 : vector<1xf32> to vector<1x1xf32>
    %981 = vector.broadcast %980 : vector<1x1xf32> to vector<1x20xf32>
    %982 = arith.cmpf oeq, %978, %981 : vector<1x20xf32>
    %c20_i32_344 = arith.constant 20 : i32
    %983 = vector.broadcast %c20_i32_344 : i32 to vector<1x20xi32>
    %984 = arith.select %982, %954, %983 : vector<1x20xi1>, vector<1x20xi32>
    %cst_345 = arith.constant dense<2147483647> : vector<1xi32>
    %985 = vector.multi_reduction <minsi>, %984, %cst_345 [1] : vector<1x20xi32> to vector<1xi32>
    %986 = vector.shape_cast %985 : vector<1xi32> to vector<1x1xi32>
    %c1_i32_346 = arith.constant 1 : i32
    %987 = vector.broadcast %c1_i32_346 : i32 to vector<5x20xi32>
    %988 = arith.cmpi eq, %955, %987 : vector<5x20xi32>
    %989 = vector.broadcast %986 : vector<1x1xi32> to vector<5x20xi32>
    %990 = arith.cmpi eq, %956, %989 : vector<5x20xi32>
    %991 = arith.andi %988, %990 : vector<5x20xi1>
    %cst_347 = arith.constant 1.000000e+00 : f32
    %cst_348 = arith.constant 0.000000e+00 : f32
    %992 = vector.broadcast %cst_347 : f32 to vector<5x20xf32>
    %993 = vector.broadcast %cst_348 : f32 to vector<5x20xf32>
    %994 = arith.select %991, %992, %993 : vector<5x20xi1>, vector<5x20xf32>
    %995 = arith.addf %974, %994 : vector<5x20xf32>
    %996 = vector.broadcast %986 : vector<1x1xi32> to vector<1x20xi32>
    %997 = arith.cmpi eq, %954, %996 : vector<1x20xi32>
    %cst_349 = arith.constant 0xFF800000 : f32
    %998 = vector.broadcast %cst_349 : f32 to vector<1x20xf32>
    %999 = arith.select %997, %998, %978 : vector<1x20xi1>, vector<1x20xf32>
    %cst_350 = arith.constant dense<0xFF800000> : vector<1xf32>
    %1000 = vector.multi_reduction <maximumf>, %999, %cst_350 [1] : vector<1x20xf32> to vector<1xf32>
    %1001 = vector.shape_cast %1000 : vector<1xf32> to vector<1x1xf32>
    %1002 = vector.broadcast %1001 : vector<1x1xf32> to vector<1x20xf32>
    %1003 = arith.cmpf oeq, %999, %1002 : vector<1x20xf32>
    %c20_i32_351 = arith.constant 20 : i32
    %1004 = vector.broadcast %c20_i32_351 : i32 to vector<1x20xi32>
    %1005 = arith.select %1003, %954, %1004 : vector<1x20xi1>, vector<1x20xi32>
    %cst_352 = arith.constant dense<2147483647> : vector<1xi32>
    %1006 = vector.multi_reduction <minsi>, %1005, %cst_352 [1] : vector<1x20xi32> to vector<1xi32>
    %1007 = vector.shape_cast %1006 : vector<1xi32> to vector<1x1xi32>
    %c2_i32_353 = arith.constant 2 : i32
    %1008 = vector.broadcast %c2_i32_353 : i32 to vector<5x20xi32>
    %1009 = arith.cmpi eq, %955, %1008 : vector<5x20xi32>
    %1010 = vector.broadcast %1007 : vector<1x1xi32> to vector<5x20xi32>
    %1011 = arith.cmpi eq, %956, %1010 : vector<5x20xi32>
    %1012 = arith.andi %1009, %1011 : vector<5x20xi1>
    %cst_354 = arith.constant 1.000000e+00 : f32
    %cst_355 = arith.constant 0.000000e+00 : f32
    %1013 = vector.broadcast %cst_354 : f32 to vector<5x20xf32>
    %1014 = vector.broadcast %cst_355 : f32 to vector<5x20xf32>
    %1015 = arith.select %1012, %1013, %1014 : vector<5x20xi1>, vector<5x20xf32>
    %1016 = arith.addf %995, %1015 : vector<5x20xf32>
    %1017 = vector.broadcast %1007 : vector<1x1xi32> to vector<1x20xi32>
    %1018 = arith.cmpi eq, %954, %1017 : vector<1x20xi32>
    %cst_356 = arith.constant 0xFF800000 : f32
    %1019 = vector.broadcast %cst_356 : f32 to vector<1x20xf32>
    %1020 = arith.select %1018, %1019, %999 : vector<1x20xi1>, vector<1x20xf32>
    %cst_357 = arith.constant dense<0xFF800000> : vector<1xf32>
    %1021 = vector.multi_reduction <maximumf>, %1020, %cst_357 [1] : vector<1x20xf32> to vector<1xf32>
    %1022 = vector.shape_cast %1021 : vector<1xf32> to vector<1x1xf32>
    %1023 = vector.broadcast %1022 : vector<1x1xf32> to vector<1x20xf32>
    %1024 = arith.cmpf oeq, %1020, %1023 : vector<1x20xf32>
    %c20_i32_358 = arith.constant 20 : i32
    %1025 = vector.broadcast %c20_i32_358 : i32 to vector<1x20xi32>
    %1026 = arith.select %1024, %954, %1025 : vector<1x20xi1>, vector<1x20xi32>
    %cst_359 = arith.constant dense<2147483647> : vector<1xi32>
    %1027 = vector.multi_reduction <minsi>, %1026, %cst_359 [1] : vector<1x20xi32> to vector<1xi32>
    %1028 = vector.shape_cast %1027 : vector<1xi32> to vector<1x1xi32>
    %c3_i32_360 = arith.constant 3 : i32
    %1029 = vector.broadcast %c3_i32_360 : i32 to vector<5x20xi32>
    %1030 = arith.cmpi eq, %955, %1029 : vector<5x20xi32>
    %1031 = vector.broadcast %1028 : vector<1x1xi32> to vector<5x20xi32>
    %1032 = arith.cmpi eq, %956, %1031 : vector<5x20xi32>
    %1033 = arith.andi %1030, %1032 : vector<5x20xi1>
    %cst_361 = arith.constant 1.000000e+00 : f32
    %cst_362 = arith.constant 0.000000e+00 : f32
    %1034 = vector.broadcast %cst_361 : f32 to vector<5x20xf32>
    %1035 = vector.broadcast %cst_362 : f32 to vector<5x20xf32>
    %1036 = arith.select %1033, %1034, %1035 : vector<5x20xi1>, vector<5x20xf32>
    %1037 = arith.addf %1016, %1036 : vector<5x20xf32>
    %1038 = vector.broadcast %1028 : vector<1x1xi32> to vector<1x20xi32>
    %1039 = arith.cmpi eq, %954, %1038 : vector<1x20xi32>
    %cst_363 = arith.constant 0xFF800000 : f32
    %1040 = vector.broadcast %cst_363 : f32 to vector<1x20xf32>
    %1041 = arith.select %1039, %1040, %1020 : vector<1x20xi1>, vector<1x20xf32>
    %cst_364 = arith.constant dense<0xFF800000> : vector<1xf32>
    %1042 = vector.multi_reduction <maximumf>, %1041, %cst_364 [1] : vector<1x20xf32> to vector<1xf32>
    %1043 = vector.shape_cast %1042 : vector<1xf32> to vector<1x1xf32>
    %1044 = vector.broadcast %1043 : vector<1x1xf32> to vector<1x20xf32>
    %1045 = arith.cmpf oeq, %1041, %1044 : vector<1x20xf32>
    %c20_i32_365 = arith.constant 20 : i32
    %1046 = vector.broadcast %c20_i32_365 : i32 to vector<1x20xi32>
    %1047 = arith.select %1045, %954, %1046 : vector<1x20xi1>, vector<1x20xi32>
    %cst_366 = arith.constant dense<2147483647> : vector<1xi32>
    %1048 = vector.multi_reduction <minsi>, %1047, %cst_366 [1] : vector<1x20xi32> to vector<1xi32>
    %1049 = vector.shape_cast %1048 : vector<1xi32> to vector<1x1xi32>
    %c4_i32_367 = arith.constant 4 : i32
    %1050 = vector.broadcast %c4_i32_367 : i32 to vector<5x20xi32>
    %1051 = arith.cmpi eq, %955, %1050 : vector<5x20xi32>
    %1052 = vector.broadcast %1049 : vector<1x1xi32> to vector<5x20xi32>
    %1053 = arith.cmpi eq, %956, %1052 : vector<5x20xi32>
    %1054 = arith.andi %1051, %1053 : vector<5x20xi1>
    %cst_368 = arith.constant 1.000000e+00 : f32
    %cst_369 = arith.constant 0.000000e+00 : f32
    %1055 = vector.broadcast %cst_368 : f32 to vector<5x20xf32>
    %1056 = vector.broadcast %cst_369 : f32 to vector<5x20xf32>
    %1057 = arith.select %1054, %1055, %1056 : vector<5x20xi1>, vector<5x20xf32>
    %1058 = arith.addf %1037, %1057 : vector<5x20xf32>
    %c1_370 = arith.constant 1 : index
    %c0_371 = arith.constant 0 : index
    %1059 = vector.load %arg10[%c1_370, %c0_371] : memref<2x5xf32, #tpu.memory_space<vmem>>, vector<1x5xf32>
    tpu.vector_store %arg10[%c1_370, %c0_371], %712 {strides = array<i32>} : memref<2x5xf32, #tpu.memory_space<vmem>>, vector<1x5xf32>,
    %c1_372 = arith.constant 1 : index
    %c0_373 = arith.constant 0 : index
    %1060 = vector.load %arg11[%c1_372, %c0_373] : memref<2x2xf32, #tpu.memory_space<vmem>>, vector<1x2xf32>
    tpu.vector_store %arg11[%c1_372, %c0_373], %743 {strides = array<i32>} : memref<2x2xf32, #tpu.memory_space<vmem>>, vector<1x2xf32>,
    %cst_374 = arith.constant dense<0.000000e+00> : vector<10x32xf32>
    %1061 = tpu.matmul %953, %591, %cst_374 {dimension_numbers = #tpu.dot_dimension_numbers<[1], [0], [0], [1], [0, 0, 1, 1], [], []>} : vector<10x20xf32>, vector<20x32xf32>, vector<10x32xf32> -> vector<10x32xf32>
    %cst_375 = arith.constant dense<0.000000e+00> : vector<5x32xf32>
    %1062 = tpu.matmul %1058, %591, %cst_375 {dimension_numbers = #tpu.dot_dimension_numbers<[1], [0], [0], [1], [0, 0, 1, 1], [], []>} : vector<5x20xf32>, vector<20x32xf32>, vector<5x32xf32> -> vector<5x32xf32>
    %c1_376 = arith.constant 1 : index
    %c0_377 = arith.constant 0 : index
    %c0_378 = arith.constant 0 : index
    %1063 = vector.load %arg0[%c1_376, %c0_377, %c0_378] : memref<2x8x32xf32, #tpu.memory_space<vmem>>, vector<1x8x32xf32>
    %1064 = vector.shape_cast %1063 : vector<1x8x32xf32> to vector<8x32xf32>
    %1065 = arith.mulf %1064, %1064 : vector<8x32xf32>
    %cst_379 = arith.constant dense<0.000000e+00> : vector<8xf32>
    %1066 = vector.multi_reduction <add>, %1065, %cst_379 [1] : vector<8x32xf32> to vector<8xf32>
    %1067 = vector.shape_cast %1066 : vector<8xf32> to vector<8x1xf32>
    %cst_380 = arith.constant 9.99999996E-13 : f32
    %1068 = vector.broadcast %cst_380 : f32 to vector<8x1xf32>
    %1069 = arith.addf %1067, %1068 : vector<8x1xf32>
    %1070 = math.rsqrt %1069 : vector<8x1xf32>
    %1071 = vector.broadcast %1070 : vector<8x1xf32> to vector<8x32xf32>
    %1072 = arith.mulf %1064, %1071 : vector<8x32xf32>
    %cst_381 = arith.constant dense<0.000000e+00> : vector<8x8xf32>
    %1073 = tpu.matmul %1072, %1072, %cst_381 {dimension_numbers = #tpu.dot_dimension_numbers<[1], [1], [0], [0], [0, 0, 1, 0], [], []>} : vector<8x32xf32>, vector<8x32xf32>, vector<8x8xf32> -> vector<8x8xf32>
    %cst_382 = arith.constant dense<0xFF800000> : vector<8xf32>
    %1074 = vector.multi_reduction <maximumf>, %1073, %cst_382 [1] : vector<8x8xf32> to vector<8xf32>
    %1075 = vector.shape_cast %1074 : vector<8xf32> to vector<8x1xf32>
    %1076 = vector.broadcast %1075 : vector<8x1xf32> to vector<8x8xf32>
    %1077 = arith.subf %1073, %1076 : vector<8x8xf32>
    %1078 = math.exp %1077 : vector<8x8xf32>
    %cst_383 = arith.constant dense<0.000000e+00> : vector<8xf32>
    %1079 = vector.multi_reduction <add>, %1078, %cst_383 [1] : vector<8x8xf32> to vector<8xf32>
    %1080 = vector.shape_cast %1079 : vector<8xf32> to vector<8x1xf32>
    %1081 = vector.broadcast %1080 : vector<8x1xf32> to vector<8x8xf32>
    %1082 = arith.divf %1078, %1081 : vector<8x8xf32>
    %cst_384 = arith.constant dense<0.000000e+00> : vector<8x32xf32>
    %1083 = tpu.matmul %1082, %1064, %cst_384 {dimension_numbers = #tpu.dot_dimension_numbers<[1], [0], [0], [1], [0, 0, 1, 1], [], []>} : vector<8x8xf32>, vector<8x32xf32>, vector<8x32xf32> -> vector<8x32xf32>
    %c1_385 = arith.constant 1 : index
    %c0_386 = arith.constant 0 : index
    %c0_387 = arith.constant 0 : index
    %1084 = vector.load %arg12[%c1_385, %c0_386, %c0_387] : memref<2x8x32xf32, #tpu.memory_space<vmem>>, vector<1x8x32xf32>
    %1085 = vector.shape_cast %1084 : vector<1x8x32xf32> to vector<8x32xf32>
    %1086 = vector.shape_cast %1083 : vector<8x32xf32> to vector<1x8x32xf32>
    tpu.vector_store %arg12[%c1_385, %c0_386, %c0_387], %1086 {strides = array<i32>} : memref<2x8x32xf32, #tpu.memory_space<vmem>>, vector<1x8x32xf32>,
    %1087 = arith.mulf %1061, %1061 : vector<10x32xf32>
    %cst_388 = arith.constant dense<0.000000e+00> : vector<10xf32>
    %1088 = vector.multi_reduction <add>, %1087, %cst_388 [1] : vector<10x32xf32> to vector<10xf32>
    %1089 = vector.shape_cast %1088 : vector<10xf32> to vector<10x1xf32>
    %cst_389 = arith.constant 9.99999996E-13 : f32
    %1090 = vector.broadcast %cst_389 : f32 to vector<10x1xf32>
    %1091 = arith.addf %1089, %1090 : vector<10x1xf32>
    %1092 = math.rsqrt %1091 : vector<10x1xf32>
    %1093 = vector.broadcast %1092 : vector<10x1xf32> to vector<10x32xf32>
    %1094 = arith.mulf %1061, %1093 : vector<10x32xf32>
    %cst_390 = arith.constant dense<0.000000e+00> : vector<10x10xf32>
    %1095 = tpu.matmul %1094, %1094, %cst_390 {dimension_numbers = #tpu.dot_dimension_numbers<[1], [1], [0], [0], [0, 0, 1, 0], [], []>} : vector<10x32xf32>, vector<10x32xf32>, vector<10x10xf32> -> vector<10x10xf32>
    %cst_391 = arith.constant dense<0xFF800000> : vector<10xf32>
    %1096 = vector.multi_reduction <maximumf>, %1095, %cst_391 [1] : vector<10x10xf32> to vector<10xf32>
    %1097 = vector.shape_cast %1096 : vector<10xf32> to vector<10x1xf32>
    %1098 = vector.broadcast %1097 : vector<10x1xf32> to vector<10x10xf32>
    %1099 = arith.subf %1095, %1098 : vector<10x10xf32>
    %1100 = math.exp %1099 : vector<10x10xf32>
    %cst_392 = arith.constant dense<0.000000e+00> : vector<10xf32>
    %1101 = vector.multi_reduction <add>, %1100, %cst_392 [1] : vector<10x10xf32> to vector<10xf32>
    %1102 = vector.shape_cast %1101 : vector<10xf32> to vector<10x1xf32>
    %1103 = vector.broadcast %1102 : vector<10x1xf32> to vector<10x10xf32>
    %1104 = arith.divf %1100, %1103 : vector<10x10xf32>
    %cst_393 = arith.constant dense<0.000000e+00> : vector<10x32xf32>
    %1105 = tpu.matmul %1104, %1061, %cst_393 {dimension_numbers = #tpu.dot_dimension_numbers<[1], [0], [0], [1], [0, 0, 1, 1], [], []>} : vector<10x10xf32>, vector<10x32xf32>, vector<10x32xf32> -> vector<10x32xf32>
    %c1_394 = arith.constant 1 : index
    %c0_395 = arith.constant 0 : index
    %c0_396 = arith.constant 0 : index
    %1106 = vector.load %arg13[%c1_394, %c0_395, %c0_396] : memref<2x10x32xf32, #tpu.memory_space<vmem>>, vector<1x10x32xf32>
    %1107 = vector.shape_cast %1106 : vector<1x10x32xf32> to vector<10x32xf32>
    %1108 = vector.shape_cast %1105 : vector<10x32xf32> to vector<1x10x32xf32>
    tpu.vector_store %arg13[%c1_394, %c0_395, %c0_396], %1108 {strides = array<i32>} : memref<2x10x32xf32, #tpu.memory_space<vmem>>, vector<1x10x32xf32>,
    %1109 = arith.mulf %1062, %1062 : vector<5x32xf32>
    %cst_397 = arith.constant dense<0.000000e+00> : vector<5xf32>
    %1110 = vector.multi_reduction <add>, %1109, %cst_397 [1] : vector<5x32xf32> to vector<5xf32>
    %1111 = vector.shape_cast %1110 : vector<5xf32> to vector<5x1xf32>
    %cst_398 = arith.constant 9.99999996E-13 : f32
    %1112 = vector.broadcast %cst_398 : f32 to vector<5x1xf32>
    %1113 = arith.addf %1111, %1112 : vector<5x1xf32>
    %1114 = math.rsqrt %1113 : vector<5x1xf32>
    %1115 = vector.broadcast %1114 : vector<5x1xf32> to vector<5x32xf32>
    %1116 = arith.mulf %1062, %1115 : vector<5x32xf32>
    %cst_399 = arith.constant dense<0.000000e+00> : vector<5x5xf32>
    %1117 = tpu.matmul %1116, %1116, %cst_399 {dimension_numbers = #tpu.dot_dimension_numbers<[1], [1], [0], [0], [0, 0, 1, 0], [], []>} : vector<5x32xf32>, vector<5x32xf32>, vector<5x5xf32> -> vector<5x5xf32>
    %cst_400 = arith.constant dense<0xFF800000> : vector<5xf32>
    %1118 = vector.multi_reduction <maximumf>, %1117, %cst_400 [1] : vector<5x5xf32> to vector<5xf32>
    %1119 = vector.shape_cast %1118 : vector<5xf32> to vector<5x1xf32>
    %1120 = vector.broadcast %1119 : vector<5x1xf32> to vector<5x5xf32>
    %1121 = arith.subf %1117, %1120 : vector<5x5xf32>
    %1122 = math.exp %1121 : vector<5x5xf32>
    %cst_401 = arith.constant dense<0.000000e+00> : vector<5xf32>
    %1123 = vector.multi_reduction <add>, %1122, %cst_401 [1] : vector<5x5xf32> to vector<5xf32>
    %1124 = vector.shape_cast %1123 : vector<5xf32> to vector<5x1xf32>
    %1125 = vector.broadcast %1124 : vector<5x1xf32> to vector<5x5xf32>
    %1126 = arith.divf %1122, %1125 : vector<5x5xf32>
    %cst_402 = arith.constant dense<0.000000e+00> : vector<5x32xf32>
    %1127 = tpu.matmul %1126, %1062, %cst_402 {dimension_numbers = #tpu.dot_dimension_numbers<[1], [0], [0], [1], [0, 0, 1, 1], [], []>} : vector<5x5xf32>, vector<5x32xf32>, vector<5x32xf32> -> vector<5x32xf32>
    %c1_403 = arith.constant 1 : index
    %c0_404 = arith.constant 0 : index
    %c0_405 = arith.constant 0 : index
    %1128 = vector.load %arg14[%c1_403, %c0_404, %c0_405] : memref<2x5x32xf32, #tpu.memory_space<vmem>>, vector<1x5x32xf32>
    %1129 = vector.shape_cast %1128 : vector<1x5x32xf32> to vector<5x32xf32>
    %1130 = vector.shape_cast %1127 : vector<5x32xf32> to vector<1x5x32xf32>
    tpu.vector_store %arg14[%c1_403, %c0_404, %c0_405], %1130 {strides = array<i32>} : memref<2x5x32xf32, #tpu.memory_space<vmem>>, vector<1x5x32xf32>,
    return
  }
}

</mosaic_0001>

<bundles_post_ra>
// kernel: tpu_custom_call.1
= control target key start
LH: loop header
LB: loop body
LE: loop exit
PB: predicated region body
PF: predicated region fallthrough
CT: control target
= control target key end

     0   :  { %20 = vsyncpa [#allocation3], 0  ;;  %s5780_s0 = inlined_call_operand.hbm [shape: f32[2,8,32], index: 0, kind: input, shape index: {}]   ;;  %s5781_s1 = inlined_call_operand.vmem [shape: f32[2,6,32], index: 1, kind: input, shape index: {}]   ;;  %s5782_s2 = inlined_call_operand.vmem [shape: f32[2,6,32], index: 2, kind: input, shape index: {}]   ;;  %s5783_s3 = inlined_call_operand.vmem [shape: f32[2,6], index: 3, kind: input, shape index: {}]   ;;  %s5784_s4 = inlined_call_operand.hbm [shape: f32[2,8,32], index: 4, kind: input, shape index: {}]   ;;  %s5785_s5 = inlined_call_operand.vmem [shape: f32[32,32], index: 5, kind: input, shape index: {}]   ;;  %s5786_s6 = inlined_call_operand.vmem [shape: f32[1,32], index: 6, kind: input, shape index: {}]   ;;  %s5787_s7 = inlined_call_operand.vmem [shape: f32[32,32], index: 7, kind: input, shape index: {}]   ;;  %s5788_s8 = inlined_call_operand.vmem [shape: f32[1,32], index: 8, kind: input, shape index: {}]   ;;  %s5789_s9 = inlined_call_operand.hbm [shape: f32[2,8], index: 9, kind: output, shape index: {0}]   ;;  %s5790_s10 = inlined_call_operand.hbm [shape: f32[2,5], index: 10, kind: output, shape index: {1}]   ;;  %s5791_s11 = inlined_call_operand.hbm [shape: f32[2,2], index: 11, kind: output, shape index: {2}]   ;;  %s5792_s12 = inlined_call_operand.hbm [shape: f32[2,8,32], index: 12, kind: output, shape index: {3}]   ;;  %s5793_s13 = inlined_call_operand.vmem [shape: f32[2,10,32], index: 13, kind: output, shape index: {4}]   ;;  %s5794_s14 = inlined_call_operand.vmem [shape: f32[2,5,32], index: 14, kind: output, shape index: {5}]  }
   0x1   :  { %21 = vsyncpa [#allocation6], 0 }
   0x2   :  { %22 = vsyncpa [#allocation4], 0 }
   0x3   :  { %23 = vsyncpa [#allocation9], 0 }
   0x4   :  { %24 = vsyncpa [#allocation12], 0  ;;  %s4719_s29 = smov [#allocation2]   ;;  %s4577_s17 = scalar_lea.hbm %s5780_s0, 256 }
   0x5   :  { %s30_s30 = sshll.u32 %s4719_s29, 4  ;;  %p4578_p0 = scmp.ne.s32.totalorder %s5780_s0, %s4577_s17  ;;  %s31_s30 = int_to_ptr.vmem [resolvable:$true] %s30_s30 }
   0x6   :  { %p4581_p1 = scmp.lt.u32.totalorder %s4577_s17, %s5780_s0 }
   0x8   :  { %p4583_p2 = pnand %p4581_p1, %p4578_p0 }
   0xa   :  { %4586 = shalt.err (!%p4583_p2)
}
   0xb   :  { %s4587_s22 = scalar_lea.vmem %s31_s30, 256  ;;  %p4592_p4 = scmp.lt.s32.totalorder %s31_s30, %s31_s30 }
   0xc   :  { %p4588_p3 = scmp.ne.s32.totalorder %s31_s30, %s4587_s22  ;;  %p4593_p5 = scmp.lt.s32.totalorder %s4587_s22, %s4587_s22 }
   0xe   :  { %p4594_p6 = por %p4593_p5, %p4592_p4 }
  0x10   :  { %p4595_p7 = pnand %p4594_p6, %p4588_p3 }
  0x12   :  { %4598 = shalt.err (!%p4595_p7)
}
  0x13   :  { %s4720_s23 = smov 128   ;;  %s4721_s24 = smov 8  }
  0x14   :  { %36 = dma.hbm_to_vmem [thread:$0]  %s5780_s0, 256, %s31_s30, [#allocation3], %s4720_s23, %s4720_s23, %s4721_s24  }
  0x15   :  { %s4722_s27 = smov [#allocation5]   ;;  %s4599_s16 = scalar_lea.hbm %s5784_s4, 256 }
  0x16   :  { %s48_s28 = sshll.u32 %s4722_s27, 4  ;;  %p4600_p8 = scmp.ne.s32.totalorder %s5784_s4, %s4599_s16  ;;  %s49_s28 = int_to_ptr.vmem [resolvable:$true] %s48_s28 }
  0x17   :  { %p4603_p9 = scmp.lt.u32.totalorder %s4599_s16, %s5784_s4 }
  0x19   :  { %p4605_p10 = pnand %p4603_p9, %p4600_p8 }
  0x1b   :  { %4608 = shalt.err (!%p4605_p10)
}
  0x1c   :  { %s4609_s21 = scalar_lea.vmem %s49_s28, 256  ;;  %p4614_p12 = scmp.lt.s32.totalorder %s49_s28, %s49_s28 }
  0x1d   :  { %p4610_p11 = scmp.ne.s32.totalorder %s49_s28, %s4609_s21  ;;  %p4615_p13 = scmp.lt.s32.totalorder %s4609_s21, %s4609_s21 }
  0x1f   :  { %p4616_p0 = por %p4615_p13, %p4614_p12 }
  0x21   :  { %p4617_p1 = pnand %p4616_p0, %p4610_p11 }
  0x23   :  { %4620 = shalt.err (!%p4617_p1)
}
  0x24   :  { %54 = dma.hbm_to_vmem [thread:$0]  %s5784_s4, 256, %s49_s28, [#allocation6], %s4720_s23, %s4720_s23, %s4721_s24  }
  0x25   :  { %4709 = dma.done.wait [#allocation3], 256  }
  0x26   :  { %4710 = vsyncadd [#allocation3], 4294967040 }
  0x27   :  { %4711 = dma.done.wait [#allocation6], 256  }
  0x28   :  { %4712 = vsyncadd [#allocation6], 4294967040  ;;  %v4723_v0 = vmov 0.0|0.0   ;;  %vm5817_vm0 = vmmov 0   ;;  %v4725_v1 = vmov 0.0   ;;  %vm5805_vm1 = vcmask 261120  }
  0x29   :  { %4408 = vmatprep.subr.bf16.mxu1 %v4723_v0  ;;  %4209 = vmatprep.mubr.msk.f32.mxu1 %vm5817_vm0, %v4725_v1  ;;  %vm4842_vm2 = vmpackc.low %vm5805_vm1, %vm5805_vm1  ;;  %v69_v3 = vld [vmem:[%s5785_s5] sm:$0xff]  ;;  %v70_v4 = vld [vmem:[%s5785_s5 + $0x8] sm:$0xff]  ;;  %vm5800_vm3 = vcmask 1045504   ;;  %vm5799_vm4 = vcmask 257024   ;;  %v79_v48 = vlaneseq  ;;  %vm5797_vm6 = vcmask 48128  }
  0x2a   :  { %v74_v5 = vld [vmem:[%s5787_s7] sm:$0xff]  ;;  %v4855_v6 = vpack.c.bf16 %v70_v4, %v69_v3  ;;  %v75_v7 = vld [vmem:[%s5787_s7 + $0x8] sm:$0xff]  ;;  %v71_v8 = vld [vmem:[%s5785_s5 + $0x10] sm:$0xff]  ;;  %vm5796_vm7 = vcmask 97280   ;;  %v4726_v4 = vmov 1.0   ;;  %vm5806_vm9 = vcmask 1043456  }
  0x2b   :  { %v72_v9 = vld [vmem:[%s5785_s5 + $0x18] sm:$0xff]  ;;  %v4866_v10 = vpack.c.bf16 %v75_v7, %v74_v5  ;;  %v98_v12 = vld [vmem:[%s5781_s1] sm:$0x3f]  ;;  %v76_v15 = vld [vmem:[%s5787_s7 + $0x10] sm:$0xff]  ;;  %v4943_v49 = vshrl.u32 %v79_v48, 7  ;;  %v4945_v50 = vand.u32 127, %v79_v48 }
  0x2c   :  { %v4868_v11 = vpack.c.bf16 %v72_v9, %v71_v8  ;;  %4398 = vmatprep.subr.msk.bf16.mxu0 %vm4842_vm2, %v4855_v6  ;;  %v99_v13 = vld [vmem:[%s5782_s2] sm:$0x3f]  ;;  %v77_v16 = vld [vmem:[%s5787_s7 + $0x18] sm:$0xff]  ;;  %v204_v19 = vld [vmem:[#allocation5] sm:$0xff]  ;;  %vm5801_vm12 = vcmask 64512   ;;  %vm5795_vm13 = vcmask 57344  }
  0x2d   :  { %4411 = vmatpush3.bf16.xpose.msk.msra.mxu1 %vm4842_vm2, %v4866_v10  ;;  %4401 = vmatpush3.bf16.xpose.msk.msra.mxu0 %vm4842_vm2, %v4855_v6  ;;  %v101_v14 = vrot.slane %v99_v13, 2  ;;  %v4897_v18 = vpack.c.bf16 %v77_v16, %v76_v15  ;;  %v4010_v20 = vld [vmem:[%s5788_s8] ss:$0 sm:$0xff]  ;;  %v83_v51 = vadd.s32 6, %v4943_v49  ;;  %v4964_v3 = vadd.s32 12, %v4943_v49 }
  0x2e   :  { %4412 = vmatprep.subr.bf16.mxu1 %v4723_v0  ;;  %4404 = vmatprep.subr.msk.bf16.mxu0 %vm4842_vm2, %v4868_v11  ;;  %v4003_v21 = vld [vmem:[%s5786_s6] ss:$0 sm:$0xff]  ;;  %vm88_vm11 = vcmp.eq.s32.totalorder %v4945_v50, %v4943_v49  ;;  %vm852_vm15 = vcmask 155648  }
  0x2f   :  { %v104_v17 = vsel %vm5800_vm3, %v98_v12, %v101_v14  ;;  %vm84_vm5 = vcmp.eq.s32.totalorder %v4945_v50, %v83_v51  ;;  %v414_v52 = vld [vmem:[%s5783_s3] sm:$0x1]  ;;  %vm5798_vm8 = vcmp.eq.s32.totalorder %v4945_v50, %v4964_v3  ;;  %vm5003_vm14 = vmpackc.low %vm5806_vm9, %vm88_vm11  ;;  %v5035_v51 = vsub.s32 0, %v4943_v49 }
  0x30   :  { %4198 = vmatprep.mubr.msk.f32.mxu0 %vm5805_vm1, %v104_v17  ;;  %v4953_v53 = vsel %vm84_vm5, 1.0, %v4725_v1 }
  0x35   :  { %4415 = vmatpush3.bf16.xpose.msk.msra.mxu1 %vm4842_vm2, %v4897_v18  ;;  %4407 = vmatpush3.bf16.xpose.msk.msra.mxu0 %vm4842_vm2, %v4868_v11 }
  0x36   :  { %4416 = vmatprep.subr.bf16.mxu0 %v4723_v0  ;;  %4219 = vmatprep.subr.mxu1 %v4725_v1 }
  0x3c   :  { %4210 = vmatmul.mubr.msk.f32.vlgmr.msra.gmra.mrb[0].mxu1 %vm5805_vm1, %v204_v19  ;;  %4199 = vmatmul.mubr.msk.f32.vlgmr.msra.gmra.mrb[0].mxu0 %vm5805_vm1, %v101_v14  ;;  %v4992_v14 = vadd.s32 8, %v4943_v49 }
  0x3d   :  { %4216 = vmatprep.mubr.msk.f32.mxu0 %vm5817_vm0, %v4725_v1  ;;  %4221 = vmatprep.mubr.msk.f32.mxu1 %vm5817_vm0, %v4725_v1 }
  0x3e   :  { %4220 = vmatpush3.msk.msra.mxu1 %vm5800_vm3, %v4953_v53  ;;  %vm89_vm10 = vcmp.eq.s32.totalorder %v4945_v50, %v4992_v14 }
  0x3f   :  { %4224 = vmatprep.subr.mxu1 %v4725_v1  ;;  %v4001_v15 = vsel %vm89_vm10, 1.0, %v4725_v1 }
  0x40   :  { %4222 = vmatmul.mubr.msk.f32.vlgmr.msra.gmra.mrb[2].mxu1 %vm5797_vm6, %v414_v52  ;;  %v5000_v16 = vpack.c.bf16 %v4001_v15, %v4726_v4 }
  0x41   :  { %4226 = vmatprep.mubr.msk.f32.mxu1 %vm5817_vm0, %v4725_v1 }
 0x10f   :  { %v292_v22 = vpop.f32.mrb[0].mxu1  ;;  %v4200_v23 = vpop.f32.mrb[0].mxu0 }
 0x110   :  { %v4919_v24 = vadd.f32 %v4010_v20, %v292_v22  ;;  %v195_v25 = vpop.f32.mrb[1].mxu0  ;;  %v4211_v26 = vpop.f32.mrb[1].mxu1  ;;  %v4921_v27 = vadd.f32 %v4200_v23, %v4003_v21 }
 0x111   :  { %v4923_v28 = vadd.f32 %v4003_v21, %v195_v25 }
 0x112   :  { %v301_v29 = vmul.f32 %v4919_v24, %v4919_v24  ;;  %v309_v33 = vmul.f32 %v4921_v27, %v4921_v27  ;;  %v4974_v7 = vrot.slane %v4919_v24, 4 }
 0x113   :  { %v308_v30 = vmul.f32 %v4923_v28, %v4923_v28  ;;  %v488_v62 = vpop.f32.mrb[2].mxu1 }
 0x114   :  { %v302_v31 = vsel %vm5805_vm1, %v301_v29, 0.0  ;;  %v314_v34 = vsel %vm5799_vm4, %v309_v33, 0.0  ;;  %v4223_v63 = vpop.f32.mrb[3].mxu1  ;;  %v300_v8 = vsel %vm5806_vm9, %v4921_v27, %v4974_v7 }
 0x115   :  { %303 = vadd.xlane.f32.xlu1 %v302_v31  ;;  %v310_v32 = vsel %vm5805_vm1, %v308_v30, 0.0  ;;  %v4980_v13 = vpack.c.bf16 %v300_v8, %v4923_v28 }
 0x116   :  { %311 = vadd.xlane.f32.xlu0 %v310_v32 }
 0x11a   :  { %315 = vadd.xlane.f32.xlu0 %v314_v34 }
 0x1a2   :  { %v304_v39 = vpop.xlane.xlu1 %303 }
 0x1a3   :  { %v312_v35 = vpop.xlane.xlu0 %311  ;;  %v305_v40 = vadd.f32 1e-12, %v304_v39 }
 0x1a4   :  { %v317_v36 = vadd.f32 1e-12, %v312_v35 }
 0x1a6   :  { %4507 = vrsqrt.f32 %v317_v36 }
 0x1a7   :  { %v316_v37 = vpop.xlane.xlu0 %315 }
 0x1a8   :  { %v318_v38 = vadd.f32 1e-12, %v316_v37 }
 0x1aa   :  { %4509 = vrsqrt.f32 %v318_v38 }
 0x1ab   :  { %4511 = vrsqrt.f32 %v305_v40 }
 0x1b0   :  { %v4508_v41 = vpop.eup %4507 }
 0x1b1   :  { %v321_v43 = vmul.f32 %v4508_v41, %v4923_v28 }
 0x1b4   :  { %v4510_v42 = vpop.eup %4509 }
 0x1b5   :  { %v322_v44 = vmul.f32 %v4510_v42, %v4921_v27  ;;  %v4512_v46 = vpop.eup %4511 }
 0x1b6   :  { %v307_v47 = vmul.f32 %v4512_v46, %v4919_v24 }
 0x1b7   :  { %v4417_v45 = vpack.c.bf16 %v322_v44, %v321_v43 }
 0x1b9   :  { %4419 = vmatpush3.bf16.xpose.msk.msra.mxu0 %vm4842_vm2, %v4417_v45 }
 0x1ba   :  { %4229 = vmatprep.subr.mxu0 %v4725_v1 }
 0x1c0   :  { %4217 = vmatmul.mubr.msk.f32.vlgmr.msra.gmra.mrb[2].mxu0 %vm5805_vm1, %v307_v47  ;;  %vm1353_vm1 = vcmask 162816  }
 0x1c1   :  { %4231 = vmatprep.mubr.msk.f32.mxu0 %vm5817_vm0, %v4725_v1  ;;  %4230 = vmatpush3.msk.msra.mxu0 %vm5798_vm8, %v4726_v4 }
 0x1c2   :  { %4420 = vmatprep.subr.bf16.mxu0 %v4723_v0 }
 0x293   :  { %v398_v54 = vpop.f32.mrb[2].mxu0 }
 0x294   :  { %v4218_v55 = vpop.f32.mrb[3].mxu0  ;;  %v403_v56 = vsel %vm5796_vm7, %v398_v54, -inf }
 0x295   :  { %404 = vmax.xlane.f32.xlu1 %v403_v56 }
 0x322   :  { %v405_v57 = vpop.xlane.xlu1 %404 }
 0x323   :  { %v406_v58 = vsub.f32 %v398_v54, %v405_v57 }
 0x325   :  { %v407_v59 = vmul.f32 1.442695, %v406_v58 }
 0x327   :  { %4513 = vpow2.f32 %v407_v59 }
 0x331   :  { %v4514_v60 = vpop.eup %4513 }
 0x332   :  { %v409_v61 = vsel %vm5796_vm7, %v4514_v60, 0.0 }
 0x333   :  { %410 = vadd.xlane.f32.xlu0 %v409_v61 }
 0x3c0   :  { %v411_v5 = vpop.xlane.xlu0 %410 }
 0x3c1   :  { %4515 = vrcp.f32 %v411_v5 }
 0x3cb   :  { %v4516_v9 = vpop.eup %4515 }
 0x3cc   :  { %v413_v12 = vmul.f32 %v4516_v9, %v4514_v60 }
 0x3ce   :  { %4225 = vmatpush3.xpose.msk.msra.mxu1 %vm5796_vm7, %v413_v12 }
 0x3cf   :  { %4425 = vmatprep.subr.bf16.mxu1 %v4980_v13 }
 0x3d1   :  { %4227 = vmatmul.mubr.msk.f32.vlgmr.msra.gmra.mrb[4].mxu1 %vm5796_vm7, %v488_v62 }
 0x3d2   :  { %4427 = vmatpush3.bf16.msra.mxu1 %v4980_v13 }
 0x3d3   :  { %4245 = vmatprep.subr.msk.mxu1 %vm5806_vm9, %v4974_v7 }
 0x3d6   :  { %4246 = vmatpush3.msk.msra.mxu1 %vm5806_vm9, %v4974_v7 }
 0x3d7   :  { %4428 = vmatprep.subr.bf16.mxu1 %v4723_v0 }
 0x4a4   :  { %v5007_v19 = vpop.f32.mrb[4].mxu1 }
 0x4a5   :  { %v4228_v20 = vpop.f32.mrb[5].mxu1  ;;  %4232 = vmatmul.mubr.msk.f32.vlgmr.msra.gmra.mrb[4].mxu0 %vm5801_vm12, %v5007_v19  ;;  %569 = vst.msk [vmem:[#allocation7] sm:$0x1] %vm5795_vm13, %v5007_v19  ;;  %vm908_vm13 = vcmp.eq.s32.totalorder %v4943_v49, 1 }
 0x4a6   :  { %4423 = vmatpush3.bf16.msk.msra.mxu0 %vm5003_vm14, %v5000_v16  ;;  %4238 = vmatprep.mubr.msk.f32.mxu0 %vm5817_vm0, %v4725_v1 }
 0x4a7   :  { %4259 = vmatprep.subr.mxu0 %v4725_v1 }
 0x4ad   :  { %4239 = vmatmul.mubr.msk.f32.vlgmr.msra.gmra.mrb[4].mxu0 %vm5796_vm7, %v488_v62 }
 0x4ae   :  { %4261 = vmatprep.mubr.msk.f32.mxu0 %vm5817_vm0, %v4725_v1 }
 0x580   :  { %v5022_v21 = vpop.f32.mrb[4].mxu0 }
 0x581   :  { %v4240_v22 = vpop.f32.mrb[5].mxu0  ;;  %v853_v23 = vsel %vm852_vm15, %v5022_v21, inf }
 0x582   :  { %854 = vmin.xlane.f32.xlu1 %v853_v23 }
 0x60f   :  { %v855_v24 = vpop.xlane.xlu1 %854 }
 0x610   :  { %vm856_vm5 = vcmp.eq.f32.partialorder %v5022_v21, %v855_v24 }
 0x611   :  { %v857_v25 = vsel %vm856_vm5, %v4945_v50, 20 }
 0x612   :  { %v858_v26 = vsel %vm852_vm15, %v857_v25, 2147483647 }
 0x613   :  { %v860_v27 = vshra.s32 %v858_v26, 16  ;;  %v859_v29 = vand.u32 65535, %v858_v26 }
 0x615   :  { %v862_v28 = vcvt.s32.f32 %v860_v27  ;;  %v861_v31 = vcvt.s32.f32 %v859_v29 }
 0x617   :  { %863 = vmin.xlane.f32.xlu0 %v862_v28 }
 0x6a4   :  { %v864_v30 = vpop.xlane.xlu0 %863 }
 0x6a5   :  { %vm865_vm10 = vcmp.eq.f32.partialorder %v862_v28, %v864_v30  ;;  %v870_v33 = vcvt.f32.s32 %v864_v30 }
 0x6a6   :  { %v866_v32 = vsel %vm865_vm10, %v861_v31, inf }
 0x6a7   :  { %867 = vmin.xlane.f32.xlu1 %v866_v32  ;;  %v871_v35 = vshll.u32 %v870_v33, 16 }
 0x734   :  { %v868_v34 = vpop.xlane.xlu1 %867 }
 0x735   :  { %v869_v36 = vcvt.f32.s32 %v868_v34 }
 0x737   :  { %v872_v37 = vadd.s32 %v871_v35, %v869_v36 }
 0x739   :  { %vm886_vm11 = vcmp.eq.s32.totalorder %v4945_v50, %v872_v37  ;;  %v878_v54 = vrot.slane %v872_v37, %v5035_v51 }
 0x73a   :  { %v887_v38 = vsel %vm886_vm11, inf, %v5022_v21  ;;  %vm873_vm11 = vcmp.eq.s32.totalorder %v4943_v49, 0 }
 0x73b   :  { %v888_v39 = vsel %vm852_vm15, %v887_v38, inf }
 0x73c   :  { %889 = vmin.xlane.f32.xlu0 %v888_v39 }
 0x7c9   :  { %v890_v40 = vpop.xlane.xlu0 %889 }
 0x7ca   :  { %vm891_vm5 = vcmp.eq.f32.partialorder %v887_v38, %v890_v40 }
 0x7cb   :  { %v892_v41 = vsel %vm891_vm5, %v4945_v50, 20  ;;  %vm879_vm5 = vcmp.eq.s32.totalorder %v4945_v50, %v878_v54 }
 0x7cc   :  { %v893_v42 = vsel %vm852_vm15, %v892_v41, 2147483647  ;;  %vm880_vm7 = vmand %vm873_vm11, %vm879_vm5 }
 0x7cd   :  { %v895_v43 = vshra.s32 %v893_v42, 16  ;;  %v894_v45 = vand.u32 65535, %v893_v42  ;;  %v882_v62 = vsel %vm880_vm7, 1.0, %v4725_v1 }
 0x7cf   :  { %v897_v44 = vcvt.s32.f32 %v895_v43  ;;  %v896_v47 = vcvt.s32.f32 %v894_v45 }
 0x7d1   :  { %898 = vmin.xlane.f32.xlu1 %v897_v44 }
 0x85e   :  { %v899_v46 = vpop.xlane.xlu1 %898 }
 0x85f   :  { %vm900_vm10 = vcmp.eq.f32.partialorder %v897_v44, %v899_v46  ;;  %v905_v52 = vcvt.f32.s32 %v899_v46 }
 0x860   :  { %v901_v48 = vsel %vm900_vm10, %v896_v47, inf }
 0x861   :  { %902 = vmin.xlane.f32.xlu0 %v901_v48  ;;  %v906_v56 = vshll.u32 %v905_v52, 16 }
 0x8ee   :  { %v903_v55 = vpop.xlane.xlu0 %902 }
 0x8ef   :  { %v904_v57 = vcvt.f32.s32 %v903_v55 }
 0x8f1   :  { %v907_v58 = vadd.s32 %v906_v56, %v904_v57 }
 0x8f3   :  { %v913_v59 = vrot.slane %v907_v58, %v5035_v51  ;;  %vm921_vm10 = vcmp.eq.s32.totalorder %v4945_v50, %v907_v58 }
 0x8f4   :  { %v922_v60 = vsel %vm921_vm10, inf, %v887_v38 }
 0x8f5   :  { %vm914_vm6 = vcmp.eq.s32.totalorder %v4945_v50, %v913_v59  ;;  %v923_v61 = vsel %vm852_vm15, %v922_v60, inf }
 0x8f6   :  { %vm915_vm8 = vmand %vm908_vm13, %vm914_vm6  ;;  %924 = vmin.xlane.f32.xlu1 %v923_v61  ;;  %vm5808_vm6 = vcmp.eq.s32.totalorder %v4943_v49, 2 }
 0x8f7   :  { %v917_v63 = vsel %vm915_vm8, 1.0, %v4725_v1 }
 0x8f8   :  { %v919_v5 = vadd.f32 %v917_v63, %v882_v62 }
 0x983   :  { %v925_v8 = vpop.xlane.xlu1 %924 }
 0x984   :  { %vm926_vm4 = vcmp.eq.f32.partialorder %v922_v60, %v925_v8 }
 0x985   :  { %v927_v9 = vsel %vm926_vm4, %v4945_v50, 20 }
 0x986   :  { %v928_v12 = vsel %vm852_vm15, %v927_v9, 2147483647 }
 0x987   :  { %v930_v15 = vshra.s32 %v928_v12, 16  ;;  %v929_v22 = vand.u32 65535, %v928_v12 }
 0x989   :  { %v932_v20 = vcvt.s32.f32 %v930_v15  ;;  %v931_v24 = vcvt.s32.f32 %v929_v22 }
 0x98b   :  { %933 = vmin.xlane.f32.xlu0 %v932_v20 }
 0xa18   :  { %v934_v23 = vpop.xlane.xlu0 %933 }
 0xa19   :  { %vm935_vm5 = vcmp.eq.f32.partialorder %v932_v20, %v934_v23  ;;  %v940_v26 = vcvt.f32.s32 %v934_v23 }
 0xa1a   :  { %v936_v25 = vsel %vm935_vm5, %v931_v24, inf }
 0xa1b   :  { %937 = vmin.xlane.f32.xlu1 %v936_v25  ;;  %v941_v28 = vshll.u32 %v940_v26, 16 }
 0xaa8   :  { %v938_v27 = vpop.xlane.xlu1 %937 }
 0xaa9   :  { %v939_v29 = vcvt.f32.s32 %v938_v27 }
 0xaab   :  { %v942_v30 = vadd.s32 %v941_v28, %v939_v29 }
 0xaad   :  { %v948_v31 = vrot.slane %v942_v30, %v5035_v51  ;;  %vm956_vm4 = vcmp.eq.s32.totalorder %v4945_v50, %v942_v30 }
 0xaae   :  { %v957_v32 = vsel %vm956_vm4, inf, %v922_v60  ;;  %vm978_vm4 = vcmp.eq.s32.totalorder %v4943_v49, 3 }
 0xaaf   :  { %vm949_vm7 = vcmp.eq.s32.totalorder %v4945_v50, %v948_v31  ;;  %v958_v33 = vsel %vm852_vm15, %v957_v32, inf }
 0xab0   :  { %vm950_vm8 = vmand %vm5808_vm6, %vm949_vm7  ;;  %959 = vmin.xlane.f32.xlu0 %v958_v33 }
 0xab1   :  { %v952_v34 = vsel %vm950_vm8, 1.0, %v4725_v1 }
 0xab2   :  { %v954_v35 = vadd.f32 %v952_v34, %v919_v5 }
 0xb3d   :  { %v960_v36 = vpop.xlane.xlu0 %959 }
 0xb3e   :  { %vm961_vm10 = vcmp.eq.f32.partialorder %v957_v32, %v960_v36 }
 0xb3f   :  { %v962_v37 = vsel %vm961_vm10, %v4945_v50, 20 }
 0xb40   :  { %v963_v38 = vsel %vm852_vm15, %v962_v37, 2147483647 }
 0xb41   :  { %v965_v39 = vshra.s32 %v963_v38, 16  ;;  %v964_v41 = vand.u32 65535, %v963_v38 }
 0xb43   :  { %v967_v40 = vcvt.s32.f32 %v965_v39  ;;  %v966_v43 = vcvt.s32.f32 %v964_v41  ;;  %v1201_v39 = vsel %vm852_vm15, %v5022_v21, -inf }
 0xb45   :  { %968 = vmin.xlane.f32.xlu1 %v967_v40 }
 0xbd2   :  { %v969_v42 = vpop.xlane.xlu1 %968 }
 0xbd3   :  { %vm970_vm5 = vcmp.eq.f32.partialorder %v967_v40, %v969_v42  ;;  %v975_v45 = vcvt.f32.s32 %v969_v42 }
 0xbd4   :  { %v971_v44 = vsel %vm970_vm5, %v966_v43, inf }
 0xbd5   :  { %972 = vmin.xlane.f32.xlu0 %v971_v44  ;;  %v976_v47 = vshll.u32 %v975_v45, 16 }
 0xc62   :  { %v973_v46 = vpop.xlane.xlu0 %972 }
 0xc63   :  { %v974_v48 = vcvt.f32.s32 %v973_v46 }
 0xc65   :  { %v977_v52 = vadd.s32 %v976_v47, %v974_v48 }
 0xc67   :  { %v983_v54 = vrot.slane %v977_v52, %v5035_v51  ;;  %vm991_vm7 = vcmp.eq.s32.totalorder %v4945_v50, %v977_v52 }
 0xc68   :  { %v992_v55 = vsel %vm991_vm7, inf, %v957_v32 }
 0xc69   :  { %vm984_vm8 = vcmp.eq.s32.totalorder %v4945_v50, %v983_v54  ;;  %v993_v56 = vsel %vm852_vm15, %v992_v55, inf }
 0xc6a   :  { %vm985_vm10 = vmand %vm978_vm4, %vm984_vm8  ;;  %994 = vmin.xlane.f32.xlu1 %v993_v56  ;;  %vm5802_vm8 = vcmp.eq.s32.totalorder %v4943_v49, 4 }
 0xc6b   :  { %v987_v57 = vsel %vm985_vm10, 1.0, %v4725_v1 }
 0xc6c   :  { %v989_v58 = vadd.f32 %v987_v57, %v954_v35 }
 0xcf7   :  { %v995_v59 = vpop.xlane.xlu1 %994 }
 0xcf8   :  { %vm996_vm5 = vcmp.eq.f32.partialorder %v992_v55, %v995_v59 }
 0xcf9   :  { %v997_v60 = vsel %vm996_vm5, %v4945_v50, 20 }
 0xcfa   :  { %v998_v61 = vsel %vm852_vm15, %v997_v60, 2147483647 }
 0xcfb   :  { %v1000_v62 = vshra.s32 %v998_v61, 16  ;;  %v999_v5 = vand.u32 65535, %v998_v61 }
 0xcfd   :  { %v1002_v63 = vcvt.s32.f32 %v1000_v62  ;;  %v1001_v9 = vcvt.s32.f32 %v999_v5 }
 0xcff   :  { %1003 = vmin.xlane.f32.xlu0 %v1002_v63 }
 0xd8c   :  { %v1004_v8 = vpop.xlane.xlu0 %1003 }
 0xd8d   :  { %vm1005_vm7 = vcmp.eq.f32.partialorder %v1002_v63, %v1004_v8  ;;  %v1010_v15 = vcvt.f32.s32 %v1004_v8 }
 0xd8e   :  { %v1006_v12 = vsel %vm1005_vm7, %v1001_v9, inf }
 0xd8f   :  { %1007 = vmin.xlane.f32.xlu1 %v1006_v12  ;;  %v1011_v22 = vshll.u32 %v1010_v15, 16 }
 0xe1c   :  { %v1008_v20 = vpop.xlane.xlu1 %1007 }
 0xe1d   :  { %v1009_v23 = vcvt.f32.s32 %v1008_v20 }
 0xe1f   :  { %v1012_v24 = vadd.s32 %v1011_v22, %v1009_v23 }
 0xe21   :  { %v1018_v25 = vrot.slane %v1012_v24, %v5035_v51  ;;  %vm1026_vm10 = vcmp.eq.s32.totalorder %v4945_v50, %v1012_v24 }
 0xe22   :  { %v1027_v26 = vsel %vm1026_vm10, inf, %v992_v55 }
 0xe23   :  { %vm1019_vm5 = vcmp.eq.s32.totalorder %v4945_v50, %v1018_v25  ;;  %v1028_v27 = vsel %vm852_vm15, %v1027_v26, inf }
 0xe24   :  { %vm1020_vm7 = vmand %vm5802_vm8, %vm1019_vm5  ;;  %1029 = vmin.xlane.f32.xlu0 %v1028_v27 }
 0xe25   :  { %v1022_v28 = vsel %vm1020_vm7, 1.0, %v4725_v1 }
 0xe26   :  { %v1024_v29 = vadd.f32 %v1022_v28, %v989_v58 }
 0xeb1   :  { %v1030_v30 = vpop.xlane.xlu0 %1029 }
 0xeb2   :  { %vm1031_vm3 = vcmp.eq.f32.partialorder %v1027_v26, %v1030_v30 }
 0xeb3   :  { %v1032_v31 = vsel %vm1031_vm3, %v4945_v50, 20  ;;  %vm5804_vm3 = vcmp.eq.s32.totalorder %v4943_v49, 5 }
 0xeb4   :  { %v1033_v32 = vsel %vm852_vm15, %v1032_v31, 2147483647 }
 0xeb5   :  { %v1035_v33 = vshra.s32 %v1033_v32, 16  ;;  %v1034_v35 = vand.u32 65535, %v1033_v32 }
 0xeb7   :  { %v1037_v34 = vcvt.s32.f32 %v1035_v33  ;;  %v1036_v37 = vcvt.s32.f32 %v1034_v35 }
 0xeb9   :  { %1038 = vmin.xlane.f32.xlu1 %v1037_v34 }
 0xf46   :  { %v1039_v36 = vpop.xlane.xlu1 %1038 }
 0xf47   :  { %vm1040_vm10 = vcmp.eq.f32.partialorder %v1037_v34, %v1039_v36  ;;  %v1045_v40 = vcvt.f32.s32 %v1039_v36 }
 0xf48   :  { %v1041_v38 = vsel %vm1040_vm10, %v1036_v37, inf }
 0xf49   :  { %1042 = vmin.xlane.f32.xlu0 %v1041_v38  ;;  %v1046_v42 = vshll.u32 %v1045_v40, 16 }
 0xf4d   :  { %1202 = vmax.xlane.f32.xlu0 %v1201_v39 }
 0xfd6   :  { %v1043_v41 = vpop.xlane.xlu0 %1042 }
 0xfd7   :  { %v1044_v43 = vcvt.f32.s32 %v1043_v41 }
 0xfd9   :  { %v1047_v44 = vadd.s32 %v1046_v42, %v1044_v43 }
 0xfda   :  { %v1203_v54 = vpop.xlane.xlu0 %1202 }
 0xfdb   :  { %v1053_v45 = vrot.slane %v1047_v44, %v5035_v51  ;;  %vm1061_vm5 = vcmp.eq.s32.totalorder %v4945_v50, %v1047_v44  ;;  %vm1204_vm12 = vcmp.eq.f32.partialorder %v5022_v21, %v1203_v54 }
 0xfdc   :  { %v1062_v46 = vsel %vm1061_vm5, inf, %v1027_v26  ;;  %v1205_v55 = vsel %vm1204_vm12, %v4945_v50, 20 }
 0xfdd   :  { %vm1054_vm7 = vcmp.eq.s32.totalorder %v4945_v50, %v1053_v45  ;;  %v1063_v47 = vsel %vm852_vm15, %v1062_v46, inf  ;;  %v1206_v59 = vsel %vm852_vm15, %v1205_v55, 2147483647 }
 0xfde   :  { %vm1055_vm10 = vmand %vm5804_vm3, %vm1054_vm7  ;;  %1064 = vmin.xlane.f32.xlu1 %v1063_v47  ;;  %v1208_v62 = vshra.s32 %v1206_v59, 16  ;;  %v1207_v12 = vand.u32 65535, %v1206_v59 }
 0xfdf   :  { %v1057_v48 = vsel %vm1055_vm10, 1.0, %v4725_v1 }
 0xfe0   :  { %v1059_v52 = vadd.f32 %v1057_v48, %v1024_v29  ;;  %v1210_v63 = vcvt.s32.f32 %v1208_v62  ;;  %v1209_v22 = vcvt.s32.f32 %v1207_v12 }
0x106b   :  { %v1065_v56 = vpop.xlane.xlu1 %1064 }
0x106c   :  { %vm1066_vm8 = vcmp.eq.f32.partialorder %v1062_v46, %v1065_v56 }
0x106d   :  { %v1067_v57 = vsel %vm1066_vm8, %v4945_v50, 20  ;;  %vm5803_vm8 = vcmp.eq.s32.totalorder %v4943_v49, 6 }
0x106e   :  { %v1068_v58 = vsel %vm852_vm15, %v1067_v57, 2147483647 }
0x106f   :  { %v1070_v60 = vshra.s32 %v1068_v58, 16  ;;  %v1069_v5 = vand.u32 65535, %v1068_v58 }
0x1071   :  { %v1072_v61 = vcvt.s32.f32 %v1070_v60  ;;  %v1071_v9 = vcvt.s32.f32 %v1069_v5 }
0x1073   :  { %1073 = vmin.xlane.f32.xlu1 %v1072_v61 }
0x1077   :  { %1211 = vmin.xlane.f32.xlu1 %v1210_v63 }
0x1100   :  { %v1074_v8 = vpop.xlane.xlu1 %1073 }
0x1101   :  { %vm1075_vm5 = vcmp.eq.f32.partialorder %v1072_v61, %v1074_v8  ;;  %v1080_v24 = vcvt.f32.s32 %v1074_v8 }
0x1102   :  { %v1076_v15 = vsel %vm1075_vm5, %v1071_v9, inf }
0x1103   :  { %1077 = vmin.xlane.f32.xlu0 %v1076_v15  ;;  %v1081_v26 = vshll.u32 %v1080_v24, 16 }
0x1104   :  { %v1212_v20 = vpop.xlane.xlu1 %1211 }
0x1105   :  { %vm1213_vm12 = vcmp.eq.f32.partialorder %v1210_v63, %v1212_v20  ;;  %v1218_v27 = vcvt.f32.s32 %v1212_v20 }
0x1106   :  { %v1214_v23 = vsel %vm1213_vm12, %v1209_v22, inf }
0x1107   :  { %1215 = vmin.xlane.f32.xlu0 %v1214_v23  ;;  %v1219_v31 = vshll.u32 %v1218_v27, 16 }
0x1190   :  { %v1078_v25 = vpop.xlane.xlu0 %1077 }
0x1191   :  { %v1079_v28 = vcvt.f32.s32 %v1078_v25 }
0x1193   :  { %v1082_v29 = vadd.s32 %v1081_v26, %v1079_v28 }
0x1194   :  { %v1216_v30 = vpop.xlane.xlu0 %1215 }
0x1195   :  { %v1088_v32 = vrot.slane %v1082_v29, %v5035_v51  ;;  %v1217_v33 = vcvt.f32.s32 %v1216_v30  ;;  %vm1096_vm7 = vcmp.eq.s32.totalorder %v4945_v50, %v1082_v29 }
0x1196   :  { %v1097_v34 = vsel %vm1096_vm7, inf, %v1062_v46 }
0x1197   :  { %vm1089_vm10 = vcmp.eq.s32.totalorder %v4945_v50, %v1088_v32  ;;  %v1220_v35 = vadd.s32 %v1219_v31, %v1217_v33  ;;  %v1098_v36 = vsel %vm852_vm15, %v1097_v34, inf }
0x1198   :  { %vm1090_vm5 = vmand %vm5803_vm8, %vm1089_vm10  ;;  %1099 = vmin.xlane.f32.xlu1 %v1098_v36 }
0x1199   :  { %v1092_v37 = vsel %vm1090_vm5, 1.0, %v4725_v1  ;;  %vm1229_vm12 = vcmp.eq.s32.totalorder %v4945_v50, %v1220_v35  ;;  %v1224_v12 = vrot.slane %v1220_v35, %v5035_v51 }
0x119a   :  { %v1230_v38 = vsel %vm1229_vm12, -inf, %v5022_v21  ;;  %v1094_v39 = vadd.f32 %v1092_v37, %v1059_v52 }
0x119b   :  { %v1231_v40 = vsel %vm852_vm15, %v1230_v38, -inf }
0x119c   :  { %1232 = vmax.xlane.f32.xlu0 %v1231_v40 }
0x1225   :  { %v1100_v41 = vpop.xlane.xlu1 %1099 }
0x1226   :  { %vm1101_vm7 = vcmp.eq.f32.partialorder %v1097_v34, %v1100_v41 }
0x1227   :  { %v1102_v42 = vsel %vm1101_vm7, %v4945_v50, 20  ;;  %vm5807_vm7 = vcmp.eq.s32.totalorder %v4943_v49, 7 }
0x1228   :  { %v1103_v43 = vsel %vm852_vm15, %v1102_v42, 2147483647 }
0x1229   :  { %v1233_v44 = vpop.xlane.xlu0 %1232  ;;  %v1105_v45 = vshra.s32 %v1103_v43, 16  ;;  %v1104_v54 = vand.u32 65535, %v1103_v43 }
0x122a   :  { %vm1234_vm10 = vcmp.eq.f32.partialorder %v1230_v38, %v1233_v44 }
0x122b   :  { %v1235_v46 = vsel %vm1234_vm10, %v4945_v50, 20  ;;  %v1107_v47 = vcvt.s32.f32 %v1105_v45  ;;  %v1106_v56 = vcvt.s32.f32 %v1104_v54 }
0x122c   :  { %v1236_v48 = vsel %vm852_vm15, %v1235_v46, 2147483647 }
0x122d   :  { %1108 = vmin.xlane.f32.xlu1 %v1107_v47  ;;  %v1238_v21 = vshra.s32 %v1236_v48, 16  ;;  %v1237_v57 = vand.u32 65535, %v1236_v48 }
0x122f   :  { %v1240_v52 = vcvt.s32.f32 %v1238_v21  ;;  %v1239_v60 = vcvt.s32.f32 %v1237_v57 }
0x1231   :  { %1241 = vmin.xlane.f32.xlu1 %v1240_v52 }
0x12ba   :  { %v1109_v55 = vpop.xlane.xlu1 %1108 }
0x12bb   :  { %vm1110_vm5 = vcmp.eq.f32.partialorder %v1107_v47, %v1109_v55  ;;  %v1115_v62 = vcvt.f32.s32 %v1109_v55 }
0x12bc   :  { %v1111_v58 = vsel %vm1110_vm5, %v1106_v56, inf  ;;  %vm1225_vm5 = vcmp.eq.s32.totalorder %v4945_v50, %v1224_v12 }
0x12bd   :  { %1112 = vmin.xlane.f32.xlu0 %v1111_v58  ;;  %v1116_v5 = vshll.u32 %v1115_v62, 16 }
0x12be   :  { %v1242_v59 = vpop.xlane.xlu1 %1241 }
0x12bf   :  { %vm1243_vm12 = vcmp.eq.f32.partialorder %v1240_v52, %v1242_v59  ;;  %v1248_v8 = vcvt.f32.s32 %v1242_v59 }
0x12c0   :  { %v1244_v61 = vsel %vm1243_vm12, %v1239_v60, inf }
0x12c1   :  { %1245 = vmin.xlane.f32.xlu0 %v1244_v61  ;;  %v1249_v22 = vshll.u32 %v1248_v8, 16 }
0x134a   :  { %v1113_v63 = vpop.xlane.xlu0 %1112 }
0x134b   :  { %v1114_v9 = vcvt.f32.s32 %v1113_v63 }
0x134d   :  { %v1117_v15 = vadd.s32 %v1116_v5, %v1114_v9 }
0x134e   :  { %v1246_v20 = vpop.xlane.xlu0 %1245 }
0x134f   :  { %v1123_v23 = vrot.slane %v1117_v15, %v5035_v51  ;;  %v1247_v24 = vcvt.f32.s32 %v1246_v20  ;;  %vm1131_vm10 = vcmp.eq.s32.totalorder %v4945_v50, %v1117_v15 }
0x1350   :  { %v1132_v25 = vsel %vm1131_vm10, inf, %v1097_v34  ;;  %vm1226_vm10 = vmand %vm873_vm11, %vm1225_vm5 }
0x1351   :  { %vm1124_vm12 = vcmp.eq.s32.totalorder %v4945_v50, %v1123_v23  ;;  %v1250_v26 = vadd.s32 %v1249_v22, %v1247_v24  ;;  %v1133_v27 = vsel %vm852_vm15, %v1132_v25, inf  ;;  %v1227_v33 = vsel %vm1226_vm10, 1.0, %v4725_v1 }
0x1352   :  { %vm1125_vm8 = vmand %vm5807_vm7, %vm1124_vm12  ;;  %1134 = vmin.xlane.f32.xlu1 %v1133_v27 }
0x1353   :  { %v1254_v28 = vrot.slane %v1250_v26, %v5035_v51  ;;  %vm1259_vm3 = vcmp.eq.s32.totalorder %v4945_v50, %v1250_v26  ;;  %v1127_v29 = vsel %vm1125_vm8, 1.0, %v4725_v1 }
0x1354   :  { %v1260_v30 = vsel %vm1259_vm3, -inf, %v1230_v38  ;;  %v1129_v31 = vadd.f32 %v1127_v29, %v1094_v39 }
0x1355   :  { %vm1255_vm9 = vcmp.eq.s32.totalorder %v4945_v50, %v1254_v28  ;;  %v1261_v32 = vsel %vm852_vm15, %v1260_v30, -inf }
0x1356   :  { %vm1256_vm12 = vmand %vm908_vm13, %vm1255_vm9  ;;  %1262 = vmax.xlane.f32.xlu0 %v1261_v32  ;;  %4247 = vmatprep.mubr.msk.f32.mxu1 %vm1353_vm1, %v1129_v31 }
0x1357   :  { %v1257_v34 = vsel %vm1256_vm12, 1.0, %v4725_v1 }
0x1358   :  { %v1258_v35 = vadd.f32 %v1257_v34, %v1227_v33 }
0x13df   :  { %v1135_v36 = vpop.xlane.xlu1 %1134 }
0x13e0   :  { %vm1136_vm8 = vcmp.eq.f32.partialorder %v1132_v25, %v1135_v36 }
0x13e1   :  { %v1137_v37 = vsel %vm1136_vm8, %v4945_v50, 20 }
0x13e2   :  { %v1138_v38 = vsel %vm852_vm15, %v1137_v37, 2147483647 }
0x13e3   :  { %v1263_v39 = vpop.xlane.xlu0 %1262  ;;  %v1140_v40 = vshra.s32 %v1138_v38, 16  ;;  %v1139_v46 = vand.u32 65535, %v1138_v38 }
0x13e4   :  { %vm1264_vm3 = vcmp.eq.f32.partialorder %v1260_v30, %v1263_v39 }
0x13e5   :  { %v1265_v41 = vsel %vm1264_vm3, %v4945_v50, 20  ;;  %v1142_v42 = vcvt.s32.f32 %v1140_v40  ;;  %v1141_v48 = vcvt.s32.f32 %v1139_v46 }
0x13e6   :  { %v1266_v43 = vsel %vm852_vm15, %v1265_v41, 2147483647 }
0x13e7   :  { %1143 = vmin.xlane.f32.xlu1 %v1142_v42  ;;  %v1268_v44 = vshra.s32 %v1266_v43, 16  ;;  %v1267_v21 = vand.u32 65535, %v1266_v43 }
0x13e9   :  { %v1270_v45 = vcvt.s32.f32 %v1268_v44  ;;  %v1269_v55 = vcvt.s32.f32 %v1267_v21 }
0x13eb   :  { %1271 = vmin.xlane.f32.xlu1 %v1270_v45 }
0x1474   :  { %v1144_v47 = vpop.xlane.xlu1 %1143 }
0x1475   :  { %vm1145_vm9 = vcmp.eq.f32.partialorder %v1142_v42, %v1144_v47  ;;  %v1150_v57 = vcvt.f32.s32 %v1144_v47 }
0x1476   :  { %v1146_v52 = vsel %vm1145_vm9, %v1141_v48, inf }
0x1477   :  { %1147 = vmin.xlane.f32.xlu0 %v1146_v52  ;;  %v1151_v59 = vshll.u32 %v1150_v57, 16 }
0x1478   :  { %v1272_v54 = vpop.xlane.xlu1 %1271 }
0x1479   :  { %vm1273_vm5 = vcmp.eq.f32.partialorder %v1270_v45, %v1272_v54  ;;  %v1278_v60 = vcvt.f32.s32 %v1272_v54 }
0x147a   :  { %v1274_v56 = vsel %vm1273_vm5, %v1269_v55, inf }
0x147b   :  { %1275 = vmin.xlane.f32.xlu0 %v1274_v56  ;;  %v1279_v5 = vshll.u32 %v1278_v60, 16 }
0x1504   :  { %v1148_v58 = vpop.xlane.xlu0 %1147 }
0x1505   :  { %v1149_v61 = vcvt.f32.s32 %v1148_v58 }
0x1507   :  { %v1152_v62 = vadd.s32 %v1151_v59, %v1149_v61 }
0x1508   :  { %v1276_v63 = vpop.xlane.xlu0 %1275 }
0x1509   :  { %v1277_v8 = vcvt.f32.s32 %v1276_v63  ;;  %vm1166_vm10 = vcmp.eq.s32.totalorder %v4945_v50, %v1152_v62  ;;  %v1158_v45 = vrot.slane %v1152_v62, %v5035_v51 }
0x150a   :  { %v1167_v9 = vsel %vm1166_vm10, inf, %v1132_v25 }
0x150b   :  { %v1280_v12 = vadd.s32 %v1279_v5, %v1277_v8  ;;  %v1168_v15 = vsel %vm852_vm15, %v1167_v9, inf }
0x150c   :  { %1169 = vmin.xlane.f32.xlu1 %v1168_v15 }
0x150d   :  { %v1284_v20 = vrot.slane %v1280_v12, %v5035_v51  ;;  %vm1289_vm12 = vcmp.eq.s32.totalorder %v4945_v50, %v1280_v12 }
0x150e   :  { %v1290_v22 = vsel %vm1289_vm12, -inf, %v1260_v30 }
0x150f   :  { %vm1285_vm8 = vcmp.eq.s32.totalorder %v4945_v50, %v1284_v20  ;;  %v1291_v23 = vsel %vm852_vm15, %v1290_v22, -inf }
0x1510   :  { %vm1286_vm3 = vmand %vm5808_vm6, %vm1285_vm8  ;;  %1292 = vmax.xlane.f32.xlu0 %v1291_v23  ;;  %vm1154_vm8 = vcmp.eq.s32.totalorder %v4992_v14, 8 }
0x1511   :  { %v1287_v24 = vsel %vm1286_vm3, 1.0, %v4725_v1  ;;  %vm1159_vm3 = vcmp.eq.s32.totalorder %v4945_v50, %v1158_v45 }
0x1512   :  { %v1288_v25 = vadd.f32 %v1287_v24, %v1258_v35 }
0x1599   :  { %v1170_v26 = vpop.xlane.xlu1 %1169 }
0x159a   :  { %vm1171_vm9 = vcmp.eq.f32.partialorder %v1167_v9, %v1170_v26 }
0x159b   :  { %v1172_v27 = vsel %vm1171_vm9, %v4945_v50, 20  ;;  %vm5809_vm9 = vcmp.eq.s32.totalorder %v4992_v14, 9 }
0x159c   :  { %v1173_v28 = vsel %vm852_vm15, %v1172_v27, 2147483647 }
0x159d   :  { %v1293_v29 = vpop.xlane.xlu0 %1292  ;;  %v1175_v31 = vshra.s32 %v1173_v28, 16  ;;  %v1174_v37 = vand.u32 65535, %v1173_v28 }
0x159e   :  { %vm1294_vm5 = vcmp.eq.f32.partialorder %v1290_v22, %v1293_v29 }
0x159f   :  { %v1295_v30 = vsel %vm1294_vm5, %v4945_v50, 20  ;;  %v1177_v32 = vcvt.s32.f32 %v1175_v31  ;;  %v1176_v38 = vcvt.s32.f32 %v1174_v37  ;;  %vm1161_vm5 = vmand %vm1154_vm8, %vm1159_vm3 }
0x15a0   :  { %v1296_v33 = vsel %vm852_vm15, %v1295_v30, 2147483647  ;;  %v1163_v59 = vsel %vm1161_vm5, 1.0, %v4725_v1 }
0x15a1   :  { %1178 = vmin.xlane.f32.xlu1 %v1177_v32  ;;  %v1298_v34 = vshra.s32 %v1296_v33, 16  ;;  %v1297_v39 = vand.u32 65535, %v1296_v33 }
0x15a3   :  { %v1300_v36 = vcvt.s32.f32 %v1298_v34  ;;  %v1299_v42 = vcvt.s32.f32 %v1297_v39 }
0x15a5   :  { %1301 = vmin.xlane.f32.xlu1 %v1300_v36 }
0x162e   :  { %v1179_v35 = vpop.xlane.xlu1 %1178 }
0x162f   :  { %vm1180_vm10 = vcmp.eq.f32.partialorder %v1177_v32, %v1179_v35  ;;  %v1185_v44 = vcvt.f32.s32 %v1179_v35 }
0x1630   :  { %v1181_v40 = vsel %vm1180_vm10, %v1176_v38, inf }
0x1631   :  { %1182 = vmin.xlane.f32.xlu0 %v1181_v40  ;;  %v1186_v47 = vshll.u32 %v1185_v44, 16 }
0x1632   :  { %v1302_v41 = vpop.xlane.xlu1 %1301 }
0x1633   :  { %vm1303_vm12 = vcmp.eq.f32.partialorder %v1300_v36, %v1302_v41  ;;  %v1308_v48 = vcvt.f32.s32 %v1302_v41 }
0x1634   :  { %v1304_v43 = vsel %vm1303_vm12, %v1299_v42, inf }
0x1635   :  { %1305 = vmin.xlane.f32.xlu0 %v1304_v43  ;;  %v1309_v55 = vshll.u32 %v1308_v48, 16 }
0x16be   :  { %v1183_v46 = vpop.xlane.xlu0 %1182 }
0x16bf   :  { %v1184_v21 = vcvt.f32.s32 %v1183_v46 }
0x16c1   :  { %v1187_v52 = vadd.s32 %v1186_v47, %v1184_v21 }
0x16c2   :  { %v1306_v54 = vpop.xlane.xlu0 %1305 }
0x16c3   :  { %v1193_v56 = vrot.slane %v1187_v52, %v5035_v51  ;;  %v1307_v57 = vcvt.f32.s32 %v1306_v54 }
0x16c5   :  { %vm1194_vm10 = vcmp.eq.s32.totalorder %v4945_v50, %v1193_v56  ;;  %v1310_v58 = vadd.s32 %v1309_v55, %v1307_v57 }
0x16c6   :  { %vm1196_vm12 = vmand %vm5809_vm9, %vm1194_vm10  ;;  %vm5824_vm10 = vcmask 261120  }
0x16c7   :  { %v1198_v60 = vsel %vm1196_vm12, 1.0, %v4725_v1  ;;  %v1314_v61 = vrot.slane %v1310_v58, %v5035_v51  ;;  %vm1319_vm7 = vcmp.eq.s32.totalorder %v4945_v50, %v1310_v58  ;;  %vm5825_vm12 = vmmov %vm5824_vm10 }
0x16c8   :  { %v1200_v62 = vadd.f32 %v1198_v60, %v1163_v59  ;;  %v1320_v63 = vsel %vm1319_vm7, -inf, %v1290_v22  ;;  %vm5823_vm7 = vcmask 1043456  }
0x16c9   :  { %vm1315_vm6 = vcmp.eq.s32.totalorder %v4945_v50, %v1314_v61  ;;  %v1321_v5 = vsel %vm852_vm15, %v1320_v63, -inf }
0x16ca   :  { %vm1316_vm3 = vmand %vm978_vm4, %vm1315_vm6  ;;  %1322 = vmax.xlane.f32.xlu1 %v1321_v5  ;;  %4248 = vmatmul.mubr.msk.f32.vlgmr.msra.gmra.mrb[6].mxu1 %vm1353_vm1, %v1200_v62  ;;  %vm5816_vm6 = vcmask 254976  }
0x16cb   :  { %v1317_v8 = vsel %vm1316_vm3, 1.0, %v4725_v1  ;;  %4430 = vmatpush3.bf16.msra.mxu1 %v4980_v13  ;;  %4256 = vmatprep.mubr.msk.f32.mxu1 %vm5817_vm0, %v4725_v1  ;;  %v1510_v13 = vld [vmem:[#allocation2] sm:$0xff] }
0x16cc   :  { %v5174_v9 = vadd.f32 %v1317_v8, %v1288_v25  ;;  %4254 = vmatprep.subr.mxu1 %v4725_v1  ;;  %v1511_v29 = vmul.f32 %v1510_v13, %v1510_v13 }
0x16ce   :  { %v1512_v30 = vsel %vm5825_vm12, %v1511_v29, 0.0 }
0x16cf   :  { %4255 = vmatpush3.msk.msra.mxu1 %vm5823_vm7, %v4974_v7  ;;  %vm1802_vm7 = vcmask 1041408  }
0x1757   :  { %v1323_v12 = vpop.xlane.xlu1 %1322 }
0x1758   :  { %vm1324_vm5 = vcmp.eq.f32.partialorder %v1320_v63, %v1323_v12 }
0x1759   :  { %v1325_v15 = vsel %vm1324_vm5, %v4945_v50, 20  ;;  %vm5826_vm5 = vmmov %vm5824_vm10 }
0x175a   :  { %v1326_v20 = vsel %vm852_vm15, %v1325_v15, 2147483647 }
0x175b   :  { %v1328_v22 = vshra.s32 %v1326_v20, 16  ;;  %v1327_v32 = vand.u32 65535, %v1326_v20 }
0x175d   :  { %v1330_v23 = vcvt.s32.f32 %v1328_v22  ;;  %v1329_v34 = vcvt.s32.f32 %v1327_v32 }
0x175f   :  { %1331 = vmin.xlane.f32.xlu0 %v1330_v23 }
0x179d   :  { %v4249_v24 = vpop.f32.mrb[6].mxu1 }
0x179e   :  { %v1428_v26 = vpop.f32.mrb[7].mxu1  ;;  %v1677_v25 = vmul.f32 %v4249_v24, %v4249_v24 }
0x179f   :  { %v5181_v27 = vpack.c.bf16 %v4249_v24, %v1428_v26  ;;  %v1676_v28 = vmul.f32 %v1428_v26, %v1428_v26 }
0x17a0   :  { %v1682_v7 = vsel %vm5816_vm6, %v1677_v25, 0.0 }
0x17a1   :  { %1683 = vadd.xlane.f32.xlu0 %v1682_v7  ;;  %v1678_v31 = vsel %vm5824_vm10, %v1676_v28, 0.0  ;;  %vm4727_vm10 = vmmov 1  }
0x17a2   :  { %1679 = vadd.xlane.f32.xlu1 %v1678_v31  ;;  %vm5190_vm12 = vmpackc.low %vm1802_vm7, %vm4727_vm10 }
0x17a6   :  { %1513 = vadd.xlane.f32.xlu1 %v1512_v30 }
0x17ec   :  { %v1332_v33 = vpop.xlane.xlu0 %1331 }
0x17ed   :  { %vm1333_vm3 = vcmp.eq.f32.partialorder %v1330_v23, %v1332_v33  ;;  %v1338_v52 = vcvt.f32.s32 %v1332_v33 }
0x17ee   :  { %v1334_v36 = vsel %vm1333_vm3, %v1329_v34, inf  ;;  %vm5829_vm3 = vmmov %vm5826_vm5 }
0x17ef   :  { %1335 = vmin.xlane.f32.xlu0 %v1334_v36  ;;  %v1339_v55 = vshll.u32 %v1338_v52, 16  ;;  %vm5831_vm9 = vmmov %vm5829_vm3 }
0x182e   :  { %v1684_v37 = vpop.xlane.xlu0 %1683 }
0x182f   :  { %v1686_v35 = vadd.f32 1e-12, %v1684_v37  ;;  %v1680_v38 = vpop.xlane.xlu1 %1679 }
0x1830   :  { %v1685_v39 = vadd.f32 1e-12, %v1680_v38 }
0x1831   :  { %4517 = vrsqrt.f32 %v1686_v35 }
0x1832   :  { %4519 = vrsqrt.f32 %v1685_v39 }
0x1833   :  { %v1514_v40 = vpop.xlane.xlu1 %1513 }
0x1834   :  { %v1515_v41 = vadd.f32 1e-12, %v1514_v40 }
0x1836   :  { %4521 = vrsqrt.f32 %v1515_v41 }
0x183b   :  { %v4518_v42 = vpop.eup %4517 }
0x183c   :  { %v4520_v43 = vpop.eup %4519  ;;  %v1690_v44 = vmul.f32 %v4518_v42, %v4249_v24 }
0x183d   :  { %v1689_v45 = vmul.f32 %v4520_v43, %v1428_v26 }
0x183f   :  { %v4431_v46 = vpack.c.bf16 %v1690_v44, %v1689_v45 }
0x1840   :  { %v4522_v47 = vpop.eup %4521 }
0x1841   :  { %4433 = vmatprep.subr.msk.bf16.mxu1 %vm4842_vm2, %v4431_v46  ;;  %v1517_v48 = vmul.f32 %v4522_v47, %v1510_v13 }
0x1843   :  { %4260 = vmatpush3.xpose.msk.msra.mxu0 %vm5826_vm5, %v1517_v48  ;;  %vm5830_vm5 = vcmp.eq.s32.totalorder %v4943_v49, 4 }
0x1844   :  { %4264 = vmatprep.subr.mxu0 %v4725_v1 }
0x1846   :  { %4262 = vmatmul.mubr.msk.f32.vlgmr.msra.gmra.mrb[6].mxu0 %vm5829_vm3, %v1517_v48 }
0x1847   :  { %4265 = vmatpush3.msra.mxu0 %v1510_v13  ;;  %4266 = vmatprep.mubr.msk.f32.mxu0 %vm5817_vm0, %v4725_v1 }
0x1848   :  { %4439 = vmatprep.subr.msk.bf16.mxu0 %vm5190_vm12, %v5181_v27 }
0x187c   :  { %v1336_v54 = vpop.xlane.xlu0 %1335 }
0x187d   :  { %v1337_v56 = vcvt.f32.s32 %v1336_v54 }
0x187f   :  { %v1340_v57 = vadd.s32 %v1339_v55, %v1337_v56 }
0x1881   :  { %v1344_v58 = vrot.slane %v1340_v57, %v5035_v51 }
0x1883   :  { %vm1345_vm7 = vcmp.eq.s32.totalorder %v4945_v50, %v1344_v58 }
0x1884   :  { %vm1346_vm10 = vmand %vm5830_vm5, %vm1345_vm7  ;;  %vm5832_vm7 = vcmask 64512   ;;  %vm5812_vm5 = vcmask 1044480  }
0x1885   :  { %v1347_v59 = vsel %vm1346_vm10, 1.0, %v4725_v1  ;;  %vm5810_vm10 = vcmask 74752  }
0x1886   :  { %v1348_v60 = vadd.f32 %v1347_v59, %v5174_v9  ;;  %v4047_v59 = vld [vmem:[%s5781_s1 + $0x8] sm:$0x3f] }
0x1888   :  { %4257 = vmatmul.mubr.msk.f32.vlgmr.msra.gmra.mrb[8].mxu1 %vm1353_vm1, %v1348_v60  ;;  %v4048_v60 = vld [vmem:[%s5782_s2 + $0x8] sm:$0x3f] }
0x1889   :  { %4436 = vmatpush3.bf16.xpose.msk.msra.mxu1 %vm4842_vm2, %v4431_v46  ;;  %4273 = vmatprep.mubr.msk.f32.mxu1 %vm5829_vm3, %v1689_v45  ;;  %vm5811_vm3 = vcmask 80896  }
0x188a   :  { %4288 = vmatprep.subr.mxu1 %v4725_v1 }
0x1890   :  { %4274 = vmatmul.mubr.msk.f32.vlgmr.msra.gmra.mrb[10].mxu1 %vm5831_vm9, %v1690_v44  ;;  %vm5833_vm9 = vmmov %vm5832_vm7 }
0x1891   :  { %4290 = vmatprep.mubr.msk.f32.mxu1 %vm5817_vm0, %v4725_v1 }
0x1919   :  { %v1587_v61 = vpop.f32.mrb[6].mxu0 }
0x191a   :  { %v1591_v62 = vsel %vm5832_vm7, %v1587_v61, -inf  ;;  %v4263_v63 = vpop.f32.mrb[7].mxu0  ;;  %vm5815_vm7 = vcmask 258048  }
0x191b   :  { %1592 = vmax.xlane.f32.xlu1 %v1591_v62 }
0x195b   :  { %v1506_v5 = vpop.f32.mrb[8].mxu1 }
0x195c   :  { %v4258_v8 = vpop.f32.mrb[9].mxu1  ;;  %4289 = vmatpush3.msk.msra.mxu1 %vm5812_vm5, %v1506_v5  ;;  %v1883_v25 = vmul.f32 %v1506_v5, %v1506_v5 }
0x195d   :  { %4455 = vmatprep.subr.bf16.mxu1 %v4723_v0 }
0x195e   :  { %v1885_v28 = vsel %vm5815_vm7, %v1883_v25, 0.0 }
0x1963   :  { %v4275_v9 = vpop.f32.mrb[10].mxu1 }
0x1964   :  { %v1763_v12 = vpop.f32.mrb[11].mxu1  ;;  %v1777_v15 = vsel %vm5810_vm10, %v4275_v9, -inf }
0x1965   :  { %1778 = vmax.xlane.f32.xlu1 %v1777_v15  ;;  %v1773_v20 = vsel %vm5811_vm3, %v1763_v12, -inf }
0x1966   :  { %1774 = vmax.xlane.f32.xlu0 %v1773_v20  ;;  %v4575_v20 = vld [vmem:[%s5786_s6] ss:$0 sm:$0xff] }
0x19a8   :  { %v1593_v22 = vpop.xlane.xlu1 %1592 }
0x19a9   :  { %v1594_v23 = vsub.f32 %v1587_v61, %v1593_v22  ;;  %v2060_v61 = vrot.slane %v4048_v60, 2 }
0x19ab   :  { %v1595_v13 = vmul.f32 1.442695, %v1594_v23 }
0x19ad   :  { %4523 = vpow2.f32 %v1595_v13 }
0x19b7   :  { %v4524_v24 = vpop.eup %4523 }
0x19b8   :  { %v1597_v26 = vsel %vm5833_vm9, %v4524_v24, 0.0 }
0x19b9   :  { %1598 = vadd.xlane.f32.xlu0 %v1597_v26 }
0x19bd   :  { %1886 = vadd.xlane.f32.xlu0 %v1885_v28 }
0x19f2   :  { %v1779_v29 = vpop.xlane.xlu1 %1778 }
0x19f3   :  { %v1781_v7 = vsub.f32 %v4275_v9, %v1779_v29  ;;  %v1775_v31 = vpop.xlane.xlu0 %1774 }
0x19f4   :  { %v1780_v30 = vsub.f32 %v1763_v12, %v1775_v31 }
0x19f5   :  { %v1784_v32 = vmul.f32 1.442695, %v1781_v7 }
0x19f6   :  { %v1782_v33 = vmul.f32 1.442695, %v1780_v30  ;;  %v2144_v30 = vld [vmem:[#allocation5 + $0x8] sm:$0xff] }
0x19f8   :  { %4525 = vpow2.f32 %v1782_v33 }
0x19f9   :  { %4527 = vpow2.f32 %v1784_v32 }
0x1a02   :  { %v4526_v34 = vpop.eup %4525 }
0x1a03   :  { %v1786_v36 = vsel %vm5811_vm3, %v4526_v34, 0.0  ;;  %v4528_v37 = vpop.eup %4527 }
0x1a04   :  { %1787 = vadd.xlane.f32.xlu1 %v1786_v36  ;;  %v1789_v35 = vsel %vm5810_vm10, %v4528_v37, 0.0 }
0x1a08   :  { %1790 = vadd.xlane.f32.xlu1 %v1789_v35 }
0x1a46   :  { %v1599_v38 = vpop.xlane.xlu0 %1598 }
0x1a47   :  { %4529 = vrcp.f32 %v1599_v38 }
0x1a4a   :  { %v1887_v41 = vpop.xlane.xlu0 %1886 }
0x1a4b   :  { %v1888_v42 = vadd.f32 1e-12, %v1887_v41  ;;  %v4576_v41 = vld [vmem:[%s5788_s8] ss:$0 sm:$0xff] }
0x1a51   :  { %v4530_v39 = vpop.eup %4529 }
0x1a52   :  { %v1601_v40 = vmul.f32 %v4530_v39, %v4524_v24 }
0x1a54   :  { %4267 = vmatmul.mubr.msk.f32.vlgmr.msra.gmra.mrb[8].mxu0 %vm5833_vm9, %v1601_v40  ;;  %vm5834_vm9 = vcmask 261120  }
0x1a55   :  { %4442 = vmatpush3.bf16.msk.msra.mxu0 %vm5190_vm12, %v5181_v27  ;;  %vm5835_vm10 = vmmov %vm5834_vm9 }
0x1a56   :  { %4283 = vmatprep.subr.mxu0 %v4725_v1 }
0x1a91   :  { %v1788_v43 = vpop.xlane.xlu1 %1787 }
0x1a92   :  { %4531 = vrcp.f32 %v1788_v43 }
0x1a93   :  { %4533 = vrsqrt.f32 %v1888_v42 }
0x1a95   :  { %v1791_v44 = vpop.xlane.xlu1 %1790 }
0x1a96   :  { %4535 = vrcp.f32 %v1791_v44 }
0x1a9c   :  { %v4532_v45 = vpop.eup %4531 }
0x1a9d   :  { %v1793_v46 = vmul.f32 %v4532_v45, %v4526_v34  ;;  %v4534_v47 = vpop.eup %4533 }
0x1a9e   :  { %v1890_v54 = vmul.f32 %v4534_v47, %v1506_v5 }
0x1a9f   :  { %4280 = vmatprep.mubr.msk.f32.mxu0 %vm5811_vm3, %v1793_v46 }
0x1aa0   :  { %v4536_v48 = vpop.eup %4535 }
0x1aa1   :  { %v1795_v52 = vmul.f32 %v4536_v48, %v4528_v37 }
0x1aa3   :  { %4281 = vmatmul.mubr.msk.f32.vlgmr.msra.gmra.mrb[10].mxu0 %vm5811_vm3, %v1795_v52  ;;  %vm5814_vm3 = vcmask 36864  }
0x1aa4   :  { %4284 = vmatpush3.xpose.msk.msra.mxu0 %vm5834_vm9, %v1890_v54  ;;  %4285 = vmatprep.mubr.msk.f32.mxu0 %vm5817_vm0, %v4725_v1 }
0x1aa5   :  { %4445 = vmatprep.subr.msk.bf16.mxu0 %vm4842_vm2, %v4855_v6 }
0x1aa7   :  { %4286 = vmatmul.mubr.msk.f32.vlgmr.msra.gmra.mrb[12].mxu0 %vm5835_vm10, %v1890_v54  ;;  %vm5836_vm10 = vmmov %vm5834_vm9  ;;  %v2333_v54 = vld [vmem:[%s5783_s3 + $0x1] sm:$0x1] }
0x1aa8   :  { %4448 = vmatpush3.bf16.xpose.msk.msra.mxu0 %vm4842_vm2, %v4855_v6  ;;  %vm5838_vm5 = vmmov %vm5836_vm10 }
0x1aa9   :  { %4451 = vmatprep.subr.msk.bf16.mxu0 %vm4842_vm2, %v4868_v11 }
0x1ab0   :  { %4454 = vmatpush3.bf16.xpose.msk.msra.mxu0 %vm4842_vm2, %v4868_v11 }
0x1ab1   :  { %4463 = vmatprep.subr.bf16.mxu0 %v4723_v0 }
0x1b27   :  { %v1671_v27 = vpop.f32.mrb[8].mxu0 }
0x1b28   :  { %1675 = vst.msk [vmem:[#allocation11] sm:$0xff] %vm5834_vm9, %v1671_v27  ;;  %v4268_v55 = vpop.f32.mrb[9].mxu0  ;;  %vm5837_vm9 = vcmask 1045504  }
0x1b29   :  { %v2062_v62 = vsel %vm5837_vm9, %v4047_v59, %v2060_v61 }
0x1b2a   :  { %4301 = vmatprep.mubr.msk.f32.mxu0 %vm5838_vm5, %v2062_v62 }
0x1b76   :  { %v4282_v56 = vpop.f32.mrb[10].mxu0 }
0x1b77   :  { %1882 = vst.msk [vmem:[%s5793_s13 + $0x8] sm:$0x3] %vm5816_vm6, %v4282_v56  ;;  %v1872_v6 = vpop.f32.mrb[11].mxu0 }
0x1b78   :  { %1881 = vst.msk [vmem:[%s5793_s13] sm:$0xff] %vm5836_vm10, %v1872_v6  ;;  %vm5839_vm10 = vmmov %vm5838_vm5  ;;  %vm5840_vm5 = vcmask 257024  }
0x1b79   :  { %4302 = vmatmul.mubr.msk.f32.vlgmr.msra.gmra.mrb[14].mxu0 %vm5839_vm10, %v2060_v61  ;;  %vm5841_vm9 = vmmov %vm5839_vm10  ;;  %vm5813_vm10 = vcmask 39936  }
0x1b7a   :  { %v1960_v11 = vpop.f32.mrb[12].mxu0  ;;  %4319 = vmatprep.mubr.msk.f32.mxu0 %vm5817_vm0, %v4725_v1 }
0x1b7b   :  { %v4287_v57 = vpop.f32.mrb[13].mxu0  ;;  %v1965_v58 = vsel %vm5814_vm3, %v1960_v11, -inf }
0x1b7c   :  { %1966 = vmax.xlane.f32.xlu0 %v1965_v58 }
0x1c09   :  { %v1967_v63 = vpop.xlane.xlu0 %1966 }
0x1c0a   :  { %v1968_v5 = vsub.f32 %v1960_v11, %v1967_v63 }
0x1c0c   :  { %v1969_v8 = vmul.f32 1.442695, %v1968_v5 }
0x1c0e   :  { %4537 = vpow2.f32 %v1969_v8 }
0x1c18   :  { %v4538_v9 = vpop.eup %4537 }
0x1c19   :  { %v1971_v12 = vsel %vm5814_vm3, %v4538_v9, 0.0 }
0x1c1a   :  { %1972 = vadd.xlane.f32.xlu1 %v1971_v12 }
0x1c4c   :  { %v4303_v15 = vpop.f32.mrb[14].mxu0 }
0x1c4d   :  { %v5272_v22 = vadd.f32 %v4575_v20, %v4303_v15  ;;  %v2134_v23 = vpop.f32.mrb[15].mxu0 }
0x1c4e   :  { %v5274_v13 = vadd.f32 %v4575_v20, %v2134_v23 }
0x1c4f   :  { %v2230_v24 = vmul.f32 %v5272_v22, %v5272_v22 }
0x1c50   :  { %v2229_v26 = vmul.f32 %v5274_v13, %v5274_v13 }
0x1c51   :  { %v2234_v25 = vsel %vm5840_vm5, %v2230_v24, 0.0  ;;  %vm5842_vm5 = vmmov %vm5841_vm9 }
0x1c52   :  { %2235 = vadd.xlane.f32.xlu1 %v2234_v25  ;;  %v2231_v28 = vsel %vm5841_vm9, %v2229_v26, 0.0  ;;  %vm5843_vm9 = vcmask 1045504  }
0x1c53   :  { %2232 = vadd.xlane.f32.xlu0 %v2231_v28 }
0x1ca7   :  { %v1973_v29 = vpop.xlane.xlu1 %1972 }
0x1ca8   :  { %4539 = vrcp.f32 %v1973_v29 }
0x1cb2   :  { %v4540_v7 = vpop.eup %4539 }
0x1cb3   :  { %v1975_v31 = vmul.f32 %v4540_v7, %v4538_v9 }
0x1cb5   :  { %4291 = vmatmul.mubr.msk.f32.vlgmr.msra.gmra.mrb[12].mxu1 %vm5813_vm10, %v1975_v31  ;;  %vm5845_vm10 = vcmp.eq.s32.totalorder %v4945_v50, %v4964_v3 }
0x1cb6   :  { %4458 = vmatpush3.bf16.xpose.msk.msra.mxu1 %vm4842_vm2, %v4866_v10  ;;  %4312 = vmatprep.mubr.msk.f32.mxu1 %vm5817_vm0, %v4725_v1 }
0x1cb7   :  { %4459 = vmatprep.subr.bf16.mxu1 %v4723_v0 }
0x1cbe   :  { %4462 = vmatpush3.bf16.xpose.msk.msra.mxu1 %vm4842_vm2, %v4897_v18 }
0x1cbf   :  { %4322 = vmatprep.subr.mxu1 %v4725_v1 }
0x1cc5   :  { %4313 = vmatmul.mubr.msk.f32.vlgmr.msra.gmra.mrb[14].mxu1 %vm5842_vm5, %v2144_v30 }
0x1cc6   :  { %4323 = vmatpush3.msk.msra.mxu1 %vm5843_vm9, %v4953_v53  ;;  %4324 = vmatprep.mubr.msk.f32.mxu1 %vm5817_vm0, %v4725_v1  ;;  %vm5844_vm9 = vmmov %vm5842_vm5 }
0x1cc7   :  { %4327 = vmatprep.subr.mxu1 %v4725_v1 }
0x1cdf   :  { %v2236_v10 = vpop.xlane.xlu1 %2235 }
0x1ce0   :  { %v2238_v32 = vadd.f32 1e-12, %v2236_v10  ;;  %v2233_v33 = vpop.xlane.xlu0 %2232 }
0x1ce1   :  { %v2237_v34 = vadd.f32 1e-12, %v2233_v33 }
0x1ce2   :  { %4541 = vrsqrt.f32 %v2238_v32 }
0x1ce3   :  { %4543 = vrsqrt.f32 %v2237_v34 }
0x1cec   :  { %v4542_v18 = vpop.eup %4541 }
0x1ced   :  { %v4544_v36 = vpop.eup %4543  ;;  %v2242_v37 = vmul.f32 %v4542_v18, %v5272_v22 }
0x1cee   :  { %v2241_v35 = vmul.f32 %v4544_v36, %v5274_v13 }
0x1cf0   :  { %v4464_v38 = vpack.c.bf16 %v2242_v37, %v2241_v35 }
0x1cf2   :  { %4466 = vmatpush3.bf16.xpose.msk.msra.mxu0 %vm4842_vm2, %v4464_v38 }
0x1cf3   :  { %4332 = vmatprep.subr.mxu0 %v4725_v1 }
0x1d88   :  { %v2050_v53 = vpop.f32.mrb[12].mxu1 }
0x1d89   :  { %2054 = vst.msk [vmem:[%s5794_s14] sm:$0x1f] %vm5815_vm7, %v2050_v53  ;;  %v4292_v39 = vpop.f32.mrb[13].mxu1 }
0x1d98   :  { %v2214_v40 = vpop.f32.mrb[14].mxu1 }
0x1d99   :  { %v2215_v42 = vadd.f32 %v4576_v41, %v2214_v40  ;;  %v4314_v43 = vpop.f32.mrb[15].mxu1 }
0x1d9b   :  { %v2222_v44 = vmul.f32 %v2215_v42, %v2215_v42  ;;  %v5328_v61 = vrot.slane %v2215_v42, 4 }
0x1d9d   :  { %v2223_v45 = vsel %vm5842_vm5, %v2222_v44, 0.0  ;;  %vm5846_vm5 = vcmask 48128  }
0x1d9e   :  { %2224 = vadd.xlane.f32.xlu0 %v2223_v45  ;;  %4325 = vmatmul.mubr.msk.f32.vlgmr.msra.gmra.mrb[16].mxu1 %vm5846_vm5, %v2333_v54  ;;  %vm5849_vm5 = vcmask 1043456  }
0x1d9f   :  { %4329 = vmatprep.mubr.msk.f32.mxu1 %vm5817_vm0, %v4725_v1  ;;  %v2221_v62 = vsel %vm5849_vm5, %v5272_v22, %v5328_v61  ;;  %vm5851_vm3 = vmmov %vm5849_vm5  ;;  %vm5853_vm5 = vcmask 64512  }
0x1da0   :  { %v5334_v8 = vpack.c.bf16 %v2221_v62, %v5274_v13  ;;  %vm5852_vm7 = vmmov %vm5851_vm3 }
0x1e2b   :  { %v2225_v46 = vpop.xlane.xlu0 %2224 }
0x1e2c   :  { %v2226_v47 = vadd.f32 1e-12, %v2225_v46 }
0x1e2e   :  { %4545 = vrsqrt.f32 %v2226_v47 }
0x1e38   :  { %v4546_v48 = vpop.eup %4545 }
0x1e39   :  { %v2228_v52 = vmul.f32 %v4546_v48, %v2215_v42 }
0x1e3b   :  { %4320 = vmatmul.mubr.msk.f32.vlgmr.msra.gmra.mrb[16].mxu0 %vm5844_vm9, %v2228_v52  ;;  %vm5847_vm9 = vcmask 97280  }
0x1e3c   :  { %4333 = vmatpush3.msk.msra.mxu0 %vm5845_vm10, %v4726_v4  ;;  %4334 = vmatprep.mubr.msk.f32.mxu0 %vm5817_vm0, %v4725_v1  ;;  %vm5848_vm10 = vmmov %vm5847_vm9 }
0x1e3d   :  { %4467 = vmatprep.subr.bf16.mxu0 %v4723_v0 }
0x1e71   :  { %v2403_v58 = vpop.f32.mrb[16].mxu1 }
0x1e72   :  { %v4326_v59 = vpop.f32.mrb[17].mxu1 }
0x1f0e   :  { %v2318_v27 = vpop.f32.mrb[16].mxu0 }
0x1f0f   :  { %v4321_v55 = vpop.f32.mrb[17].mxu0  ;;  %v2322_v56 = vsel %vm5847_vm9, %v2318_v27, -inf }
0x1f10   :  { %2323 = vmax.xlane.f32.xlu1 %v2322_v56 }
0x1f9d   :  { %v2324_v3 = vpop.xlane.xlu1 %2323 }
0x1f9e   :  { %v2325_v4 = vsub.f32 %v2318_v27, %v2324_v3 }
0x1fa0   :  { %v2326_v6 = vmul.f32 1.442695, %v2325_v4 }
0x1fa2   :  { %4547 = vpow2.f32 %v2326_v6 }
0x1fac   :  { %v4548_v11 = vpop.eup %4547 }
0x1fad   :  { %v2328_v57 = vsel %vm5848_vm10, %v4548_v11, 0.0  ;;  %vm5850_vm10 = vmmov %vm5847_vm9 }
0x1fae   :  { %2329 = vadd.xlane.f32.xlu0 %v2328_v57 }
0x203b   :  { %v2330_v60 = vpop.xlane.xlu0 %2329 }
0x203c   :  { %4549 = vrcp.f32 %v2330_v60 }
0x2046   :  { %v4550_v63 = vpop.eup %4549 }
0x2047   :  { %v2332_v5 = vmul.f32 %v4550_v63, %v4548_v11 }
0x2049   :  { %4328 = vmatpush3.xpose.msk.msra.mxu1 %vm5847_vm9, %v2332_v5  ;;  %vm5854_vm9 = vcmask 57344  }
0x204a   :  { %4472 = vmatprep.subr.bf16.mxu1 %v5334_v8 }
0x204c   :  { %4330 = vmatmul.mubr.msk.f32.vlgmr.msra.gmra.mrb[18].mxu1 %vm5850_vm10, %v2403_v58 }
0x204d   :  { %4474 = vmatpush3.bf16.msra.mxu1 %v5334_v8 }
0x204e   :  { %4348 = vmatprep.subr.msk.mxu1 %vm5851_vm3, %v5328_v61  ;;  %vm5855_vm3 = vmmov %vm5850_vm10 }
0x2051   :  { %4349 = vmatpush3.msk.msra.mxu1 %vm5852_vm7, %v5328_v61 }
0x2052   :  { %4475 = vmatprep.subr.bf16.mxu1 %v4723_v0 }
0x211f   :  { %v5345_v9 = vpop.f32.mrb[18].mxu1 }
0x2120   :  { %v4331_v12 = vpop.f32.mrb[19].mxu1  ;;  %4335 = vmatmul.mubr.msk.f32.vlgmr.msra.gmra.mrb[18].mxu0 %vm5853_vm5, %v5345_v9  ;;  %2483 = vst.msk [vmem:[#allocation7 + $0x1] sm:$0x1] %vm5854_vm9, %v5345_v9 }
0x2121   :  { %4470 = vmatpush3.bf16.msk.msra.mxu0 %vm5003_vm14, %v5000_v16  ;;  %4341 = vmatprep.mubr.msk.f32.mxu0 %vm5817_vm0, %v4725_v1 }
0x2122   :  { %4362 = vmatprep.subr.mxu0 %v4725_v1 }
0x2128   :  { %4342 = vmatmul.mubr.msk.f32.vlgmr.msra.gmra.mrb[18].mxu0 %vm5855_vm3, %v2403_v58 }
0x2129   :  { %4364 = vmatprep.mubr.msk.f32.mxu0 %vm5817_vm0, %v4725_v1 }
0x21fb   :  { %v5360_v0 = vpop.f32.mrb[18].mxu0 }
0x21fc   :  { %v4343_v15 = vpop.f32.mrb[19].mxu0  ;;  %v2757_v20 = vsel %vm852_vm15, %v5360_v0, inf }
0x21fd   :  { %2758 = vmin.xlane.f32.xlu1 %v2757_v20 }
0x228a   :  { %v2759_v22 = vpop.xlane.xlu1 %2758 }
0x228b   :  { %vm2760_vm14 = vcmp.eq.f32.partialorder %v5360_v0, %v2759_v22 }
0x228c   :  { %v2761_v16 = vsel %vm2760_vm14, %v4945_v50, 20 }
0x228d   :  { %v2762_v17 = vsel %vm852_vm15, %v2761_v16, 2147483647 }
0x228e   :  { %v2764_v23 = vshra.s32 %v2762_v17, 16  ;;  %v2763_v24 = vand.u32 65535, %v2762_v17 }
0x2290   :  { %v2766_v13 = vcvt.s32.f32 %v2764_v23  ;;  %v2765_v25 = vcvt.s32.f32 %v2763_v24 }
0x2292   :  { %2767 = vmin.xlane.f32.xlu0 %v2766_v13 }
0x231f   :  { %v2768_v26 = vpop.xlane.xlu0 %2767 }
0x2320   :  { %vm2769_vm7 = vcmp.eq.f32.partialorder %v2766_v13, %v2768_v26  ;;  %v2774_v29 = vcvt.f32.s32 %v2768_v26 }
0x2321   :  { %v2770_v28 = vsel %vm2769_vm7, %v2765_v25, inf }
0x2322   :  { %2771 = vmin.xlane.f32.xlu1 %v2770_v28  ;;  %v2775_v31 = vshll.u32 %v2774_v29, 16 }
0x23af   :  { %v2772_v7 = vpop.xlane.xlu1 %2771 }
0x23b0   :  { %v2773_v30 = vcvt.f32.s32 %v2772_v7 }
0x23b2   :  { %v2776_v10 = vadd.s32 %v2775_v31, %v2773_v30 }
0x23b4   :  { %vm2788_vm10 = vcmp.eq.s32.totalorder %v4945_v50, %v2776_v10  ;;  %v2780_v42 = vrot.slane %v2776_v10, %v5035_v51 }
0x23b5   :  { %v2789_v32 = vsel %vm2788_vm10, inf, %v5360_v0 }
0x23b6   :  { %v2790_v33 = vsel %vm852_vm15, %v2789_v32, inf  ;;  %vm2781_vm3 = vcmp.eq.s32.totalorder %v4945_v50, %v2780_v42 }
0x23b7   :  { %2791 = vmin.xlane.f32.xlu0 %v2790_v33  ;;  %vm2782_vm7 = vmand %vm873_vm11, %vm2781_vm3 }
0x23b8   :  { %v2784_v54 = vsel %vm2782_vm7, 1.0, %v4725_v1 }
0x2444   :  { %v2792_v34 = vpop.xlane.xlu0 %2791 }
0x2445   :  { %vm2793_vm5 = vcmp.eq.f32.partialorder %v2789_v32, %v2792_v34 }
0x2446   :  { %v2794_v18 = vsel %vm2793_vm5, %v4945_v50, 20 }
0x2447   :  { %v2795_v36 = vsel %vm852_vm15, %v2794_v18, 2147483647 }
0x2448   :  { %v2797_v37 = vshra.s32 %v2795_v36, 16  ;;  %v2796_v38 = vand.u32 65535, %v2795_v36 }
0x244a   :  { %v2799_v35 = vcvt.s32.f32 %v2797_v37  ;;  %v2798_v39 = vcvt.s32.f32 %v2796_v38 }
0x244c   :  { %2800 = vmin.xlane.f32.xlu1 %v2799_v35 }
0x24d9   :  { %v2801_v53 = vpop.xlane.xlu1 %2800 }
0x24da   :  { %vm2802_vm9 = vcmp.eq.f32.partialorder %v2799_v35, %v2801_v53  ;;  %v2807_v41 = vcvt.f32.s32 %v2801_v53 }
0x24db   :  { %v2803_v40 = vsel %vm2802_vm9, %v2798_v39, inf }
0x24dc   :  { %2804 = vmin.xlane.f32.xlu0 %v2803_v40  ;;  %v2808_v44 = vshll.u32 %v2807_v41, 16 }
0x2569   :  { %v2805_v43 = vpop.xlane.xlu0 %2804 }
0x256a   :  { %v2806_v45 = vcvt.f32.s32 %v2805_v43 }
0x256c   :  { %v2809_v46 = vadd.s32 %v2808_v44, %v2806_v45 }
0x256e   :  { %v2813_v47 = vrot.slane %v2809_v46, %v5035_v51  ;;  %vm2821_vm14 = vcmp.eq.s32.totalorder %v4945_v50, %v2809_v46 }
0x256f   :  { %v2822_v48 = vsel %vm2821_vm14, inf, %v2789_v32 }
0x2570   :  { %vm2814_vm10 = vcmp.eq.s32.totalorder %v4945_v50, %v2813_v47  ;;  %v2823_v52 = vsel %vm852_vm15, %v2822_v48, inf }
0x2571   :  { %vm2815_vm5 = vmand %vm908_vm13, %vm2814_vm10  ;;  %2824 = vmin.xlane.f32.xlu1 %v2823_v52  ;;  %vm5856_vm10 = vcmp.eq.s32.totalorder %v4943_v49, 2 }
0x2572   :  { %v2817_v27 = vsel %vm2815_vm5, 1.0, %v4725_v1 }
0x2573   :  { %v2819_v55 = vadd.f32 %v2817_v27, %v2784_v54 }
0x25fe   :  { %v2825_v56 = vpop.xlane.xlu1 %2824 }
0x25ff   :  { %vm2826_vm9 = vcmp.eq.f32.partialorder %v2822_v48, %v2825_v56 }
0x2600   :  { %v2827_v3 = vsel %vm2826_vm9, %v4945_v50, 20 }
0x2601   :  { %v2828_v4 = vsel %vm852_vm15, %v2827_v3, 2147483647 }
0x2602   :  { %v2830_v6 = vshra.s32 %v2828_v4, 16  ;;  %v2829_v57 = vand.u32 65535, %v2828_v4 }
0x2604   :  { %v2832_v11 = vcvt.s32.f32 %v2830_v6  ;;  %v2831_v59 = vcvt.s32.f32 %v2829_v57 }
0x2606   :  { %2833 = vmin.xlane.f32.xlu0 %v2832_v11 }
0x2693   :  { %v2834_v58 = vpop.xlane.xlu0 %2833 }
0x2694   :  { %vm2835_vm3 = vcmp.eq.f32.partialorder %v2832_v11, %v2834_v58  ;;  %v2840_v62 = vcvt.f32.s32 %v2834_v58 }
0x2695   :  { %v2836_v60 = vsel %vm2835_vm3, %v2831_v59, inf }
0x2696   :  { %2837 = vmin.xlane.f32.xlu1 %v2836_v60  ;;  %v2841_v5 = vshll.u32 %v2840_v62, 16 }
0x2723   :  { %v2838_v63 = vpop.xlane.xlu1 %2837 }
0x2724   :  { %v2839_v12 = vcvt.f32.s32 %v2838_v63 }
0x2726   :  { %v2842_v15 = vadd.s32 %v2841_v5, %v2839_v12 }
0x2728   :  { %v2846_v20 = vrot.slane %v2842_v15, %v5035_v51  ;;  %vm2854_vm14 = vcmp.eq.s32.totalorder %v4945_v50, %v2842_v15 }
0x2729   :  { %v2855_v22 = vsel %vm2854_vm14, inf, %v2822_v48 }
0x272a   :  { %vm2847_vm7 = vcmp.eq.s32.totalorder %v4945_v50, %v2846_v20  ;;  %v2856_v16 = vsel %vm852_vm15, %v2855_v22, inf  ;;  %v3085_v20 = vsel %vm852_vm15, %v5360_v0, -inf }
0x272b   :  { %vm2848_vm5 = vmand %vm5856_vm10, %vm2847_vm7  ;;  %2857 = vmin.xlane.f32.xlu0 %v2856_v16 }
0x272c   :  { %v2850_v17 = vsel %vm2848_vm5, 1.0, %v4725_v1 }
0x272d   :  { %v2852_v23 = vadd.f32 %v2850_v17, %v2819_v55 }
0x27b8   :  { %v2858_v13 = vpop.xlane.xlu0 %2857 }
0x27b9   :  { %vm2859_vm9 = vcmp.eq.f32.partialorder %v2855_v22, %v2858_v13 }
0x27ba   :  { %v2860_v24 = vsel %vm2859_vm9, %v4945_v50, 20 }
0x27bb   :  { %v2861_v26 = vsel %vm852_vm15, %v2860_v24, 2147483647 }
0x27bc   :  { %v2863_v25 = vshra.s32 %v2861_v26, 16  ;;  %v2862_v29 = vand.u32 65535, %v2861_v26 }
0x27be   :  { %v2865_v28 = vcvt.s32.f32 %v2863_v25  ;;  %v2864_v31 = vcvt.s32.f32 %v2862_v29 }
0x27c0   :  { %2866 = vmin.xlane.f32.xlu1 %v2865_v28 }
0x284d   :  { %v2867_v7 = vpop.xlane.xlu1 %2866 }
0x284e   :  { %vm2868_vm3 = vcmp.eq.f32.partialorder %v2865_v28, %v2867_v7  ;;  %v2873_v10 = vcvt.f32.s32 %v2867_v7 }
0x284f   :  { %v2869_v30 = vsel %vm2868_vm3, %v2864_v31, inf }
0x2850   :  { %2870 = vmin.xlane.f32.xlu0 %v2869_v30  ;;  %v2874_v33 = vshll.u32 %v2873_v10, 16 }
0x28dd   :  { %v2871_v32 = vpop.xlane.xlu0 %2870 }
0x28de   :  { %v2872_v34 = vcvt.f32.s32 %v2871_v32 }
0x28e0   :  { %v2875_v18 = vadd.s32 %v2874_v33, %v2872_v34 }
0x28e2   :  { %v2879_v36 = vrot.slane %v2875_v18, %v5035_v51  ;;  %vm2887_vm14 = vcmp.eq.s32.totalorder %v4945_v50, %v2875_v18 }
0x28e3   :  { %v2888_v37 = vsel %vm2887_vm14, inf, %v2855_v22 }
0x28e4   :  { %vm2880_vm7 = vcmp.eq.s32.totalorder %v4945_v50, %v2879_v36  ;;  %v2889_v35 = vsel %vm852_vm15, %v2888_v37, inf }
0x28e5   :  { %vm2881_vm10 = vmand %vm978_vm4, %vm2880_vm7  ;;  %2890 = vmin.xlane.f32.xlu1 %v2889_v35  ;;  %vm5857_vm7 = vcmp.eq.s32.totalorder %v4943_v49, 4 }
0x28e6   :  { %v2883_v38 = vsel %vm2881_vm10, 1.0, %v4725_v1 }
0x28e7   :  { %v2885_v53 = vadd.f32 %v2883_v38, %v2852_v23 }
0x2972   :  { %v2891_v39 = vpop.xlane.xlu1 %2890 }
0x2973   :  { %vm2892_vm5 = vcmp.eq.f32.partialorder %v2888_v37, %v2891_v39 }
0x2974   :  { %v2893_v40 = vsel %vm2892_vm5, %v4945_v50, 20 }
0x2975   :  { %v2894_v41 = vsel %vm852_vm15, %v2893_v40, 2147483647 }
0x2976   :  { %v2896_v42 = vshra.s32 %v2894_v41, 16  ;;  %v2895_v44 = vand.u32 65535, %v2894_v41 }
0x2978   :  { %v2898_v43 = vcvt.s32.f32 %v2896_v42  ;;  %v2897_v46 = vcvt.s32.f32 %v2895_v44 }
0x297a   :  { %2899 = vmin.xlane.f32.xlu0 %v2898_v43 }
0x2a07   :  { %v2900_v45 = vpop.xlane.xlu0 %2899 }
0x2a08   :  { %vm2901_vm9 = vcmp.eq.f32.partialorder %v2898_v43, %v2900_v45  ;;  %v2906_v48 = vcvt.f32.s32 %v2900_v45 }
0x2a09   :  { %v2902_v47 = vsel %vm2901_vm9, %v2897_v46, inf }
0x2a0a   :  { %2903 = vmin.xlane.f32.xlu1 %v2902_v47  ;;  %v2907_v54 = vshll.u32 %v2906_v48, 16 }
0x2a97   :  { %v2904_v52 = vpop.xlane.xlu1 %2903 }
0x2a98   :  { %v2905_v27 = vcvt.f32.s32 %v2904_v52 }
0x2a9a   :  { %v2908_v55 = vadd.s32 %v2907_v54, %v2905_v27 }
0x2a9c   :  { %v2912_v56 = vrot.slane %v2908_v55, %v5035_v51  ;;  %vm2920_vm3 = vcmp.eq.s32.totalorder %v4945_v50, %v2908_v55 }
0x2a9d   :  { %v2921_v3 = vsel %vm2920_vm3, inf, %v2888_v37 }
0x2a9e   :  { %vm2913_vm14 = vcmp.eq.s32.totalorder %v4945_v50, %v2912_v56  ;;  %v2922_v4 = vsel %vm852_vm15, %v2921_v3, inf }
0x2a9f   :  { %vm2914_vm10 = vmand %vm5857_vm7, %vm2913_vm14  ;;  %2923 = vmin.xlane.f32.xlu0 %v2922_v4  ;;  %vm5858_vm7 = vcmp.eq.s32.totalorder %v4943_v49, 5 }
0x2aa0   :  { %v2916_v6 = vsel %vm2914_vm10, 1.0, %v4725_v1 }
0x2aa1   :  { %v2918_v11 = vadd.f32 %v2916_v6, %v2885_v53 }
0x2b2c   :  { %v2924_v57 = vpop.xlane.xlu0 %2923 }
0x2b2d   :  { %vm2925_vm5 = vcmp.eq.f32.partialorder %v2921_v3, %v2924_v57 }
0x2b2e   :  { %v2926_v58 = vsel %vm2925_vm5, %v4945_v50, 20 }
0x2b2f   :  { %v2927_v59 = vsel %vm852_vm15, %v2926_v58, 2147483647 }
0x2b30   :  { %v2929_v60 = vshra.s32 %v2927_v59, 16  ;;  %v2928_v63 = vand.u32 65535, %v2927_v59 }
0x2b32   :  { %v2931_v62 = vcvt.s32.f32 %v2929_v60  ;;  %v2930_v12 = vcvt.s32.f32 %v2928_v63 }
0x2b34   :  { %2932 = vmin.xlane.f32.xlu1 %v2931_v62 }
0x2bc1   :  { %v2933_v5 = vpop.xlane.xlu1 %2932 }
0x2bc2   :  { %vm2934_vm9 = vcmp.eq.f32.partialorder %v2931_v62, %v2933_v5  ;;  %v2939_v22 = vcvt.f32.s32 %v2933_v5 }
0x2bc3   :  { %v2935_v15 = vsel %vm2934_vm9, %v2930_v12, inf }
0x2bc4   :  { %2936 = vmin.xlane.f32.xlu0 %v2935_v15  ;;  %v2940_v17 = vshll.u32 %v2939_v22, 16 }
0x2bc8   :  { %3086 = vmax.xlane.f32.xlu0 %v3085_v20 }
0x2c51   :  { %v2937_v16 = vpop.xlane.xlu0 %2936 }
0x2c52   :  { %v2938_v23 = vcvt.f32.s32 %v2937_v16 }
0x2c54   :  { %v2941_v13 = vadd.s32 %v2940_v17, %v2938_v23 }
0x2c55   :  { %v3087_v7 = vpop.xlane.xlu0 %3086 }
0x2c56   :  { %v2945_v24 = vrot.slane %v2941_v13, %v5035_v51  ;;  %vm2953_vm3 = vcmp.eq.s32.totalorder %v4945_v50, %v2941_v13  ;;  %vm3088_vm5 = vcmp.eq.f32.partialorder %v5360_v0, %v3087_v7 }
0x2c57   :  { %v2954_v26 = vsel %vm2953_vm3, inf, %v2921_v3  ;;  %v3089_v31 = vsel %vm3088_vm5, %v4945_v50, 20  ;;  %vm5859_vm5 = vcmp.eq.s32.totalorder %v4943_v49, 6 }
0x2c58   :  { %vm2946_vm14 = vcmp.eq.s32.totalorder %v4945_v50, %v2945_v24  ;;  %v2955_v25 = vsel %vm852_vm15, %v2954_v26, inf  ;;  %v3090_v32 = vsel %vm852_vm15, %v3089_v31, 2147483647 }
0x2c59   :  { %vm2947_vm10 = vmand %vm5858_vm7, %vm2946_vm14  ;;  %2956 = vmin.xlane.f32.xlu1 %v2955_v25  ;;  %v3092_v36 = vshra.s32 %v3090_v32, 16  ;;  %v3091_v39 = vand.u32 65535, %v3090_v32 }
0x2c5a   :  { %v2949_v28 = vsel %vm2947_vm10, 1.0, %v4725_v1 }
0x2c5b   :  { %v2951_v29 = vadd.f32 %v2949_v28, %v2918_v11  ;;  %v3094_v37 = vcvt.s32.f32 %v3092_v36  ;;  %v3093_v42 = vcvt.s32.f32 %v3091_v39 }
0x2ce6   :  { %v2957_v30 = vpop.xlane.xlu1 %2956 }
0x2ce7   :  { %vm2958_vm9 = vcmp.eq.f32.partialorder %v2954_v26, %v2957_v30 }
0x2ce8   :  { %v2959_v10 = vsel %vm2958_vm9, %v4945_v50, 20 }
0x2ce9   :  { %v2960_v33 = vsel %vm852_vm15, %v2959_v10, 2147483647 }
0x2cea   :  { %v2962_v34 = vshra.s32 %v2960_v33, 16  ;;  %v2961_v35 = vand.u32 65535, %v2960_v33 }
0x2cec   :  { %v2964_v18 = vcvt.s32.f32 %v2962_v34  ;;  %v2963_v53 = vcvt.s32.f32 %v2961_v35 }
0x2cee   :  { %2965 = vmin.xlane.f32.xlu1 %v2964_v18 }
0x2cf2   :  { %3095 = vmin.xlane.f32.xlu1 %v3094_v37 }
0x2d7b   :  { %v2966_v38 = vpop.xlane.xlu1 %2965 }
0x2d7c   :  { %vm2967_vm3 = vcmp.eq.f32.partialorder %v2964_v18, %v2966_v38  ;;  %v2972_v44 = vcvt.f32.s32 %v2966_v38 }
0x2d7d   :  { %v2968_v40 = vsel %vm2967_vm3, %v2963_v53, inf }
0x2d7e   :  { %2969 = vmin.xlane.f32.xlu0 %v2968_v40  ;;  %v2973_v46 = vshll.u32 %v2972_v44, 16 }
0x2d7f   :  { %v3096_v41 = vpop.xlane.xlu1 %3095 }
0x2d80   :  { %vm3097_vm14 = vcmp.eq.f32.partialorder %v3094_v37, %v3096_v41  ;;  %v3102_v47 = vcvt.f32.s32 %v3096_v41 }
0x2d81   :  { %v3098_v43 = vsel %vm3097_vm14, %v3093_v42, inf }
0x2d82   :  { %3099 = vmin.xlane.f32.xlu0 %v3098_v43  ;;  %v3103_v27 = vshll.u32 %v3102_v47, 16 }
0x2e0b   :  { %v2970_v45 = vpop.xlane.xlu0 %2969 }
0x2e0c   :  { %v2971_v48 = vcvt.f32.s32 %v2970_v45 }
0x2e0e   :  { %v2974_v52 = vadd.s32 %v2973_v46, %v2971_v48 }
0x2e0f   :  { %v3100_v54 = vpop.xlane.xlu0 %3099 }
0x2e10   :  { %v2978_v55 = vrot.slane %v2974_v52, %v5035_v51  ;;  %v3101_v56 = vcvt.f32.s32 %v3100_v54  ;;  %vm2986_vm7 = vcmp.eq.s32.totalorder %v4945_v50, %v2974_v52 }
0x2e11   :  { %v2987_v3 = vsel %vm2986_vm7, inf, %v2954_v26 }
0x2e12   :  { %vm2979_vm10 = vcmp.eq.s32.totalorder %v4945_v50, %v2978_v55  ;;  %v3104_v4 = vadd.s32 %v3103_v27, %v3101_v56  ;;  %v2988_v6 = vsel %vm852_vm15, %v2987_v3, inf }
0x2e13   :  { %vm2980_vm9 = vmand %vm5859_vm5, %vm2979_vm10  ;;  %2989 = vmin.xlane.f32.xlu1 %v2988_v6 }
0x2e14   :  { %v2982_v11 = vsel %vm2980_vm9, 1.0, %v4725_v1  ;;  %vm3113_vm3 = vcmp.eq.s32.totalorder %v4945_v50, %v3104_v4  ;;  %v3108_v33 = vrot.slane %v3104_v4, %v5035_v51 }
0x2e15   :  { %v3114_v57 = vsel %vm3113_vm3, -inf, %v5360_v0  ;;  %v2984_v58 = vadd.f32 %v2982_v11, %v2951_v29 }
0x2e16   :  { %v3115_v59 = vsel %vm852_vm15, %v3114_v57, -inf  ;;  %vm3109_vm3 = vcmp.eq.s32.totalorder %v4945_v50, %v3108_v33 }
0x2e17   :  { %3116 = vmax.xlane.f32.xlu0 %v3115_v59 }
0x2ea0   :  { %v2990_v60 = vpop.xlane.xlu1 %2989 }
0x2ea1   :  { %vm2991_vm14 = vcmp.eq.f32.partialorder %v2987_v3, %v2990_v60 }
0x2ea2   :  { %v2992_v62 = vsel %vm2991_vm14, %v4945_v50, 20 }
0x2ea3   :  { %v2993_v63 = vsel %vm852_vm15, %v2992_v62, 2147483647 }
0x2ea4   :  { %v3117_v5 = vpop.xlane.xlu0 %3116  ;;  %v2995_v12 = vshra.s32 %v2993_v63, 16  ;;  %v2994_v17 = vand.u32 65535, %v2993_v63 }
0x2ea5   :  { %vm3118_vm7 = vcmp.eq.f32.partialorder %v3114_v57, %v3117_v5 }
0x2ea6   :  { %v3119_v15 = vsel %vm3118_vm7, %v4945_v50, 20  ;;  %v2997_v20 = vcvt.s32.f32 %v2995_v12  ;;  %v2996_v13 = vcvt.s32.f32 %v2994_v17  ;;  %vm5860_vm7 = vcmp.eq.s32.totalorder %v4943_v49, 7 }
0x2ea7   :  { %v3120_v22 = vsel %vm852_vm15, %v3119_v15, 2147483647 }
0x2ea8   :  { %2998 = vmin.xlane.f32.xlu1 %v2997_v20  ;;  %v3122_v0 = vshra.s32 %v3120_v22, 16  ;;  %v3121_v24 = vand.u32 65535, %v3120_v22 }
0x2eaa   :  { %v3124_v16 = vcvt.s32.f32 %v3122_v0  ;;  %v3123_v28 = vcvt.s32.f32 %v3121_v24 }
0x2eac   :  { %3125 = vmin.xlane.f32.xlu1 %v3124_v16 }
0x2f35   :  { %v2999_v23 = vpop.xlane.xlu1 %2998 }
0x2f36   :  { %vm3000_vm10 = vcmp.eq.f32.partialorder %v2997_v20, %v2999_v23  ;;  %v3005_v7 = vcvt.f32.s32 %v2999_v23 }
0x2f37   :  { %v3001_v26 = vsel %vm3000_vm10, %v2996_v13, inf }
0x2f38   :  { %3002 = vmin.xlane.f32.xlu0 %v3001_v26  ;;  %v3006_v30 = vshll.u32 %v3005_v7, 16 }
0x2f39   :  { %v3126_v25 = vpop.xlane.xlu1 %3125 }
0x2f3a   :  { %vm3127_vm5 = vcmp.eq.f32.partialorder %v3124_v16, %v3126_v25  ;;  %v3132_v10 = vcvt.f32.s32 %v3126_v25 }
0x2f3b   :  { %v3128_v29 = vsel %vm3127_vm5, %v3123_v28, inf }
0x2f3c   :  { %3129 = vmin.xlane.f32.xlu0 %v3128_v29  ;;  %v3133_v36 = vshll.u32 %v3132_v10, 16 }
0x2fc5   :  { %v3003_v31 = vpop.xlane.xlu0 %3002 }
0x2fc6   :  { %v3004_v32 = vcvt.f32.s32 %v3003_v31 }
0x2fc8   :  { %v3007_v34 = vadd.s32 %v3006_v30, %v3004_v32 }
0x2fc9   :  { %v3130_v18 = vpop.xlane.xlu0 %3129 }
0x2fca   :  { %v3011_v37 = vrot.slane %v3007_v34, %v5035_v51  ;;  %v3131_v35 = vcvt.f32.s32 %v3130_v18  ;;  %vm3019_vm9 = vcmp.eq.s32.totalorder %v4945_v50, %v3007_v34 }
0x2fcb   :  { %v3020_v38 = vsel %vm3019_vm9, inf, %v2987_v3  ;;  %vm3110_vm9 = vmand %vm873_vm11, %vm3109_vm3 }
0x2fcc   :  { %vm3012_vm14 = vcmp.eq.s32.totalorder %v4945_v50, %v3011_v37  ;;  %v3134_v53 = vadd.s32 %v3133_v36, %v3131_v35  ;;  %v3021_v39 = vsel %vm852_vm15, %v3020_v38, inf  ;;  %v3111_v45 = vsel %vm3110_vm9, 1.0, %v4725_v1 }
0x2fcd   :  { %vm3013_vm10 = vmand %vm5860_vm7, %vm3012_vm14  ;;  %3022 = vmin.xlane.f32.xlu1 %v3021_v39 }
0x2fce   :  { %v3138_v40 = vrot.slane %v3134_v53, %v5035_v51  ;;  %vm3143_vm5 = vcmp.eq.s32.totalorder %v4945_v50, %v3134_v53  ;;  %v3015_v41 = vsel %vm3013_vm10, 1.0, %v4725_v1  ;;  %vm5861_vm10 = vcmp.eq.s32.totalorder %v4943_v49, 2 }
0x2fcf   :  { %v3144_v42 = vsel %vm3143_vm5, -inf, %v3114_v57  ;;  %v3017_v43 = vadd.f32 %v3015_v41, %v2984_v58 }
0x2fd0   :  { %vm3139_vm6 = vcmp.eq.s32.totalorder %v4945_v50, %v3138_v40  ;;  %v3145_v44 = vsel %vm852_vm15, %v3144_v42, -inf }
0x2fd1   :  { %vm3140_vm0 = vmand %vm908_vm13, %vm3139_vm6  ;;  %3146 = vmax.xlane.f32.xlu0 %v3145_v44  ;;  %4350 = vmatprep.mubr.msk.f32.mxu1 %vm1353_vm1, %v3017_v43 }
0x2fd2   :  { %v3141_v46 = vsel %vm3140_vm0, 1.0, %v4725_v1 }
0x2fd3   :  { %v3142_v47 = vadd.f32 %v3141_v46, %v3111_v45 }
0x305a   :  { %v3023_v48 = vpop.xlane.xlu1 %3022 }
0x305b   :  { %vm3024_vm14 = vcmp.eq.f32.partialorder %v3020_v38, %v3023_v48 }
0x305c   :  { %v3025_v52 = vsel %vm3024_vm14, %v4945_v50, 20 }
0x305d   :  { %v3026_v54 = vsel %vm852_vm15, %v3025_v52, 2147483647 }
0x305e   :  { %v3028_v27 = vshra.s32 %v3026_v54, 16  ;;  %v3147_v55 = vpop.xlane.xlu0 %3146  ;;  %v3027_v57 = vand.u32 65535, %v3026_v54 }
0x305f   :  { %vm3148_vm11 = vcmp.eq.f32.partialorder %v3144_v42, %v3147_v55 }
0x3060   :  { %v3149_v56 = vsel %vm3148_vm11, %v4945_v50, 20  ;;  %v3030_v3 = vcvt.s32.f32 %v3028_v27  ;;  %v3029_v60 = vcvt.s32.f32 %v3027_v57 }
0x3061   :  { %v3150_v4 = vsel %vm852_vm15, %v3149_v56, 2147483647 }
0x3062   :  { %v3152_v6 = vshra.s32 %v3150_v4, 16  ;;  %3031 = vmin.xlane.f32.xlu1 %v3030_v3  ;;  %v3151_v58 = vand.u32 65535, %v3150_v4 }
0x3064   :  { %v3154_v11 = vcvt.s32.f32 %v3152_v6  ;;  %v3153_v5 = vcvt.s32.f32 %v3151_v58 }
0x3066   :  { %3155 = vmin.xlane.f32.xlu1 %v3154_v11 }
0x30ef   :  { %v3032_v59 = vpop.xlane.xlu1 %3031 }
0x30f0   :  { %vm3033_vm0 = vcmp.eq.f32.partialorder %v3030_v3, %v3032_v59  ;;  %v3038_v15 = vcvt.f32.s32 %v3032_v59 }
0x30f1   :  { %v3034_v62 = vsel %vm3033_vm0, %v3029_v60, inf }
0x30f2   :  { %3035 = vmin.xlane.f32.xlu0 %v3034_v62  ;;  %v3039_v22 = vshll.u32 %v3038_v15, 16 }
0x30f3   :  { %v3156_v63 = vpop.xlane.xlu1 %3155 }
0x30f4   :  { %vm3157_vm13 = vcmp.eq.f32.partialorder %v3154_v11, %v3156_v63  ;;  %v3162_v0 = vcvt.f32.s32 %v3156_v63 }
0x30f5   :  { %v3158_v12 = vsel %vm3157_vm13, %v3153_v5, inf }
0x30f6   :  { %3159 = vmin.xlane.f32.xlu0 %v3158_v12  ;;  %v3163_v13 = vshll.u32 %v3162_v0, 16 }
0x317f   :  { %v3036_v20 = vpop.xlane.xlu0 %3035 }
0x3180   :  { %v3037_v16 = vcvt.f32.s32 %v3036_v20 }
0x3182   :  { %v3040_v17 = vadd.s32 %v3039_v22, %v3037_v16 }
0x3183   :  { %v3160_v23 = vpop.xlane.xlu0 %3159 }
0x3184   :  { %v3161_v24 = vcvt.f32.s32 %v3160_v23  ;;  %vm3052_vm6 = vcmp.eq.s32.totalorder %v4945_v50, %v3040_v17  ;;  %v3044_v52 = vrot.slane %v3040_v17, %v5035_v51 }
0x3185   :  { %v3053_v26 = vsel %vm3052_vm6, inf, %v3020_v38 }
0x3186   :  { %v3164_v25 = vadd.s32 %v3163_v13, %v3161_v24  ;;  %v3054_v28 = vsel %vm852_vm15, %v3053_v26, inf  ;;  %vm3045_vm13 = vcmp.eq.s32.totalorder %v4945_v50, %v3044_v52 }
0x3187   :  { %3055 = vmin.xlane.f32.xlu1 %v3054_v28  ;;  %vm3047_vm6 = vmand %vm1154_vm8, %vm3045_vm13  ;;  %vm5866_vm13 = vcmask 261120  }
0x3188   :  { %v3168_v29 = vrot.slane %v3164_v25, %v5035_v51  ;;  %vm3173_vm3 = vcmp.eq.s32.totalorder %v4945_v50, %v3164_v25  ;;  %v3049_v59 = vsel %vm3047_vm6, 1.0, %v4725_v1  ;;  %vm5867_vm6 = vmmov %vm5866_vm13 }
0x3189   :  { %v3174_v7 = vsel %vm3173_vm3, -inf, %v3144_v42 }
0x318a   :  { %vm3169_vm7 = vcmp.eq.s32.totalorder %v4945_v50, %v3168_v29  ;;  %v3175_v31 = vsel %vm852_vm15, %v3174_v7, -inf }
0x318b   :  { %vm3170_vm5 = vmand %vm5861_vm10, %vm3169_vm7  ;;  %3176 = vmax.xlane.f32.xlu0 %v3175_v31  ;;  %vm5862_vm7 = vcmp.eq.s32.totalorder %v4992_v14, 9 }
0x318c   :  { %v3171_v30 = vsel %vm3170_vm5, 1.0, %v4725_v1 }
0x318d   :  { %v3172_v10 = vadd.f32 %v3171_v30, %v3142_v47 }
0x3214   :  { %v3056_v32 = vpop.xlane.xlu1 %3055 }
0x3215   :  { %vm3057_vm9 = vcmp.eq.f32.partialorder %v3053_v26, %v3056_v32 }
0x3216   :  { %v3058_v33 = vsel %vm3057_vm9, %v4945_v50, 20 }
0x3217   :  { %v3059_v34 = vsel %vm852_vm15, %v3058_v33, 2147483647 }
0x3218   :  { %v3061_v18 = vshra.s32 %v3059_v34, 16  ;;  %v3177_v36 = vpop.xlane.xlu0 %3176  ;;  %v3060_v40 = vand.u32 65535, %v3059_v34 }
0x3219   :  { %vm3178_vm14 = vcmp.eq.f32.partialorder %v3174_v7, %v3177_v36 }
0x321a   :  { %v3179_v37 = vsel %vm3178_vm14, %v4945_v50, 20  ;;  %v3063_v35 = vcvt.s32.f32 %v3061_v18  ;;  %v3062_v43 = vcvt.s32.f32 %v3060_v40  ;;  %vm5863_vm14 = vmmov 0  }
0x321b   :  { %v3180_v38 = vsel %vm852_vm15, %v3179_v37, 2147483647 }
0x321c   :  { %v3182_v53 = vshra.s32 %v3180_v38, 16  ;;  %3064 = vmin.xlane.f32.xlu1 %v3063_v35  ;;  %v3181_v41 = vand.u32 65535, %v3180_v38 }
0x321e   :  { %v3184_v39 = vcvt.s32.f32 %v3182_v53  ;;  %v3183_v46 = vcvt.s32.f32 %v3181_v41 }
0x3220   :  { %3185 = vmin.xlane.f32.xlu1 %v3184_v39 }
0x32a9   :  { %v3065_v42 = vpop.xlane.xlu1 %3064 }
0x32aa   :  { %vm3066_vm11 = vcmp.eq.f32.partialorder %v3063_v35, %v3065_v42  ;;  %v3071_v48 = vcvt.f32.s32 %v3065_v42 }
0x32ab   :  { %v3067_v44 = vsel %vm3066_vm11, %v3062_v43, inf  ;;  %vm5864_vm11 = vcmask 1043456  }
0x32ac   :  { %3068 = vmin.xlane.f32.xlu0 %v3067_v44  ;;  %v3072_v27 = vshll.u32 %v3071_v48, 16 }
0x32ad   :  { %v3186_v45 = vpop.xlane.xlu1 %3185 }
0x32ae   :  { %vm3187_vm0 = vcmp.eq.f32.partialorder %v3184_v39, %v3186_v45  ;;  %v3192_v55 = vcvt.f32.s32 %v3186_v45 }
0x32af   :  { %v3188_v47 = vsel %vm3187_vm0, %v3183_v46, inf }
0x32b0   :  { %3189 = vmin.xlane.f32.xlu0 %v3188_v47  ;;  %v3193_v6 = vshll.u32 %v3192_v55, 16 }
0x3339   :  { %v3069_v54 = vpop.xlane.xlu0 %3068 }
0x333a   :  { %v3070_v56 = vcvt.f32.s32 %v3069_v54 }
0x333c   :  { %v3073_v3 = vadd.s32 %v3072_v27, %v3070_v56 }
0x333d   :  { %v3190_v4 = vpop.xlane.xlu0 %3189 }
0x333e   :  { %v3077_v11 = vrot.slane %v3073_v3, %v5035_v51  ;;  %v3191_v57 = vcvt.f32.s32 %v3190_v4 }
0x3340   :  { %vm3078_vm3 = vcmp.eq.s32.totalorder %v4945_v50, %v3077_v11  ;;  %v3194_v58 = vadd.s32 %v3193_v6, %v3191_v57 }
0x3341   :  { %vm3080_vm10 = vmand %vm5862_vm7, %vm3078_vm3 }
0x3342   :  { %v3082_v60 = vsel %vm3080_vm10, 1.0, %v4725_v1  ;;  %v3198_v62 = vrot.slane %v3194_v58, %v5035_v51  ;;  %vm3203_vm5 = vcmp.eq.s32.totalorder %v4945_v50, %v3194_v58 }
0x3343   :  { %v3084_v63 = vadd.f32 %v3082_v60, %v3049_v59  ;;  %v3204_v5 = vsel %vm3203_vm5, -inf, %v3174_v7 }
0x3344   :  { %vm3199_vm9 = vcmp.eq.s32.totalorder %v4945_v50, %v3198_v62  ;;  %v3205_v12 = vsel %vm852_vm15, %v3204_v5, -inf }
0x3345   :  { %vm3200_vm8 = vmand %vm978_vm4, %vm3199_vm9  ;;  %3206 = vmax.xlane.f32.xlu1 %v3205_v12  ;;  %4351 = vmatmul.mubr.msk.f32.vlgmr.msra.gmra.mrb[20].mxu1 %vm1353_vm1, %v3084_v63  ;;  %vm5865_vm4 = vcmask 254976  }
0x3346   :  { %v3201_v14 = vsel %vm3200_vm8, 1.0, %v4725_v1  ;;  %4477 = vmatpush3.bf16.msra.mxu1 %v5334_v8  ;;  %4359 = vmatprep.mubr.msk.f32.mxu1 %vm5863_vm14, %v4725_v1  ;;  %v3392_v8 = vld [vmem:[#allocation2 + $0x8] sm:$0xff]  ;;  %vm5871_vm9 = vmmov %vm5867_vm6 }
0x3347   :  { %v5499_v15 = vadd.f32 %v3201_v14, %v3172_v10  ;;  %4357 = vmatprep.subr.mxu1 %v4725_v1  ;;  %v3393_v28 = vmul.f32 %v3392_v8, %v3392_v8  ;;  %vm5872_vm8 = vmmov %vm5867_vm6 }
0x3349   :  { %v3394_v7 = vsel %vm5867_vm6, %v3393_v28, 0.0 }
0x334a   :  { %4358 = vmatpush3.msk.msra.mxu1 %vm5864_vm11, %v5328_v61 }
0x33d2   :  { %v3207_v20 = vpop.xlane.xlu1 %3206 }
0x33d3   :  { %vm3208_vm0 = vcmp.eq.f32.partialorder %v3204_v5, %v3207_v20 }
0x33d4   :  { %v3209_v22 = vsel %vm3208_vm0, %v4945_v50, 20 }
0x33d5   :  { %v3210_v0 = vsel %vm852_vm15, %v3209_v22, 2147483647  ;;  %vm5868_vm15 = vcmask 57344  }
0x33d6   :  { %v3212_v16 = vshra.s32 %v3210_v0, 16  ;;  %v717_v31 = vsel %vm5868_vm15, %v5007_v19, inf  ;;  %v3211_v30 = vand.u32 65535, %v3210_v0  ;;  %vm5869_vm7 = vmmov %vm5868_vm15 }
0x33d7   :  { %v2627_v34 = vsel %vm5869_vm7, %v5345_v9, inf  ;;  %vm5870_vm5 = vmmov %vm5869_vm7 }
0x33d8   :  { %v3214_v17 = vcvt.s32.f32 %v3212_v16  ;;  %v3213_v32 = vcvt.s32.f32 %v3211_v30  ;;  %vm5875_vm15 = vmmov %vm5872_vm8 }
0x33da   :  { %3215 = vmin.xlane.f32.xlu0 %v3214_v17 }
0x3418   :  { %v4352_v23 = vpop.f32.mrb[20].mxu1 }
0x3419   :  { %v3560_v13 = vmul.f32 %v4352_v23, %v4352_v23  ;;  %v3309_v24 = vpop.f32.mrb[21].mxu1 }
0x341a   :  { %v3559_v26 = vmul.f32 %v3309_v24, %v3309_v24  ;;  %v5506_v25 = vpack.c.bf16 %v4352_v23, %v3309_v24 }
0x341b   :  { %v3564_v29 = vsel %vm5865_vm4, %v3560_v13, 0.0  ;;  %vm5873_vm4 = vmmov %vm5870_vm5 }
0x341c   :  { %3565 = vadd.xlane.f32.xlu0 %v3564_v29  ;;  %v3561_v61 = vsel %vm5866_vm13, %v3559_v26, 0.0  ;;  %vm5874_vm13 = vcmp.eq.s32.totalorder %v4943_v49, 4 }
0x341d   :  { %3562 = vadd.xlane.f32.xlu1 %v3561_v61 }
0x3421   :  { %3395 = vadd.xlane.f32.xlu1 %v3394_v7 }
0x3425   :  { %718 = vmin.xlane.f32.xlu1 %v717_v31 }
0x3467   :  { %v3216_v10 = vpop.xlane.xlu0 %3215 }
0x3468   :  { %vm3217_vm3 = vcmp.eq.f32.partialorder %v3214_v17, %v3216_v10  ;;  %v3222_v27 = vcvt.f32.s32 %v3216_v10 }
0x3469   :  { %v3218_v33 = vsel %vm3217_vm3, %v3213_v32, inf  ;;  %vm5876_vm3 = vmmov %vm5872_vm8 }
0x346a   :  { %3219 = vmin.xlane.f32.xlu0 %v3218_v33  ;;  %v3223_v56 = vshll.u32 %v3222_v27, 16 }
0x346e   :  { %2628 = vmin.xlane.f32.xlu0 %v2627_v34 }
0x34a9   :  { %v3566_v18 = vpop.xlane.xlu0 %3565 }
0x34aa   :  { %v3568_v36 = vadd.f32 1e-12, %v3566_v18  ;;  %v3563_v37 = vpop.xlane.xlu1 %3562 }
0x34ab   :  { %v3567_v35 = vadd.f32 1e-12, %v3563_v37 }
0x34ac   :  { %4551 = vrsqrt.f32 %v3568_v36 }
0x34ad   :  { %4553 = vrsqrt.f32 %v3567_v35 }
0x34ae   :  { %v3396_v38 = vpop.xlane.xlu1 %3395 }
0x34af   :  { %v3397_v53 = vadd.f32 1e-12, %v3396_v38 }
0x34b1   :  { %4555 = vrsqrt.f32 %v3397_v53 }
0x34b2   :  { %v5515_v39 = vpop.xlane.xlu1 %718 }
0x34b3   :  { %vm720_vm10 = vcmp.eq.f32.partialorder %v5007_v19, %v5515_v39 }
0x34b4   :  { %v721_v40 = vsel %vm720_vm10, %v4945_v50, 8  ;;  %vm5878_vm10 = vcmask 1044480  }
0x34b5   :  { %v722_v41 = vsel %vm5870_vm5, %v721_v40, 2147483647 }
0x34b6   :  { %v4552_v42 = vpop.eup %4551  ;;  %v724_v43 = vshra.s32 %v722_v41, 16  ;;  %v723_v49 = vand.u32 65535, %v722_v41 }
0x34b7   :  { %v4554_v44 = vpop.eup %4553  ;;  %v3572_v45 = vmul.f32 %v4552_v42, %v4352_v23 }
0x34b8   :  { %v726_v46 = vcvt.s32.f32 %v724_v43  ;;  %v3571_v47 = vmul.f32 %v4554_v44, %v3309_v24  ;;  %v725_v5 = vcvt.s32.f32 %v723_v49 }
0x34ba   :  { %727 = vmin.xlane.f32.xlu1 %v726_v46  ;;  %v4478_v48 = vpack.c.bf16 %v3572_v45, %v3571_v47 }
0x34bb   :  { %v4556_v52 = vpop.eup %4555 }
0x34bc   :  { %4480 = vmatprep.subr.msk.bf16.mxu1 %vm4842_vm2, %v4478_v48  ;;  %v3399_v54 = vmul.f32 %v4556_v52, %v3392_v8 }
0x34be   :  { %4363 = vmatpush3.xpose.msk.msra.mxu0 %vm5871_vm9, %v3399_v54  ;;  %vm5879_vm9 = vcmask 74752  }
0x34bf   :  { %4367 = vmatprep.subr.mxu0 %v4725_v1 }
0x34c1   :  { %4365 = vmatmul.mubr.msk.f32.vlgmr.msra.gmra.mrb[20].mxu0 %vm5872_vm8, %v3399_v54  ;;  %vm5880_vm8 = vcmask 80896  }
0x34c2   :  { %4368 = vmatpush3.msra.mxu0 %v3392_v8  ;;  %4369 = vmatprep.mubr.msk.f32.mxu0 %vm5863_vm14, %v4725_v1 }
0x34c3   :  { %4486 = vmatprep.subr.msk.bf16.mxu0 %vm5190_vm12, %v5506_v25 }
0x34f7   :  { %v3220_v55 = vpop.xlane.xlu0 %3219 }
0x34f8   :  { %v3221_v3 = vcvt.f32.s32 %v3220_v55 }
0x34fa   :  { %v3224_v4 = vadd.s32 %v3223_v56, %v3221_v3 }
0x34fb   :  { %v5531_v6 = vpop.xlane.xlu0 %2628 }
0x34fc   :  { %v3228_v11 = vrot.slane %v3224_v4, %v5035_v51  ;;  %vm2630_vm11 = vcmp.eq.f32.partialorder %v5345_v9, %v5531_v6 }
0x34fd   :  { %v2631_v57 = vsel %vm2630_vm11, %v4945_v50, 8  ;;  %vm5881_vm11 = vmmov %vm5873_vm4 }
0x34fe   :  { %vm3229_vm0 = vcmp.eq.s32.totalorder %v4945_v50, %v3228_v11  ;;  %v2632_v58 = vsel %vm5873_vm4, %v2631_v57, 2147483647 }
0x34ff   :  { %vm3230_vm6 = vmand %vm5874_vm13, %vm3229_vm0  ;;  %v2634_v59 = vshra.s32 %v2632_v58, 16  ;;  %v2633_v14 = vand.u32 65535, %v2632_v58 }
0x3500   :  { %v3231_v60 = vsel %vm3230_vm6, 1.0, %v4725_v1 }
0x3501   :  { %v3232_v62 = vadd.f32 %v3231_v60, %v5499_v15  ;;  %v2636_v63 = vcvt.s32.f32 %v2634_v59  ;;  %v2635_v20 = vcvt.s32.f32 %v2633_v14 }
0x3503   :  { %4360 = vmatmul.mubr.msk.f32.vlgmr.msra.gmra.mrb[22].mxu1 %vm1353_vm1, %v3232_v62  ;;  %2637 = vmin.xlane.f32.xlu0 %v2636_v63 }
0x3504   :  { %4483 = vmatpush3.bf16.xpose.msk.msra.mxu1 %vm4842_vm2, %v4478_v48  ;;  %4376 = vmatprep.mubr.msk.f32.mxu1 %vm5875_vm15, %v3571_v47  ;;  %vm5877_vm2 = vcmask 64512   ;;  %vm5883_vm15 = vmmov %vm5873_vm4 }
0x3505   :  { %4391 = vmatprep.subr.mxu1 %v4725_v1  ;;  %vm5882_vm13 = vmmov %vm5877_vm2 }
0x350b   :  { %4377 = vmatmul.mubr.msk.f32.vlgmr.msra.gmra.mrb[24].mxu1 %vm5876_vm3, %v3572_v45  ;;  %vm5884_vm3 = vmmov %vm5880_vm8 }
0x350c   :  { %4393 = vmatprep.mubr.msk.f32.mxu1 %vm5863_vm14, %v4725_v1 }
0x3547   :  { %v728_v51 = vpop.xlane.xlu1 %727 }
0x3548   :  { %vm729_vm7 = vcmp.eq.f32.partialorder %v726_v46, %v728_v51  ;;  %v734_v17 = vcvt.f32.s32 %v728_v51 }
0x3549   :  { %v730_v12 = vsel %vm729_vm7, %v725_v5, inf  ;;  %vm5885_vm7 = vmmov %vm5879_vm9 }
0x354a   :  { %731 = vmin.xlane.f32.xlu1 %v730_v12  ;;  %v735_v24 = vshll.u32 %v734_v17, 16 }
0x3590   :  { %v2638_v15 = vpop.xlane.xlu0 %2637 }
0x3591   :  { %vm2639_vm1 = vcmp.eq.f32.partialorder %v2636_v63, %v2638_v15  ;;  %v2644_v32 = vcvt.f32.s32 %v2638_v15 }
0x3592   :  { %v2640_v2 = vsel %vm2639_vm1, %v2635_v20, inf }
0x3593   :  { %2641 = vmin.xlane.f32.xlu0 %v2640_v2  ;;  %v2645_v34 = vshll.u32 %v2644_v32, 16 }
0x3594   :  { %v3469_v22 = vpop.f32.mrb[20].mxu0 }
0x3595   :  { %v3473_v0 = vsel %vm5877_vm2, %v3469_v22, -inf  ;;  %v4366_v16 = vpop.f32.mrb[21].mxu0  ;;  %vm5886_vm2 = vmmov %vm5873_vm4 }
0x3596   :  { %3474 = vmax.xlane.f32.xlu1 %v3473_v0 }
0x35d6   :  { %v5552_v8 = vpop.f32.mrb[22].mxu1 }
0x35d7   :  { %v732_v23 = vpop.xlane.xlu1 %731  ;;  %v4361_v13 = vpop.f32.mrb[23].mxu1  ;;  %4392 = vmatpush3.msk.msra.mxu1 %vm5878_vm10, %v5552_v8  ;;  %v3763_v49 = vmul.f32 %v5552_v8, %v5552_v8  ;;  %vm5887_vm10 = vcmask 258048  }
0x35d8   :  { %v733_v26 = vcvt.f32.s32 %v732_v23 }
0x35d9   :  { %v3764_v51 = vsel %vm5887_vm10, %v3763_v49, 0.0 }
0x35da   :  { %v736_v28 = vadd.s32 %v735_v24, %v733_v26 }
0x35dc   :  { %vm740_vm5 = vcmp.eq.s32.totalorder %v4945_v50, %v736_v28 }
0x35dd   :  { %v5560_v30 = vsel %vm740_vm5, inf, %v5007_v19  ;;  %vm5888_vm5 = vmmov %vm5882_vm13 }
0x35de   :  { %v4378_v29 = vpop.f32.mrb[24].mxu1  ;;  %v742_v10 = vsel %vm5881_vm11, %v5560_v30, inf  ;;  %vm5890_vm11 = vmmov %vm5884_vm3 }
0x35df   :  { %v3645_v61 = vpop.f32.mrb[25].mxu1  ;;  %v3657_v7 = vsel %vm5879_vm9, %v4378_v29, -inf }
0x35e0   :  { %3658 = vmax.xlane.f32.xlu1 %v3657_v7  ;;  %v3654_v31 = vsel %vm5880_vm8, %v3645_v61, -inf  ;;  %vm5889_vm8 = vmmov %vm5884_vm3 }
0x35e1   :  { %3655 = vmax.xlane.f32.xlu0 %v3654_v31 }
0x35e5   :  { %743 = vmin.xlane.f32.xlu0 %v742_v10 }
0x3620   :  { %v2642_v33 = vpop.xlane.xlu0 %2641 }
0x3621   :  { %v2643_v18 = vcvt.f32.s32 %v2642_v33 }
0x3623   :  { %v2646_v36 = vadd.s32 %v2645_v34, %v2643_v18  ;;  %v3475_v37 = vpop.xlane.xlu1 %3474 }
0x3624   :  { %v3476_v35 = vsub.f32 %v3469_v22, %v3475_v37 }
0x3625   :  { %vm2649_vm0 = vcmp.eq.s32.totalorder %v4945_v50, %v2646_v36 }
0x3626   :  { %v3477_v38 = vmul.f32 1.442695, %v3476_v35  ;;  %v5566_v53 = vsel %vm2649_vm0, inf, %v5345_v9  ;;  %vm5891_vm0 = vcmask 261120  }
0x3627   :  { %v2651_v40 = vsel %vm5873_vm4, %v5566_v53, inf  ;;  %vm5892_vm4 = vmmov %vm5891_vm0 }
0x3628   :  { %4557 = vpow2.f32 %v3477_v38  ;;  %2652 = vmin.xlane.f32.xlu1 %v2651_v40 }
0x3632   :  { %v4558_v41 = vpop.eup %4557 }
0x3633   :  { %v3479_v42 = vsel %vm5882_vm13, %v4558_v41, 0.0  ;;  %vm5893_vm13 = vmmov %vm5886_vm2 }
0x3634   :  { %3480 = vadd.xlane.f32.xlu0 %v3479_v42 }
0x366d   :  { %v3659_v43 = vpop.xlane.xlu1 %3658 }
0x366e   :  { %v3661_v44 = vsub.f32 %v4378_v29, %v3659_v43  ;;  %v3656_v45 = vpop.xlane.xlu0 %3655 }
0x366f   :  { %v3660_v46 = vsub.f32 %v3645_v61, %v3656_v45 }
0x3670   :  { %v3664_v47 = vmul.f32 1.442695, %v3661_v44 }
0x3671   :  { %v3662_v48 = vmul.f32 1.442695, %v3660_v46 }
0x3672   :  { %v5571_v52 = vpop.xlane.xlu0 %743 }
0x3673   :  { %4559 = vpow2.f32 %v3662_v48  ;;  %vm745_vm6 = vcmp.eq.f32.partialorder %v5560_v30, %v5571_v52 }
0x3674   :  { %v746_v54 = vsel %vm745_vm6, %v4945_v50, 8  ;;  %4561 = vpow2.f32 %v3664_v47  ;;  %vm5894_vm6 = vmmov %vm5891_vm0 }
0x3675   :  { %v747_v27 = vsel %vm5883_vm15, %v746_v54, 2147483647 }
0x3676   :  { %v749_v55 = vshra.s32 %v747_v27, 16  ;;  %v748_v15 = vand.u32 65535, %v747_v27 }
0x3678   :  { %v751_v56 = vcvt.s32.f32 %v749_v55  ;;  %v750_v2 = vcvt.s32.f32 %v748_v15 }
0x367a   :  { %752 = vmin.xlane.f32.xlu1 %v751_v56 }
0x367d   :  { %v4560_v3 = vpop.eup %4559 }
0x367e   :  { %v3666_v4 = vsel %vm5884_vm3, %v4560_v3, 0.0  ;;  %v4562_v11 = vpop.eup %4561  ;;  %vm5895_vm3 = vmmov %vm5886_vm2 }
0x367f   :  { %3667 = vadd.xlane.f32.xlu1 %v3666_v4  ;;  %v3669_v57 = vsel %vm5885_vm7, %v4562_v11, 0.0  ;;  %vm5896_vm7 = vcmask 254976   ;;  %vm5898_vm10 = vmmov %vm5895_vm3 }
0x3683   :  { %3670 = vadd.xlane.f32.xlu1 %v3669_v57 }
0x36b5   :  { %v5579_v58 = vpop.xlane.xlu1 %2652 }
0x36b6   :  { %vm2654_vm1 = vcmp.eq.f32.partialorder %v5566_v53, %v5579_v58 }
0x36b7   :  { %v2655_v59 = vsel %vm2654_vm1, %v4945_v50, 8  ;;  %vm5897_vm1 = vmmov %vm5891_vm0 }
0x36b8   :  { %v2656_v60 = vsel %vm5886_vm2, %v2655_v59, 2147483647 }
0x36b9   :  { %v2658_v62 = vshra.s32 %v2656_v60, 16  ;;  %v2657_v21 = vand.u32 65535, %v2656_v60 }
0x36bb   :  { %v2660_v63 = vcvt.s32.f32 %v2658_v62  ;;  %v2659_v26 = vcvt.s32.f32 %v2657_v21 }
0x36bd   :  { %2661 = vmin.xlane.f32.xlu0 %v2660_v63 }
0x36c1   :  { %v3481_v5 = vpop.xlane.xlu0 %3480  ;;  %3765 = vadd.xlane.f32.xlu0 %v3764_v51 }
0x36c2   :  { %4563 = vrcp.f32 %v3481_v5 }
0x36cc   :  { %v4564_v12 = vpop.eup %4563 }
0x36cd   :  { %v3483_v14 = vmul.f32 %v4564_v12, %v4558_v41 }
0x36cf   :  { %4370 = vmatmul.mubr.msk.f32.vlgmr.msra.gmra.mrb[22].mxu0 %vm5888_vm5, %v3483_v14 }
0x36d0   :  { %4489 = vmatpush3.bf16.msk.msra.mxu0 %vm5190_vm12, %v5506_v25 }
0x36d1   :  { %4386 = vmatprep.subr.mxu0 %v4725_v1 }
0x3707   :  { %v753_v20 = vpop.xlane.xlu1 %752 }
0x3708   :  { %vm754_vm9 = vcmp.eq.f32.partialorder %v751_v56, %v753_v20  ;;  %v759_v10 = vcvt.f32.s32 %v753_v20 }
0x3709   :  { %v755_v22 = vsel %vm754_vm9, %v750_v2, inf  ;;  %vm5899_vm9 = vmmov %vm5895_vm3 }
0x370a   :  { %756 = vmin.xlane.f32.xlu0 %v755_v22  ;;  %v760_v33 = vshll.u32 %v759_v10, 16 }
0x370c   :  { %v3668_v0 = vpop.xlane.xlu1 %3667 }
0x370d   :  { %4565 = vrcp.f32 %v3668_v0 }
0x3710   :  { %v3671_v16 = vpop.xlane.xlu1 %3670 }
0x3711   :  { %4567 = vrcp.f32 %v3671_v16 }
0x3717   :  { %v4566_v17 = vpop.eup %4565 }
0x3718   :  { %v3673_v23 = vmul.f32 %v4566_v17, %v4560_v3 }
0x371a   :  { %4383 = vmatprep.mubr.msk.f32.mxu0 %vm5889_vm8, %v3673_v23 }
0x371b   :  { %v4568_v13 = vpop.eup %4567 }
0x371c   :  { %v3675_v24 = vmul.f32 %v4568_v13, %v4562_v11 }
0x371e   :  { %4384 = vmatmul.mubr.msk.f32.vlgmr.msra.gmra.mrb[24].mxu0 %vm5890_vm11, %v3675_v24  ;;  %vm5900_vm11 = vcmask 36864  }
0x371f   :  { %4388 = vmatprep.mubr.msk.f32.mxu0 %vm5863_vm14, %v4725_v1 }
0x374a   :  { %v2662_v25 = vpop.xlane.xlu0 %2661 }
0x374b   :  { %vm2663_vm12 = vcmp.eq.f32.partialorder %v2660_v63, %v2662_v25  ;;  %v2668_v35 = vcvt.f32.s32 %v2662_v25 }
0x374c   :  { %v2664_v28 = vsel %vm2663_vm12, %v2659_v26, inf }
0x374d   :  { %2665 = vmin.xlane.f32.xlu1 %v2664_v28  ;;  %v2669_v40 = vshll.u32 %v2668_v35, 16 }
0x374e   :  { %v3766_v29 = vpop.xlane.xlu0 %3765 }
0x374f   :  { %v3767_v61 = vadd.f32 1e-12, %v3766_v29 }
0x3751   :  { %4569 = vrsqrt.f32 %v3767_v61 }
0x375b   :  { %v4570_v7 = vpop.eup %4569 }
0x375c   :  { %v3769_v31 = vmul.f32 %v4570_v7, %v5552_v8 }
0x375e   :  { %4387 = vmatpush3.xpose.msk.msra.mxu0 %vm5891_vm0, %v3769_v31 }
0x3761   :  { %4389 = vmatmul.mubr.msk.f32.vlgmr.msra.gmra.mrb[26].mxu0 %vm5892_vm4, %v3769_v31  ;;  %vm5901_vm4 = vmmov %vm5895_vm3 }
0x3797   :  { %v757_v32 = vpop.xlane.xlu0 %756 }
0x3798   :  { %v758_v1 = vcvt.f32.s32 %v757_v32 }
0x379a   :  { %v761_v34 = vadd.s32 %v760_v33, %v758_v1  ;;  %v2728_v33 = vsel %vm5895_vm3, %v5345_v9, -inf }
0x379c   :  { %vm765_vm14 = vcmp.eq.s32.totalorder %v4945_v50, %v761_v34 }
0x379d   :  { %v766_v18 = vsel %vm765_vm14, inf, %v5560_v30  ;;  %vm5902_vm14 = vmmov %vm5895_vm3 }
0x379e   :  { %v767_v36 = vsel %vm5893_vm13, %v766_v18, inf  ;;  %v823_v21 = vsel %vm5902_vm14, %v5007_v19, -inf  ;;  %vm5903_vm13 = vmmov %vm5900_vm11 }
0x379f   :  { %768 = vmin.xlane.f32.xlu0 %v767_v36 }
0x37a2   :  { %v3553_v37 = vpop.f32.mrb[22].mxu0 }
0x37a3   :  { %3558 = vst.msk [vmem:[#allocation11 + $0x8] sm:$0xff] %vm5894_vm6, %v3553_v37  ;;  %v4371_v8 = vpop.f32.mrb[23].mxu0 }
0x37da   :  { %v2666_v38 = vpop.xlane.xlu1 %2665 }
0x37db   :  { %v2667_v41 = vcvt.f32.s32 %v2666_v38 }
0x37dd   :  { %v2670_v42 = vadd.s32 %v2669_v40, %v2667_v41 }
0x37df   :  { %vm2673_vm15 = vcmp.eq.s32.totalorder %v4945_v50, %v2670_v42 }
0x37e0   :  { %v2674_v43 = vsel %vm2673_vm15, inf, %v5566_v53  ;;  %vm5904_vm15 = vmmov %vm5895_vm3 }
0x37e1   :  { %v2675_v44 = vsel %vm5895_vm3, %v2674_v43, inf }
0x37e2   :  { %2676 = vmin.xlane.f32.xlu1 %v2675_v44 }
0x37f1   :  { %v4385_v30 = vpop.f32.mrb[24].mxu0 }
0x37f2   :  { %4088 = vst.msk [vmem:[%s5793_s13 + $0x18] sm:$0x3] %vm5896_vm7, %v4385_v30  ;;  %v3751_v45 = vpop.f32.mrb[25].mxu0 }
0x37f3   :  { %4087 = vst.msk [vmem:[%s5793_s13 + $0x10] sm:$0xff] %vm5897_vm1, %v3751_v45  ;;  %vm5905_vm1 = vmmov %vm5895_vm3 }
0x37f4   :  { %vm5911_vm3 = vmmov %vm5905_vm1 }
0x382c   :  { %v5615_v46 = vpop.xlane.xlu0 %768 }
0x382d   :  { %vm770_vm2 = vcmp.eq.f32.partialorder %v766_v18, %v5615_v46 }
0x382e   :  { %v771_v53 = vsel %vm770_vm2, %v4945_v50, 8 }
0x382f   :  { %v772_v47 = vsel %vm5898_vm10, %v771_v53, 2147483647  ;;  %vm5906_vm10 = vmmov %vm5905_vm1 }
0x3830   :  { %v774_v48 = vshra.s32 %v772_v47, 16  ;;  %v773_v59 = vand.u32 65535, %v772_v47 }
0x3832   :  { %v776_v54 = vcvt.s32.f32 %v774_v48  ;;  %v775_v62 = vcvt.s32.f32 %v773_v59 }
0x3834   :  { %777 = vmin.xlane.f32.xlu0 %v776_v54  ;;  %v3839_v27 = vpop.f32.mrb[26].mxu0 }
0x3835   :  { %v4390_v55 = vpop.f32.mrb[27].mxu0  ;;  %v3843_v49 = vsel %vm5900_vm11, %v3839_v27, -inf }
0x386f   :  { %v5620_v56 = vpop.xlane.xlu1 %2676 }
0x3870   :  { %vm2678_vm5 = vcmp.eq.f32.partialorder %v2674_v43, %v5620_v56 }
0x3871   :  { %v2679_v3 = vsel %vm2678_vm5, %v4945_v50, 8  ;;  %vm5907_vm5 = vcmask 39936  }
0x3872   :  { %v2680_v4 = vsel %vm5899_vm9, %v2679_v3, 2147483647 }
0x3873   :  { %v2682_v11 = vshra.s32 %v2680_v4, 16  ;;  %v2681_v51 = vand.u32 65535, %v2680_v4 }
0x3875   :  { %v2684_v57 = vcvt.s32.f32 %v2682_v11  ;;  %v2683_v12 = vcvt.s32.f32 %v2681_v51 }
0x3877   :  { %2685 = vmin.xlane.f32.xlu1 %v2684_v57 }
0x38c1   :  { %v778_v60 = vpop.xlane.xlu0 %777 }
0x38c2   :  { %vm779_vm8 = vcmp.eq.f32.partialorder %v776_v54, %v778_v60  ;;  %v784_v15 = vcvt.f32.s32 %v778_v60 }
0x38c3   :  { %v780_v63 = vsel %vm779_vm8, %v775_v62, inf  ;;  %vm5908_vm8 = vmmov %vm5905_vm1 }
0x38c4   :  { %781 = vmin.xlane.f32.xlu0 %v780_v63  ;;  %v785_v2 = vshll.u32 %v784_v15, 16 }
0x38c8   :  { %3844 = vmax.xlane.f32.xlu0 %v3843_v49 }
0x3904   :  { %v2686_v5 = vpop.xlane.xlu1 %2685 }
0x3905   :  { %vm2687_vm12 = vcmp.eq.f32.partialorder %v2684_v57, %v2686_v5  ;;  %v2692_v28 = vcvt.f32.s32 %v2686_v5 }
0x3906   :  { %v2688_v14 = vsel %vm2687_vm12, %v2683_v12, inf  ;;  %vm5909_vm12 = vmmov %vm5905_vm1 }
0x3907   :  { %2689 = vmin.xlane.f32.xlu1 %v2688_v14  ;;  %v2693_v61 = vshll.u32 %v2692_v28, 16 }
0x3951   :  { %v782_v20 = vpop.xlane.xlu0 %781 }
0x3952   :  { %v783_v22 = vcvt.f32.s32 %v782_v20 }
0x3954   :  { %v786_v0 = vadd.s32 %v785_v2, %v783_v22 }
0x3955   :  { %v3845_v16 = vpop.xlane.xlu0 %3844 }
0x3956   :  { %vm790_vm0 = vcmp.eq.s32.totalorder %v4945_v50, %v786_v0  ;;  %v3846_v17 = vsub.f32 %v3839_v27, %v3845_v16 }
0x3957   :  { %v5627_v23 = vsel %vm790_vm0, inf, %v766_v18 }
0x3958   :  { %v3847_v13 = vmul.f32 1.442695, %v3846_v17  ;;  %v792_v24 = vsel %vm5901_vm4, %v5627_v23, inf }
0x3959   :  { %793 = vmin.xlane.f32.xlu1 %v792_v24 }
0x395a   :  { %4571 = vpow2.f32 %v3847_v13 }
0x395d   :  { %824 = vmax.xlane.f32.xlu1 %v823_v21 }
0x3964   :  { %v4572_v25 = vpop.eup %4571 }
0x3965   :  { %v3849_v26 = vsel %vm5903_vm13, %v4572_v25, 0.0 }
0x3966   :  { %3850 = vadd.xlane.f32.xlu1 %v3849_v26 }
0x3994   :  { %v2690_v29 = vpop.xlane.xlu1 %2689 }
0x3995   :  { %v2691_v7 = vcvt.f32.s32 %v2690_v29 }
0x3997   :  { %v2694_v31 = vadd.s32 %v2693_v61, %v2691_v7 }
0x3999   :  { %vm2697_vm6 = vcmp.eq.s32.totalorder %v4945_v50, %v2694_v31 }
0x399a   :  { %v5635_v10 = vsel %vm2697_vm6, inf, %v2674_v43  ;;  %vm5910_vm6 = vcmask 258048  }
0x399b   :  { %v2699_v32 = vsel %vm5904_vm15, %v5635_v10, inf }
0x399c   :  { %2700 = vmin.xlane.f32.xlu0 %v2699_v32 }
0x39a0   :  { %2729 = vmax.xlane.f32.xlu0 %v2728_v33 }
0x39e6   :  { %v5641_v1 = vpop.xlane.xlu1 %793 }
0x39e7   :  { %vm795_vm7 = vcmp.eq.f32.partialorder %v5627_v23, %v5641_v1 }
0x39e8   :  { %v796_v34 = vsel %vm795_vm7, %v4945_v50, 8 }
0x39e9   :  { %v797_v18 = vsel %vm5905_vm1, %v796_v34, 2147483647 }
0x39ea   :  { %v5647_v36 = vpop.xlane.xlu1 %824  ;;  %v799_v37 = vshra.s32 %v797_v18, 16  ;;  %v798_v11 = vand.u32 65535, %v797_v18 }
0x39eb   :  { %vm826_vm2 = vcmp.eq.f32.partialorder %v5007_v19, %v5647_v36 }
0x39ec   :  { %v827_v8 = vsel %vm826_vm2, %v4945_v50, 8  ;;  %v801_v35 = vcvt.s32.f32 %v799_v37  ;;  %v800_v59 = vcvt.s32.f32 %v798_v11 }
0x39ed   :  { %v828_v38 = vsel %vm5906_vm10, %v827_v8, 2147483647  ;;  %vm5912_vm10 = vmmov %vm5905_vm1 }
0x39ee   :  { %802 = vmin.xlane.f32.xlu0 %v801_v35  ;;  %v830_v40 = vshra.s32 %v828_v38, 16  ;;  %v829_v60 = vand.u32 65535, %v828_v38 }
0x39f0   :  { %v832_v41 = vcvt.s32.f32 %v830_v40  ;;  %v831_v49 = vcvt.s32.f32 %v829_v60 }
0x39f2   :  { %833 = vmin.xlane.f32.xlu0 %v832_v41 }
0x39f3   :  { %v3851_v42 = vpop.xlane.xlu1 %3850 }
0x39f4   :  { %4573 = vrcp.f32 %v3851_v42 }
0x39fe   :  { %v4574_v43 = vpop.eup %4573 }
0x39ff   :  { %v3853_v44 = vmul.f32 %v4574_v43, %v4572_v25 }
0x3a01   :  { %4394 = vmatmul.mubr.msk.f32.vlgmr.msra.gmra.mrb[26].mxu1 %vm5907_vm5, %v3853_v44 }
0x3a29   :  { %v5654_v30 = vpop.xlane.xlu0 %2700 }
0x3a2a   :  { %vm2702_vm9 = vcmp.eq.f32.partialorder %v5635_v10, %v5654_v30 }
0x3a2b   :  { %v2703_v45 = vsel %vm2702_vm9, %v4945_v50, 8  ;;  %vm5913_vm9 = vmmov %vm5905_vm1 }
0x3a2c   :  { %v2704_v53 = vsel %vm5908_vm8, %v2703_v45, 2147483647 }
0x3a2d   :  { %v5660_v47 = vpop.xlane.xlu0 %2729  ;;  %v2706_v48 = vshra.s32 %v2704_v53, 16  ;;  %v2705_v5 = vand.u32 65535, %v2704_v53 }
0x3a2e   :  { %vm2731_vm11 = vcmp.eq.f32.partialorder %v5345_v9, %v5660_v47 }
0x3a2f   :  { %v2732_v54 = vsel %vm2731_vm11, %v4945_v50, 8  ;;  %v2708_v27 = vcvt.s32.f32 %v2706_v48  ;;  %v2707_v14 = vcvt.s32.f32 %v2705_v5 }
0x3a30   :  { %v2733_v55 = vsel %vm5909_vm12, %v2732_v54, 2147483647 }
0x3a31   :  { %2709 = vmin.xlane.f32.xlu1 %v2708_v27  ;;  %v2735_v3 = vshra.s32 %v2733_v55, 16  ;;  %v2734_v15 = vand.u32 65535, %v2733_v55 }
0x3a33   :  { %v2737_v4 = vcvt.s32.f32 %v2735_v3  ;;  %v2736_v22 = vcvt.s32.f32 %v2734_v15 }
0x3a35   :  { %2738 = vmin.xlane.f32.xlu1 %v2737_v4 }
0x3a7b   :  { %v803_v57 = vpop.xlane.xlu0 %802 }
0x3a7c   :  { %vm804_vm0 = vcmp.eq.f32.partialorder %v801_v35, %v803_v57  ;;  %v809_v13 = vcvt.f32.s32 %v803_v57 }
0x3a7d   :  { %v805_v62 = vsel %vm804_vm0, %v800_v59, inf }
0x3a7e   :  { %806 = vmin.xlane.f32.xlu0 %v805_v62  ;;  %v810_v21 = vshll.u32 %v809_v13, 16 }
0x3a7f   :  { %v834_v63 = vpop.xlane.xlu0 %833 }
0x3a80   :  { %vm835_vm4 = vcmp.eq.f32.partialorder %v832_v41, %v834_v63  ;;  %v840_v25 = vcvt.f32.s32 %v834_v63 }
0x3a81   :  { %v836_v51 = vsel %vm835_vm4, %v831_v49, inf }
0x3a82   :  { %837 = vmin.xlane.f32.xlu0 %v836_v51  ;;  %v841_v61 = vshll.u32 %v840_v25, 16 }
0x3abe   :  { %v2710_v12 = vpop.xlane.xlu1 %2709 }
0x3abf   :  { %vm2711_vm14 = vcmp.eq.f32.partialorder %v2708_v27, %v2710_v12  ;;  %v2716_v37 = vcvt.f32.s32 %v2710_v12 }
0x3ac0   :  { %v2712_v20 = vsel %vm2711_vm14, %v2707_v14, inf }
0x3ac1   :  { %2713 = vmin.xlane.f32.xlu1 %v2712_v20  ;;  %v2717_v35 = vshll.u32 %v2716_v37, 16 }
0x3ac2   :  { %v2739_v2 = vpop.xlane.xlu1 %2738 }
0x3ac3   :  { %vm2740_vm13 = vcmp.eq.f32.partialorder %v2737_v4, %v2739_v2  ;;  %v2745_v38 = vcvt.f32.s32 %v2739_v2 }
0x3ac4   :  { %v2741_v0 = vsel %vm2740_vm13, %v2736_v22, inf }
0x3ac5   :  { %2742 = vmin.xlane.f32.xlu1 %v2741_v0  ;;  %v2746_v43 = vshll.u32 %v2745_v38, 16 }
0x3ad4   :  { %v3926_v16 = vpop.f32.mrb[26].mxu1 }
0x3ad5   :  { %4093 = vst.msk [vmem:[%s5794_s14 + $0x8] sm:$0x1f] %vm5910_vm6, %v3926_v16  ;;  %v4395_v17 = vpop.f32.mrb[27].mxu1  ;;  %s4728_s14 = smov [#allocation7]  }
0x3ad6   :  { %s3938_s29 = sshll.u32 %s4728_s14, 4  ;;  %s3939_s29 = int_to_ptr.vmem [resolvable:$true] %s3938_s29 }
0x3ad7   :  { %s4621_s15 = scalar_lea.vmem %s3939_s29, 32  ;;  %p4626_p3 = scmp.lt.s32.totalorder %s3939_s29, %s3939_s29 }
0x3ad8   :  { %p4622_p2 = scmp.ne.s32.totalorder %s3939_s29, %s4621_s15  ;;  %p4627_p4 = scmp.lt.s32.totalorder %s4621_s15, %s4621_s15 }
0x3ada   :  { %p4628_p5 = por %p4627_p4, %p4626_p3 }
0x3adc   :  { %p4629_p6 = pnand %p4628_p5, %p4622_p2 }
0x3b0b   :  { %v807_v24 = vpop.xlane.xlu0 %806 }
0x3b0c   :  { %v808_v26 = vcvt.f32.s32 %v807_v24 }
0x3b0e   :  { %v811_v28 = vadd.s32 %v810_v21, %v808_v26 }
0x3b0f   :  { %v838_v29 = vpop.xlane.xlu0 %837 }
0x3b10   :  { %v839_v7 = vcvt.f32.s32 %v838_v29  ;;  %vm815_vm15 = vcmp.eq.s32.totalorder %v4945_v50, %v811_v28 }
0x3b11   :  { %v816_v31 = vsel %vm815_vm15, inf, %v5627_v23 }
0x3b12   :  { %v842_v32 = vadd.s32 %v841_v61, %v839_v7  ;;  %v817_v33 = vsel %vm5911_vm3, %v816_v31, inf }
0x3b13   :  { %818 = vmin.xlane.f32.xlu0 %v817_v33 }
0x3b14   :  { %vm845_vm7 = vcmp.eq.s32.totalorder %v4945_v50, %v842_v32 }
0x3b15   :  { %v846_v34 = vsel %vm845_vm7, -inf, %v5007_v19 }
0x3b16   :  { %v847_v18 = vsel %vm5905_vm1, %v846_v34, -inf }
0x3b17   :  { %848 = vmax.xlane.f32.xlu0 %v847_v18 }
0x3b4e   :  { %v2714_v8 = vpop.xlane.xlu1 %2713 }
0x3b4f   :  { %v2715_v40 = vcvt.f32.s32 %v2714_v8 }
0x3b51   :  { %v2718_v41 = vadd.s32 %v2717_v35, %v2715_v40 }
0x3b52   :  { %v2743_v42 = vpop.xlane.xlu1 %2742 }
0x3b53   :  { %v2744_v23 = vcvt.f32.s32 %v2743_v42  ;;  %vm2721_vm2 = vcmp.eq.s32.totalorder %v4945_v50, %v2718_v41 }
0x3b54   :  { %v2722_v44 = vsel %vm2721_vm2, inf, %v5635_v10 }
0x3b55   :  { %v2747_v45 = vadd.s32 %v2746_v43, %v2744_v23  ;;  %v2723_v53 = vsel %vm5912_vm10, %v2722_v44, inf }
0x3b56   :  { %2724 = vmin.xlane.f32.xlu1 %v2723_v53 }
0x3b57   :  { %vm2750_vm5 = vcmp.eq.s32.totalorder %v4945_v50, %v2747_v45 }
0x3b58   :  { %v2751_v19 = vsel %vm2750_vm5, -inf, %v5345_v9 }
0x3b59   :  { %v2752_v48 = vsel %vm5913_vm9, %v2751_v19, -inf }
0x3b5a   :  { %2753 = vmax.xlane.f32.xlu1 %v2752_v48 }
0x3b5b   :  { %4632 = shalt.err (!%p4629_p6)
}
0x3b5c   :  { %s4633_s18 = scalar_lea.hbm %s5789_s9, 32 }
0x3b5d   :  { %p4634_p7 = scmp.ne.s32.totalorder %s5789_s9, %s4633_s18  ;;  %p4637_p8 = scmp.lt.u32.totalorder %s4633_s18, %s5789_s9 }
0x3b5f   :  { %p4639_p9 = pnand %p4637_p8, %p4634_p7 }
0x3b61   :  { %4642 = shalt.err (!%p4639_p9)
}
0x3b62   :  { %3941 = dma.vmem_to_hbm [thread:$0]  %s3939_s29, 32, %s5789_s9, [#allocation4]  }
0x3b63   :  { %s4729_s2 = smov [#allocation11]  }
0x3b64   :  { %s3967_s6 = sshll.u32 %s4729_s2, 4  ;;  %s3968_s6 = int_to_ptr.vmem [resolvable:$true] %s3967_s6 }
0x3b65   :  { %s4643_s5 = scalar_lea.vmem %s3968_s6, 256  ;;  %p4648_p11 = scmp.lt.s32.totalorder %s3968_s6, %s3968_s6 }
0x3b66   :  { %p4644_p10 = scmp.ne.s32.totalorder %s3968_s6, %s4643_s5  ;;  %p4649_p12 = scmp.lt.s32.totalorder %s4643_s5, %s4643_s5 }
0x3b68   :  { %p4650_p13 = por %p4649_p12, %p4648_p11 }
0x3b6a   :  { %p4651_p0 = pnand %p4650_p13, %p4644_p10 }
0x3b6c   :  { %4654 = shalt.err (!%p4651_p0)
}
0x3b6d   :  { %s4655_s8 = scalar_lea.hbm %s5792_s12, 256 }
0x3b6e   :  { %p4656_p1 = scmp.ne.s32.totalorder %s5792_s12, %s4655_s8  ;;  %p4659_p2 = scmp.lt.u32.totalorder %s4655_s8, %s5792_s12 }
0x3b70   :  { %p4661_p3 = pnand %p4659_p2, %p4656_p1 }
0x3b72   :  { %4664 = shalt.err (!%p4661_p3)
}
0x3b73   :  { %3973 = dma.vmem_to_hbm [thread:$0]  %s3968_s6, 256, %s5792_s12, [#allocation12], %s4720_s23, %s4720_s23, %s4721_s24   ;;  %vm762_vm8 = vcmp.eq.s32.totalorder %v4945_v50, 1  ;;  %vm737_vm11 = vcmp.eq.s32.totalorder %v4945_v50, 0  ;;  %vm787_vm12 = vcmp.eq.s32.totalorder %v4945_v50, 2  ;;  %vm812_vm0 = vcmp.eq.s32.totalorder %v4945_v50, 3 }
0x3b74   :  { %v763_v9 = vsel %vm762_vm8, %v5571_v52, 0.0  ;;  %v738_v10 = vsel %vm737_vm11, %v5515_v39, 0.0  ;;  %v788_v54 = vsel %vm787_vm12, %v5615_v46, 0.0  ;;  %v813_v55 = vsel %vm812_vm0, %v5641_v1, 0.0  ;;  %s4730_s12 = smov [#allocation8]   ;;  %s4731_s24 = smov [#allocation10]  }
0x3b75   :  { %v764_v27 = vadd.f32 %v763_v9, %v738_v10  ;;  %vm820_vm4 = vcmp.eq.s32.totalorder %v4945_v50, 4  ;;  %vm1349_vm14 = vcmask 32768   ;;  %v843_v46 = vsel %vm737_vm11, %v5647_v36, 0.0  ;;  %s3948_s23 = sshll.u32 %s4730_s12, 4  ;;  %s3958_s13 = sshll.u32 %s4731_s24, 4  ;;  %s3949_s23 = int_to_ptr.vmem [resolvable:$true] %s3948_s23  ;;  %s3959_s13 = int_to_ptr.vmem [resolvable:$true] %s3958_s13 }
0x3b76   :  { %vm1351_vm13 = vcmask 8192   ;;  %v2671_v60 = vsel %vm762_vm8, %v5579_v58, 0.0  ;;  %v2647_v62 = vsel %vm737_vm11, %v5531_v6, 0.0  ;;  %v2695_v63 = vsel %vm787_vm12, %v5620_v56, 0.0  ;;  %s4665_s28 = scalar_lea.vmem %s3949_s23, 32  ;;  %p4670_p5 = scmp.lt.s32.totalorder %s3949_s23, %s3949_s23 }
0x3b77   :  { %v789_v3 = vadd.f32 %v788_v54, %v764_v27  ;;  %v2672_v36 = vadd.f32 %v2671_v60, %v2647_v62  ;;  %v2719_v49 = vsel %vm812_vm0, %v5654_v30, 0.0  ;;  %v2748_v56 = vsel %vm737_vm11, %v5660_v47, 0.0  ;;  %p4666_p4 = scmp.ne.s32.totalorder %s3949_s23, %s4665_s28  ;;  %p4671_p6 = scmp.lt.s32.totalorder %s4665_s28, %s4665_s28 }
0x3b79   :  { %v814_v4 = vadd.f32 %v813_v55, %v789_v3  ;;  %v2696_v51 = vadd.f32 %v2695_v63, %v2672_v36  ;;  %p4672_p7 = por %p4671_p6, %p4670_p5 }
0x3b7b   :  { %v2720_v5 = vadd.f32 %v2719_v49, %v2696_v51  ;;  %p4673_p8 = pnand %p4672_p7, %p4666_p4 }
0x3ba0   :  { %v819_v52 = vpop.xlane.xlu0 %818 }
0x3ba1   :  { %v821_v11 = vsel %vm820_vm4, %v819_v52, 0.0 }
0x3ba2   :  { %v822_v57 = vadd.f32 %v821_v11, %v814_v4 }
0x3ba4   :  { %v849_v39 = vpop.xlane.xlu0 %848  ;;  %1350 = vst.msk [vmem:[#allocation8] sm:$0x1] %vm1349_vm14, %v822_v57 }
0x3ba5   :  { %v850_v1 = vsel %vm762_vm8, %v849_v39, 0.0 }
0x3ba6   :  { %v851_v59 = vadd.f32 %v850_v1, %v843_v46 }
0x3ba8   :  { %1352 = vst.msk [vmem:[#allocation10] sm:$0x1] %vm1351_vm13, %v851_v59 }
0x3be3   :  { %v2725_v12 = vpop.xlane.xlu1 %2724 }
0x3be4   :  { %v2726_v58 = vsel %vm820_vm4, %v2725_v12, 0.0 }
0x3be5   :  { %v2727_v14 = vadd.f32 %v2726_v58, %v2720_v5 }
0x3be7   :  { %v2754_v6 = vpop.xlane.xlu1 %2753  ;;  %3233 = vst.msk [vmem:[#allocation8 + $0x1] sm:$0x1] %vm1349_vm14, %v2727_v14 }
0x3be8   :  { %v2755_v30 = vsel %vm762_vm8, %v2754_v6, 0.0 }
0x3be9   :  { %4676 = shalt.err (!%p4673_p8)
}
0x3bea   :  { %s4677_s15 = scalar_lea.hbm %s5790_s10, 32 }
0x3beb   :  { %p4678_p9 = scmp.ne.s32.totalorder %s5790_s10, %s4677_s15  ;;  %p4681_p10 = scmp.lt.u32.totalorder %s4677_s15, %s5790_s10 }
0x3bed   :  { %p4683_p11 = pnand %p4681_p10, %p4678_p9 }
0x3bef   :  { %4686 = shalt.err (!%p4683_p11)
}
0x3bf0   :  { %3951 = dma.vmem_to_hbm [thread:$0]  %s3949_s23, 32, %s5790_s10, [#allocation9]   ;;  %v2756_v50 = vadd.f32 %v2755_v30, %v2748_v56 }
0x3bf1   :  { %s4687_s0 = scalar_lea.vmem %s3959_s13, 32  ;;  %p4692_p13 = scmp.lt.s32.totalorder %s3959_s13, %s3959_s13 }
0x3bf2   :  { %3234 = vst.msk [vmem:[#allocation10 + $0x1] sm:$0x1] %vm1351_vm13, %v2756_v50  ;;  %p4688_p12 = scmp.ne.s32.totalorder %s3959_s13, %s4687_s0  ;;  %p4693_p0 = scmp.lt.s32.totalorder %s4687_s0, %s4687_s0 }
0x3bf4   :  { %p4694_p1 = por %p4693_p0, %p4692_p13 }
0x3bf6   :  { %p4695_p2 = pnand %p4694_p1, %p4688_p12 }
0x3bf8   :  { %4698 = shalt.err (!%p4695_p2)
}
0x3bf9   :  { %s4699_s2 = scalar_lea.hbm %s5791_s11, 32 }
0x3bfa   :  { %p4700_p3 = scmp.ne.s32.totalorder %s5791_s11, %s4699_s2  ;;  %p4703_p4 = scmp.lt.u32.totalorder %s4699_s2, %s5791_s11 }
0x3bfc   :  { %p4705_p5 = pnand %p4703_p4, %p4700_p3 }
0x3bfe   :  { %4708 = shalt.err (!%p4705_p5)
}
0x3bff   :  { %3961 = dma.vmem_to_hbm [thread:$0]  %s3959_s13, 32, %s5791_s11, [#allocation9]  }
0x3c00   :  { %4713 = dma.done.wait [#allocation4], 32  }
0x3c01   :  { %4714 = vsyncadd [#allocation4], 4294967264 }
0x3c02   :  { %4715 = dma.done.wait [#allocation9], 64  }
0x3c03   :  { %4716 = vsyncadd [#allocation9], 4294967232 }
0x3c04   :  { %4717 = dma.done.wait [#allocation12], 256  }
0x3c05   :  { %4718 = vsyncadd [#allocation12], 4294967040 }
0x3c06   :  { %3994 = vsyncpa [#allocation3], 1 }
0x3c07   :  { %3995 = vsyncpa [#allocation6], 1 }
0x3c08   :  { %3996 = vsyncpa [#allocation4], 1 }
0x3c09   :  { %3997 = vsyncpa [#allocation9], 1 }
0x3c0a   :  { %3998 = vsyncpa [#allocation12], 1 }

</bundles_post_ra>
